<compile_context>
chip_gen: v7x
topology: tpu7x:2x2x1
jax: 0.10.0
libtpu: 0.0.40
codegen_flags: <defaults>
</compile_context>

<pallas_src>
import math

import jax
import jax.numpy as jnp
import numpy as np
from jax.experimental import pallas as pl
from jax.experimental.pallas import tpu as pltpu

HI = jax.lax.Precision.HIGHEST
C_RED = 16  # num_channels_reduced in the PyTorch module


def _wse_layout(C, n_branch, B):
    """Row layout of the f32 SE-head/bias/mask pack (shared by packer & kernel)."""
    row_b1 = C_RED + C          # b1 row
    row_b2 = row_b1 + 1         # b2 row
    row_fc = row_b1 + 2         # [fcw(3), fcb]
    row_bo = row_b1 + 3         # per-branch output-projection bias rows
    row_mask = ((row_bo + n_branch + 7) // 8) * 8
    mask_stride = ((2 * B + 7) // 8) * 8
    rows = row_mask + mask_stride * n_branch
    return row_b1, row_b2, row_fc, row_bo, row_mask, mask_stride, rows


# ----------------------------- Pallas kernel --------------------------------
def _make_kernel(B, C, T, kersizes):
    kmax = max(kersizes)
    BT = B * T
    inv_sqrt = 1.0 / math.sqrt(C)
    row_b1, row_b2, row_fc, row_bo, row_mask, mask_stride, _ = _wse_layout(
        C, len(kersizes), B)

    def kernel(xsh_ref, xt_ref, convp_ref, watt_ref, wse_ref, o_ref):
        feats = []  # per-branch pooled+projected features, (B, C)
        for i, ksz in enumerate(kersizes):
            base = i * kmax

            # depthwise "valid" conv along time, channels-first (C, B*T).
            # Shifted copies come from the host stack (no rolls, no narrow
            # slices); columns t >= Tp per batch segment are garbage and are
            # masked downstream.  Conv bias is folded into beff (host).
            acc = xsh_ref[0] * convp_ref[:, base:base + 1]
            for j in range(1, ksz):
                acc = acc + xsh_ref[j] * convp_ref[:, base + j:base + j + 1]
            xc = acc.astype(jnp.bfloat16)                       # (C, B*T)

            wa = watt_ref[i]                                    # (4C, 128) bf16
            w_qkv = wa[0:3 * C, 0:C]                            # (3C, C)
            beff = wa[0:3 * C, C:C + 1]                         # (3C, 1) = W@cb + b
            w_o = wa[3 * C:4 * C, 0:C]                          # (C, C)

            # fused Q/K/V projection for the whole batch: one bf16 MXU call
            qkv = jax.lax.dot_general(
                w_qkv, xc, (((1,), (0,)), ((), ())),
                preferred_element_type=jnp.float32) + beff.astype(jnp.float32)
            q = qkv[0:C, :]                                     # (C, B*T)
            k = qkv[C:2 * C, :]
            v = qkv[2 * C:3 * C, :]

            # sigmoid attention scores (cross-batch / t>=Tp blocks are masked
            # away by the host-precomputed pool / selection masks below)
            scores = jax.lax.dot_general(
                q.astype(jnp.bfloat16), k.astype(jnp.bfloat16),
                (((0,), (0,)), ((), ())),
                preferred_element_type=jnp.float32) * inv_sqrt   # (B*T, B*T)
            # approx EUP reciprocal; clamp so exp of garbage columns stays finite
            sig = pl.reciprocal(1.0 + jnp.exp(jnp.minimum(-scores, 60.0)),
                                approx=True)

            mrow = row_mask + mask_stride * i
            pool01 = wse_ref[mrow:mrow + B, 0:BT]               # 0/1: same batch, t1<Tp
            selm = wse_ref[mrow + B:mrow + 2 * B, 0:BT]         # (1/Tp)*[same batch, t2<Tp]

            # AdaptiveAvgPool1d(1) folded in before the V-contraction and the
            # output projection (mean commutes with the affine map).
            s_mean = jax.lax.dot_general(
                pool01.astype(jnp.bfloat16), sig.astype(jnp.bfloat16),
                (((1,), (0,)), ((), ())),
                preferred_element_type=jnp.float32)              # (B, B*T)
            s_sel = s_mean * selm                                # (B, B*T)

            pooled = jax.lax.dot_general(
                s_sel.astype(jnp.bfloat16), v.astype(jnp.bfloat16),
                (((1,), (1,)), ((), ())),
                preferred_element_type=jnp.float32)              # (B, C)

            b_o = wse_ref[row_bo + i:row_bo + i + 1, 0:C]        # (1, C)
            fo = jax.lax.dot_general(
                pooled.astype(jnp.bfloat16), w_o,
                (((1,), (1,)), ((), ())),
                preferred_element_type=jnp.float32) + b_o        # (B, C)
            feats.append(jnp.maximum(fo, 0.0))

        # ---------------------- SE head (batch-major, bf16 MXU) --------------
        fc = wse_ref[row_fc:row_fc + 1, 0:8]                     # [fcw0..2, fcb]
        squeeze = (feats[0] * fc[:, 0:1] + feats[1] * fc[:, 1:2]
                   + feats[2] * fc[:, 2:3] + fc[:, 3:4])         # (B, C)

        w1 = wse_ref[0:C_RED, 0:C]                               # (16, C)
        w2 = wse_ref[C_RED:C_RED + C, 0:C_RED]                   # (C, 16)
        b1 = wse_ref[row_b1:row_b1 + 1, 0:C_RED]                 # (1, 16)
        b2 = wse_ref[row_b2:row_b2 + 1, 0:C]                     # (1, C)

        h1 = jnp.maximum(
            jax.lax.dot_general(squeeze.astype(jnp.bfloat16),
                                w1.astype(jnp.bfloat16),
                                (((1,), (1,)), ((), ())),
                                preferred_element_type=jnp.float32) + b1, 0.0)  # (B,16)
        logits = jax.lax.dot_general(h1.astype(jnp.bfloat16),
                                     w2.astype(jnp.bfloat16),
                                     (((1,), (1,)), ((), ())),
                                     preferred_element_type=jnp.float32) + b2   # (B,C)
        scale = 1.0 / (1.0 + jnp.exp(jnp.minimum(-logits, 60.0)))               # exact

        # lane-dense scale line (lane = b*C + c), one unmasked full-width store
        scale_line = jnp.concatenate([scale[b:b + 1, :] for b in range(B)],
                                     axis=1)                     # (1, B*C)
        o_ref[...] = xt_ref[...] * scale_line

    return kernel


# --------------------------- host-side packing -------------------------------
def pack_params(params, B, C, T, kersizes):
    kmax = max(kersizes)
    names = ("small", "middle", "large")
    row_b1, row_b2, row_fc, row_bo, row_mask, mask_stride, rows = _wse_layout(
        C, len(names), B)

    # conv taps, channels-first, lanes padded to 128 (branch i uses cols
    # [i*kmax, i*kmax + ksz_i)); conv bias is folded into beff below.
    convp = np.zeros((C, 128), np.float32)
    for i, name in enumerate(names):
        convp[:, i * kmax:i * kmax + kersizes[i]] = np.asarray(params[name]["cw"])

    # attention pack (bf16, MXU-native): per branch rows [Wq;Wk;Wv;Wo],
    # column C holds the effective Q/K/V bias (W @ conv_bias + b).
    watts = []
    for name in names:
        p = params[name]
        cb = np.asarray(p["cb"])
        blk = np.zeros((4 * C, 128), np.float32)
        for r, (wn, bn) in enumerate((("wq", "bq"), ("wk", "bk"), ("wv", "bv"))):
            w = np.asarray(p[wn])
            blk[r * C:(r + 1) * C, 0:C] = w
            blk[r * C:(r + 1) * C, C] = w @ cb + np.asarray(p[bn])
        blk[3 * C:4 * C, 0:C] = np.asarray(p["wo"])
        watts.append(blk)
    watt = jnp.asarray(np.stack(watts, axis=0)).astype(jnp.bfloat16)  # (3, 4C, 128)

    # f32 pack: SE-head params, output-projection biases, pooling/selection masks
    wse = np.zeros((rows, 128), np.float32)
    wse[0:C_RED, 0:C] = np.asarray(params["w1"])
    wse[C_RED:C_RED + C, 0:C_RED] = np.asarray(params["w2"])
    wse[row_b1, 0:C_RED] = np.asarray(params["b1"])
    wse[row_b2, 0:C] = np.asarray(params["b2"])
    wse[row_fc, 0:3] = np.asarray(params["fcw"]).reshape(-1)
    wse[row_fc, 3] = float(np.asarray(params["fcb"]).reshape(-1)[0])
    for i, name in enumerate(names):
        wse[row_bo + i, 0:C] = np.asarray(params[name]["bo"])
        Tp = T - kersizes[i] + 1
        mrow = row_mask + mask_stride * i
        for b in range(B):
            wse[mrow + b, b * T:b * T + Tp] = 1.0            # pool: same batch, t1<Tp
            wse[mrow + B + b, b * T:b * T + Tp] = 1.0 / Tp   # select: same batch, t2<Tp
    return jnp.asarray(convp), watt, jnp.asarray(wse)


def _prep_x(x, kmax):
    """Layout plumbing (wrapper-side): shifted channels-first stack + (T, B*C) slab."""
    B, C, T = x.shape
    xp = jnp.pad(x, ((0, 0), (0, 0), (0, kmax)))
    xsh = jnp.stack(
        [jnp.transpose(xp[:, :, j:j + T], (1, 0, 2)).reshape(C, B * T)
         for j in range(kmax)], axis=0)                      # (kmax, C, B*T)
    xt = jnp.transpose(x, (2, 0, 1)).reshape(T, B * C)       # (T, B*C), lane-dense
    return xsh, xt


def channel_time_sense_attention_se(x, params, kersizes):
    B, C, T = x.shape
    kmax = max(kersizes)
    xsh, xt = _prep_x(x, kmax)
    convp, watt, wse = pack_params(params, B, C, T, kersizes)
    kernel = _make_kernel(B, C, T, kersizes)
    out_t = pl.pallas_call(
        kernel,
        out_shape=jax.ShapeDtypeStruct((T, B * C), jnp.float32),
        grid=(1,),
        in_specs=[
            pl.BlockSpec(xsh.shape, lambda i: (0, 0, 0)),
            pl.BlockSpec(xt.shape, lambda i: (0, 0)),
            pl.BlockSpec(convp.shape, lambda i: (0, 0)),
            pl.BlockSpec(watt.shape, lambda i: (0, 0, 0)),
            pl.BlockSpec(wse.shape, lambda i: (0, 0)),
        ],
        out_specs=pl.BlockSpec((T, B * C), lambda i: (0, 0)),
        compiler_params=pltpu.CompilerParams(dimension_semantics=("arbitrary",)),
    )(xsh, xt, convp, watt, wse)
    return jnp.transpose(out_t.reshape(T, B, C), (1, 2, 0))


# ---------------- pure-JAX reference (mirrors the PyTorch forward) -----------
def reference(x, params, kersizes, mxu_bf16=True):
    """With mxu_bf16=True, matmul operands are rounded to bf16 (f32 accum) to
    emulate the MXU-native precision the kernel uses."""
    B, C, T = x.shape

    def rnd(a):
        return a.astype(jnp.bfloat16).astype(jnp.float32) if mxu_bf16 else a

    def branch(p, k):
        Tp = T - k + 1
        cw, cb = p["cw"], p["cb"]
        y = cb[None, :, None] + sum(
            x[:, :, j:j + Tp] * cw[:, j][None, :, None] for j in range(k))
        yt = jnp.transpose(y, (0, 2, 1))                     # (B, Tp, C)
        q = jnp.einsum("btc,dc->btd", rnd(yt), rnd(p["wq"]), precision=HI) + p["bq"]
        kk = jnp.einsum("btc,dc->btd", rnd(yt), rnd(p["wk"]), precision=HI) + p["bk"]
        v = jnp.einsum("btc,dc->btd", rnd(yt), rnd(p["wv"]), precision=HI) + p["bv"]
        scores = jax.nn.sigmoid(
            jnp.einsum("btd,bsd->bts", rnd(q), rnd(kk), precision=HI) / math.sqrt(C))
        out = jnp.einsum("bts,bsd->btd", rnd(scores), rnd(v), precision=HI)
        out = jnp.einsum("btd,ed->bte", rnd(out), rnd(p["wo"]), precision=HI) + p["bo"]
        return jnp.maximum(jnp.mean(out, axis=1), 0.0)       # (B, C)

    names = ("small", "middle", "large")
    feats = [branch(params[n], kersizes[i]) for i, n in enumerate(names)]
    feature = jnp.stack(feats, axis=2)                       # (B, C, 3)
    squeeze = jnp.einsum("bcf,f->bc", feature, params["fcw"]) + params["fcb"]
    h1 = jnp.maximum(
        jnp.einsum("bc,hc->bh", rnd(squeeze), rnd(params["w1"]), precision=HI)
        + params["b1"], 0.0)
    scale = jax.nn.sigmoid(
        jnp.einsum("bh,ch->bc", rnd(h1), rnd(params["w2"]), precision=HI)
        + params["b2"])
    return x * scale[:, :, None]


# ---------------- deterministic parameter init --------------------------------
def init_params(key, C, kersizes):
    names = ("small", "middle", "large")
    keys = iter(jax.random.split(key, 40))
    params = {}
    for n, k in zip(names, kersizes):
        params[n] = dict(
            cw=jax.random.normal(next(keys), (C, k), jnp.float32) / math.sqrt(k),
            cb=jax.random.normal(next(keys), (C,), jnp.float32) * 0.1,
            wq=jax.random.normal(next(keys), (C, C), jnp.float32) / math.sqrt(C),
            bq=jax.random.normal(next(keys), (C,), jnp.float32) * 0.1,
            wk=jax.random.normal(next(keys), (C, C), jnp.float32) / math.sqrt(C),
            bk=jax.random.normal(next(keys), (C,), jnp.float32) * 0.1,
            wv=jax.random.normal(next(keys), (C, C), jnp.float32) / math.sqrt(C),
            bv=jax.random.normal(next(keys), (C,), jnp.float32) * 0.1,
            wo=jax.random.normal(next(keys), (C, C), jnp.float32) / math.sqrt(C),
            bo=jax.random.normal(next(keys), (C,), jnp.float32) * 0.1,
        )
    params["fcw"] = jax.random.normal(next(keys), (3,), jnp.float32) / math.sqrt(3)
    params["fcb"] = jax.random.normal(next(keys), (), jnp.float32) * 0.1
    params["w1"] = jax.random.normal(next(keys), (C_RED, C), jnp.float32) / math.sqrt(C)
    params["b1"] = jax.random.normal(next(keys), (C_RED,), jnp.float32) * 0.1
    params["w2"] = jax.random.normal(next(keys), (C, C_RED), jnp.float32) / math.sqrt(C_RED)
    params["b2"] = jax.random.normal(next(keys), (C,), jnp.float32) * 0.1
    return params


if __name__ == "__main__":
    B, C, T = 2, 64, 32
    kersizes = (3, 5, 10)

    kx, kp = jax.random.split(jax.random.PRNGKey(0))
    x = jax.random.normal(kx, (B, C, T), jnp.float32)
    params = init_params(kp, C, kersizes)

    out = jax.block_until_ready(channel_time_sense_attention_se(x, params, kersizes))

    # Kernel feeds bf16 operands to the MXU (f32 accumulation) and uses the
    # approx EUP reciprocal for the score sigmoids; compare against a reference
    # with matching bf16 operand rounding.  Tolerance covers the remaining
    # rounding-point / accumulation-order / approx-reciprocal differences.
    ref = reference(x, params, kersizes, mxu_bf16=True)
    np.testing.assert_allclose(np.asarray(out), np.asarray(ref), rtol=4e-2, atol=4e-2)

    print("KERNEL_OK")
</pallas_src>

<mosaic_0001>
module attributes {stable_mosaic.version = 11 : i64} {
  func.func @kernel(%arg0: i32, %arg1: memref<10x64x64xf32, #tpu.memory_space<vmem>>, %arg2: memref<32x128xf32, #tpu.memory_space<vmem>>, %arg3: memref<64x128xf32, #tpu.memory_space<vmem>>, %arg4: memref<3x256x128xbf16, #tpu.memory_space<vmem>>, %arg5: memref<112x128xf32, #tpu.memory_space<vmem>>, %arg6: memref<32x128xf32, #tpu.memory_space<vmem>>) attributes {dimension_semantics = [#tpu.dimension_semantics<arbitrary>], iteration_bounds = array<i64: 1>, scalar_prefetch = 0 : i64, scratch_operands = 0 : i64, tpu.core_type = #tpu.core_type<tc>, window_params = [{pipeline_mode = #tpu.pipeline_mode<synchronous>, transform_indices = @transform_0, window_bounds = array<i64: 10, 64, 64>}, {pipeline_mode = #tpu.pipeline_mode<synchronous>, transform_indices = @transform_1, window_bounds = array<i64: 32, 128>}, {pipeline_mode = #tpu.pipeline_mode<synchronous>, transform_indices = @transform_2, window_bounds = array<i64: 64, 128>}, {pipeline_mode = #tpu.pipeline_mode<synchronous>, transform_indices = @transform_3, window_bounds = array<i64: 3, 256, 128>}, {pipeline_mode = #tpu.pipeline_mode<synchronous>, transform_indices = @transform_4, window_bounds = array<i64: 112, 128>}, {pipeline_mode = #tpu.pipeline_mode<synchronous>, transform_indices = @transform_5, window_bounds = array<i64: 32, 128>}]} {
    %c0 = arith.constant 0 : index
    %c0_0 = arith.constant 0 : index
    %c0_1 = arith.constant 0 : index
    %0 = vector.load %arg1[%c0, %c0_0, %c0_1] : memref<10x64x64xf32, #tpu.memory_space<vmem>>, vector<1x64x64xf32>
    %1 = vector.shape_cast %0 : vector<1x64x64xf32> to vector<64x64xf32>
    %c0_2 = arith.constant 0 : index
    %c0_3 = arith.constant 0 : index
    %2 = vector.load %arg3[%c0_2, %c0_3] : memref<64x128xf32, #tpu.memory_space<vmem>>, vector<64x1xf32>
    %3 = vector.broadcast %2 : vector<64x1xf32> to vector<64x64xf32>
    %4 = arith.mulf %1, %3 : vector<64x64xf32>
    %c1 = arith.constant 1 : index
    %c0_4 = arith.constant 0 : index
    %c0_5 = arith.constant 0 : index
    %5 = vector.load %arg1[%c1, %c0_4, %c0_5] : memref<10x64x64xf32, #tpu.memory_space<vmem>>, vector<1x64x64xf32>
    %6 = vector.shape_cast %5 : vector<1x64x64xf32> to vector<64x64xf32>
    %c0_6 = arith.constant 0 : index
    %c1_7 = arith.constant 1 : index
    %7 = vector.load %arg3[%c0_6, %c1_7] : memref<64x128xf32, #tpu.memory_space<vmem>>, vector<64x1xf32>
    %8 = vector.broadcast %7 : vector<64x1xf32> to vector<64x64xf32>
    %9 = arith.mulf %6, %8 : vector<64x64xf32>
    %10 = arith.addf %4, %9 : vector<64x64xf32>
    %c2 = arith.constant 2 : index
    %c0_8 = arith.constant 0 : index
    %c0_9 = arith.constant 0 : index
    %11 = vector.load %arg1[%c2, %c0_8, %c0_9] : memref<10x64x64xf32, #tpu.memory_space<vmem>>, vector<1x64x64xf32>
    %12 = vector.shape_cast %11 : vector<1x64x64xf32> to vector<64x64xf32>
    %c0_10 = arith.constant 0 : index
    %c2_11 = arith.constant 2 : index
    %13 = vector.load %arg3[%c0_10, %c2_11] : memref<64x128xf32, #tpu.memory_space<vmem>>, vector<64x1xf32>
    %14 = vector.broadcast %13 : vector<64x1xf32> to vector<64x64xf32>
    %15 = arith.mulf %12, %14 : vector<64x64xf32>
    %16 = arith.addf %10, %15 : vector<64x64xf32>
    %17 = arith.truncf %16 : vector<64x64xf32> to vector<64x64xbf16>
    %c0_12 = arith.constant 0 : index
    %c0_13 = arith.constant 0 : index
    %c0_14 = arith.constant 0 : index
    %18 = vector.load %arg4[%c0_12, %c0_13, %c0_14] : memref<3x256x128xbf16, #tpu.memory_space<vmem>>, vector<1x256x128xbf16>
    %19 = vector.shape_cast %18 : vector<1x256x128xbf16> to vector<256x128xbf16>
    %20 = vector.extract_strided_slice %19 {offsets = [0, 0], sizes = [192, 64], strides = [1, 1]} : vector<256x128xbf16> to vector<192x64xbf16>
    %21 = vector.extract_strided_slice %19 {offsets = [0, 64], sizes = [192, 1], strides = [1, 1]} : vector<256x128xbf16> to vector<192x1xbf16>
    %22 = vector.extract_strided_slice %19 {offsets = [192, 0], sizes = [64, 64], strides = [1, 1]} : vector<256x128xbf16> to vector<64x64xbf16>
    %cst = arith.constant dense<0.000000e+00> : vector<192x64xf32>
    %23 = tpu.matmul %20, %17, %cst {dimension_numbers = #tpu.dot_dimension_numbers<[1], [0], [0], [1], [0, 0, 1, 1], [], []>} : vector<192x64xbf16>, vector<64x64xbf16>, vector<192x64xf32> -> vector<192x64xf32>
    %24 = arith.extf %21 : vector<192x1xbf16> to vector<192x1xf32>
    %25 = vector.broadcast %24 : vector<192x1xf32> to vector<192x64xf32>
    %26 = arith.addf %23, %25 : vector<192x64xf32>
    %27 = vector.extract_strided_slice %26 {offsets = [0, 0], sizes = [64, 64], strides = [1, 1]} : vector<192x64xf32> to vector<64x64xf32>
    %28 = vector.extract_strided_slice %26 {offsets = [64, 0], sizes = [64, 64], strides = [1, 1]} : vector<192x64xf32> to vector<64x64xf32>
    %29 = vector.extract_strided_slice %26 {offsets = [128, 0], sizes = [64, 64], strides = [1, 1]} : vector<192x64xf32> to vector<64x64xf32>
    %30 = arith.truncf %27 : vector<64x64xf32> to vector<64x64xbf16>
    %31 = arith.truncf %28 : vector<64x64xf32> to vector<64x64xbf16>
    %cst_15 = arith.constant dense<0.000000e+00> : vector<64x64xf32>
    %32 = tpu.matmul %30, %31, %cst_15 {dimension_numbers = #tpu.dot_dimension_numbers<[0], [0], [1], [1], [0, 1, 1, 1], [], []>} : vector<64x64xbf16>, vector<64x64xbf16>, vector<64x64xf32> -> vector<64x64xf32>
    %cst_16 = arith.constant 1.250000e-01 : f32
    %33 = vector.broadcast %cst_16 : f32 to vector<64x64xf32>
    %34 = arith.mulf %32, %33 : vector<64x64xf32>
    %cst_17 = arith.constant 0.000000e+00 : f32
    %35 = vector.broadcast %cst_17 : f32 to vector<64x64xf32>
    %36 = arith.subf %35, %34 : vector<64x64xf32>
    %cst_18 = arith.constant 6.000000e+01 : f32
    %37 = vector.broadcast %cst_18 : f32 to vector<64x64xf32>
    %38 = arith.minimumf %36, %37 : vector<64x64xf32>
    %39 = math.exp %38 : vector<64x64xf32>
    %cst_19 = arith.constant 1.000000e+00 : f32
    %40 = vector.broadcast %cst_19 : f32 to vector<64x64xf32>
    %41 = arith.addf %40, %39 : vector<64x64xf32>
    %42 = tpu.reciprocal %41 {approx = true} : vector<64x64xf32> -> vector<64x64xf32>
    %c88 = arith.constant 88 : index
    %c0_20 = arith.constant 0 : index
    %43 = vector.load %arg5[%c88, %c0_20] : memref<112x128xf32, #tpu.memory_space<vmem>>, vector<2x64xf32>
    %c90 = arith.constant 90 : index
    %c0_21 = arith.constant 0 : index
    %44 = vector.load %arg5[%c90, %c0_21] : memref<112x128xf32, #tpu.memory_space<vmem>>, vector<2x64xf32>
    %45 = arith.truncf %43 : vector<2x64xf32> to vector<2x64xbf16>
    %46 = arith.truncf %42 : vector<64x64xf32> to vector<64x64xbf16>
    %cst_22 = arith.constant dense<0.000000e+00> : vector<2x64xf32>
    %47 = tpu.matmul %45, %46, %cst_22 {dimension_numbers = #tpu.dot_dimension_numbers<[1], [0], [0], [1], [0, 0, 1, 1], [], []>} : vector<2x64xbf16>, vector<64x64xbf16>, vector<2x64xf32> -> vector<2x64xf32>
    %48 = arith.mulf %47, %44 : vector<2x64xf32>
    %49 = arith.truncf %48 : vector<2x64xf32> to vector<2x64xbf16>
    %50 = arith.truncf %29 : vector<64x64xf32> to vector<64x64xbf16>
    %cst_23 = arith.constant dense<0.000000e+00> : vector<2x64xf32>
    %51 = tpu.matmul %49, %50, %cst_23 {dimension_numbers = #tpu.dot_dimension_numbers<[1], [1], [0], [0], [0, 0, 1, 0], [], []>} : vector<2x64xbf16>, vector<64x64xbf16>, vector<2x64xf32> -> vector<2x64xf32>
    %c83 = arith.constant 83 : index
    %c0_24 = arith.constant 0 : index
    %52 = vector.load %arg5[%c83, %c0_24] : memref<112x128xf32, #tpu.memory_space<vmem>>, vector<1x64xf32>
    %53 = arith.truncf %51 : vector<2x64xf32> to vector<2x64xbf16>
    %cst_25 = arith.constant dense<0.000000e+00> : vector<2x64xf32>
    %54 = tpu.matmul %53, %22, %cst_25 {dimension_numbers = #tpu.dot_dimension_numbers<[1], [1], [0], [0], [0, 0, 1, 0], [], []>} : vector<2x64xbf16>, vector<64x64xbf16>, vector<2x64xf32> -> vector<2x64xf32>
    %55 = vector.broadcast %52 : vector<1x64xf32> to vector<2x64xf32>
    %56 = arith.addf %54, %55 : vector<2x64xf32>
    %cst_26 = arith.constant 0.000000e+00 : f32
    %57 = vector.broadcast %cst_26 : f32 to vector<2x64xf32>
    %58 = arith.maximumf %56, %57 : vector<2x64xf32>
    %c0_27 = arith.constant 0 : index
    %c0_28 = arith.constant 0 : index
    %c0_29 = arith.constant 0 : index
    %59 = vector.load %arg1[%c0_27, %c0_28, %c0_29] : memref<10x64x64xf32, #tpu.memory_space<vmem>>, vector<1x64x64xf32>
    %60 = vector.shape_cast %59 : vector<1x64x64xf32> to vector<64x64xf32>
    %c0_30 = arith.constant 0 : index
    %c10 = arith.constant 10 : index
    %61 = vector.load %arg3[%c0_30, %c10] : memref<64x128xf32, #tpu.memory_space<vmem>>, vector<64x1xf32>
    %62 = vector.broadcast %61 : vector<64x1xf32> to vector<64x64xf32>
    %63 = arith.mulf %60, %62 : vector<64x64xf32>
    %c1_31 = arith.constant 1 : index
    %c0_32 = arith.constant 0 : index
    %c0_33 = arith.constant 0 : index
    %64 = vector.load %arg1[%c1_31, %c0_32, %c0_33] : memref<10x64x64xf32, #tpu.memory_space<vmem>>, vector<1x64x64xf32>
    %65 = vector.shape_cast %64 : vector<1x64x64xf32> to vector<64x64xf32>
    %c0_34 = arith.constant 0 : index
    %c11 = arith.constant 11 : index
    %66 = vector.load %arg3[%c0_34, %c11] : memref<64x128xf32, #tpu.memory_space<vmem>>, vector<64x1xf32>
    %67 = vector.broadcast %66 : vector<64x1xf32> to vector<64x64xf32>
    %68 = arith.mulf %65, %67 : vector<64x64xf32>
    %69 = arith.addf %63, %68 : vector<64x64xf32>
    %c2_35 = arith.constant 2 : index
    %c0_36 = arith.constant 0 : index
    %c0_37 = arith.constant 0 : index
    %70 = vector.load %arg1[%c2_35, %c0_36, %c0_37] : memref<10x64x64xf32, #tpu.memory_space<vmem>>, vector<1x64x64xf32>
    %71 = vector.shape_cast %70 : vector<1x64x64xf32> to vector<64x64xf32>
    %c0_38 = arith.constant 0 : index
    %c12 = arith.constant 12 : index
    %72 = vector.load %arg3[%c0_38, %c12] : memref<64x128xf32, #tpu.memory_space<vmem>>, vector<64x1xf32>
    %73 = vector.broadcast %72 : vector<64x1xf32> to vector<64x64xf32>
    %74 = arith.mulf %71, %73 : vector<64x64xf32>
    %75 = arith.addf %69, %74 : vector<64x64xf32>
    %c3 = arith.constant 3 : index
    %c0_39 = arith.constant 0 : index
    %c0_40 = arith.constant 0 : index
    %76 = vector.load %arg1[%c3, %c0_39, %c0_40] : memref<10x64x64xf32, #tpu.memory_space<vmem>>, vector<1x64x64xf32>
    %77 = vector.shape_cast %76 : vector<1x64x64xf32> to vector<64x64xf32>
    %c0_41 = arith.constant 0 : index
    %c13 = arith.constant 13 : index
    %78 = vector.load %arg3[%c0_41, %c13] : memref<64x128xf32, #tpu.memory_space<vmem>>, vector<64x1xf32>
    %79 = vector.broadcast %78 : vector<64x1xf32> to vector<64x64xf32>
    %80 = arith.mulf %77, %79 : vector<64x64xf32>
    %81 = arith.addf %75, %80 : vector<64x64xf32>
    %c4 = arith.constant 4 : index
    %c0_42 = arith.constant 0 : index
    %c0_43 = arith.constant 0 : index
    %82 = vector.load %arg1[%c4, %c0_42, %c0_43] : memref<10x64x64xf32, #tpu.memory_space<vmem>>, vector<1x64x64xf32>
    %83 = vector.shape_cast %82 : vector<1x64x64xf32> to vector<64x64xf32>
    %c0_44 = arith.constant 0 : index
    %c14 = arith.constant 14 : index
    %84 = vector.load %arg3[%c0_44, %c14] : memref<64x128xf32, #tpu.memory_space<vmem>>, vector<64x1xf32>
    %85 = vector.broadcast %84 : vector<64x1xf32> to vector<64x64xf32>
    %86 = arith.mulf %83, %85 : vector<64x64xf32>
    %87 = arith.addf %81, %86 : vector<64x64xf32>
    %88 = arith.truncf %87 : vector<64x64xf32> to vector<64x64xbf16>
    %c1_45 = arith.constant 1 : index
    %c0_46 = arith.constant 0 : index
    %c0_47 = arith.constant 0 : index
    %89 = vector.load %arg4[%c1_45, %c0_46, %c0_47] : memref<3x256x128xbf16, #tpu.memory_space<vmem>>, vector<1x256x128xbf16>
    %90 = vector.shape_cast %89 : vector<1x256x128xbf16> to vector<256x128xbf16>
    %91 = vector.extract_strided_slice %90 {offsets = [0, 0], sizes = [192, 64], strides = [1, 1]} : vector<256x128xbf16> to vector<192x64xbf16>
    %92 = vector.extract_strided_slice %90 {offsets = [0, 64], sizes = [192, 1], strides = [1, 1]} : vector<256x128xbf16> to vector<192x1xbf16>
    %93 = vector.extract_strided_slice %90 {offsets = [192, 0], sizes = [64, 64], strides = [1, 1]} : vector<256x128xbf16> to vector<64x64xbf16>
    %cst_48 = arith.constant dense<0.000000e+00> : vector<192x64xf32>
    %94 = tpu.matmul %91, %88, %cst_48 {dimension_numbers = #tpu.dot_dimension_numbers<[1], [0], [0], [1], [0, 0, 1, 1], [], []>} : vector<192x64xbf16>, vector<64x64xbf16>, vector<192x64xf32> -> vector<192x64xf32>
    %95 = arith.extf %92 : vector<192x1xbf16> to vector<192x1xf32>
    %96 = vector.broadcast %95 : vector<192x1xf32> to vector<192x64xf32>
    %97 = arith.addf %94, %96 : vector<192x64xf32>
    %98 = vector.extract_strided_slice %97 {offsets = [0, 0], sizes = [64, 64], strides = [1, 1]} : vector<192x64xf32> to vector<64x64xf32>
    %99 = vector.extract_strided_slice %97 {offsets = [64, 0], sizes = [64, 64], strides = [1, 1]} : vector<192x64xf32> to vector<64x64xf32>
    %100 = vector.extract_strided_slice %97 {offsets = [128, 0], sizes = [64, 64], strides = [1, 1]} : vector<192x64xf32> to vector<64x64xf32>
    %101 = arith.truncf %98 : vector<64x64xf32> to vector<64x64xbf16>
    %102 = arith.truncf %99 : vector<64x64xf32> to vector<64x64xbf16>
    %cst_49 = arith.constant dense<0.000000e+00> : vector<64x64xf32>
    %103 = tpu.matmul %101, %102, %cst_49 {dimension_numbers = #tpu.dot_dimension_numbers<[0], [0], [1], [1], [0, 1, 1, 1], [], []>} : vector<64x64xbf16>, vector<64x64xbf16>, vector<64x64xf32> -> vector<64x64xf32>
    %cst_50 = arith.constant 1.250000e-01 : f32
    %104 = vector.broadcast %cst_50 : f32 to vector<64x64xf32>
    %105 = arith.mulf %103, %104 : vector<64x64xf32>
    %cst_51 = arith.constant 0.000000e+00 : f32
    %106 = vector.broadcast %cst_51 : f32 to vector<64x64xf32>
    %107 = arith.subf %106, %105 : vector<64x64xf32>
    %cst_52 = arith.constant 6.000000e+01 : f32
    %108 = vector.broadcast %cst_52 : f32 to vector<64x64xf32>
    %109 = arith.minimumf %107, %108 : vector<64x64xf32>
    %110 = math.exp %109 : vector<64x64xf32>
    %cst_53 = arith.constant 1.000000e+00 : f32
    %111 = vector.broadcast %cst_53 : f32 to vector<64x64xf32>
    %112 = arith.addf %111, %110 : vector<64x64xf32>
    %113 = tpu.reciprocal %112 {approx = true} : vector<64x64xf32> -> vector<64x64xf32>
    %c96 = arith.constant 96 : index
    %c0_54 = arith.constant 0 : index
    %114 = vector.load %arg5[%c96, %c0_54] : memref<112x128xf32, #tpu.memory_space<vmem>>, vector<2x64xf32>
    %c98 = arith.constant 98 : index
    %c0_55 = arith.constant 0 : index
    %115 = vector.load %arg5[%c98, %c0_55] : memref<112x128xf32, #tpu.memory_space<vmem>>, vector<2x64xf32>
    %116 = arith.truncf %114 : vector<2x64xf32> to vector<2x64xbf16>
    %117 = arith.truncf %113 : vector<64x64xf32> to vector<64x64xbf16>
    %cst_56 = arith.constant dense<0.000000e+00> : vector<2x64xf32>
    %118 = tpu.matmul %116, %117, %cst_56 {dimension_numbers = #tpu.dot_dimension_numbers<[1], [0], [0], [1], [0, 0, 1, 1], [], []>} : vector<2x64xbf16>, vector<64x64xbf16>, vector<2x64xf32> -> vector<2x64xf32>
    %119 = arith.mulf %118, %115 : vector<2x64xf32>
    %120 = arith.truncf %119 : vector<2x64xf32> to vector<2x64xbf16>
    %121 = arith.truncf %100 : vector<64x64xf32> to vector<64x64xbf16>
    %cst_57 = arith.constant dense<0.000000e+00> : vector<2x64xf32>
    %122 = tpu.matmul %120, %121, %cst_57 {dimension_numbers = #tpu.dot_dimension_numbers<[1], [1], [0], [0], [0, 0, 1, 0], [], []>} : vector<2x64xbf16>, vector<64x64xbf16>, vector<2x64xf32> -> vector<2x64xf32>
    %c84 = arith.constant 84 : index
    %c0_58 = arith.constant 0 : index
    %123 = vector.load %arg5[%c84, %c0_58] : memref<112x128xf32, #tpu.memory_space<vmem>>, vector<1x64xf32>
    %124 = arith.truncf %122 : vector<2x64xf32> to vector<2x64xbf16>
    %cst_59 = arith.constant dense<0.000000e+00> : vector<2x64xf32>
    %125 = tpu.matmul %124, %93, %cst_59 {dimension_numbers = #tpu.dot_dimension_numbers<[1], [1], [0], [0], [0, 0, 1, 0], [], []>} : vector<2x64xbf16>, vector<64x64xbf16>, vector<2x64xf32> -> vector<2x64xf32>
    %126 = vector.broadcast %123 : vector<1x64xf32> to vector<2x64xf32>
    %127 = arith.addf %125, %126 : vector<2x64xf32>
    %cst_60 = arith.constant 0.000000e+00 : f32
    %128 = vector.broadcast %cst_60 : f32 to vector<2x64xf32>
    %129 = arith.maximumf %127, %128 : vector<2x64xf32>
    %c0_61 = arith.constant 0 : index
    %c0_62 = arith.constant 0 : index
    %c0_63 = arith.constant 0 : index
    %130 = vector.load %arg1[%c0_61, %c0_62, %c0_63] : memref<10x64x64xf32, #tpu.memory_space<vmem>>, vector<1x64x64xf32>
    %131 = vector.shape_cast %130 : vector<1x64x64xf32> to vector<64x64xf32>
    %c0_64 = arith.constant 0 : index
    %c20 = arith.constant 20 : index
    %132 = vector.load %arg3[%c0_64, %c20] : memref<64x128xf32, #tpu.memory_space<vmem>>, vector<64x1xf32>
    %133 = vector.broadcast %132 : vector<64x1xf32> to vector<64x64xf32>
    %134 = arith.mulf %131, %133 : vector<64x64xf32>
    %c1_65 = arith.constant 1 : index
    %c0_66 = arith.constant 0 : index
    %c0_67 = arith.constant 0 : index
    %135 = vector.load %arg1[%c1_65, %c0_66, %c0_67] : memref<10x64x64xf32, #tpu.memory_space<vmem>>, vector<1x64x64xf32>
    %136 = vector.shape_cast %135 : vector<1x64x64xf32> to vector<64x64xf32>
    %c0_68 = arith.constant 0 : index
    %c21 = arith.constant 21 : index
    %137 = vector.load %arg3[%c0_68, %c21] : memref<64x128xf32, #tpu.memory_space<vmem>>, vector<64x1xf32>
    %138 = vector.broadcast %137 : vector<64x1xf32> to vector<64x64xf32>
    %139 = arith.mulf %136, %138 : vector<64x64xf32>
    %140 = arith.addf %134, %139 : vector<64x64xf32>
    %c2_69 = arith.constant 2 : index
    %c0_70 = arith.constant 0 : index
    %c0_71 = arith.constant 0 : index
    %141 = vector.load %arg1[%c2_69, %c0_70, %c0_71] : memref<10x64x64xf32, #tpu.memory_space<vmem>>, vector<1x64x64xf32>
    %142 = vector.shape_cast %141 : vector<1x64x64xf32> to vector<64x64xf32>
    %c0_72 = arith.constant 0 : index
    %c22 = arith.constant 22 : index
    %143 = vector.load %arg3[%c0_72, %c22] : memref<64x128xf32, #tpu.memory_space<vmem>>, vector<64x1xf32>
    %144 = vector.broadcast %143 : vector<64x1xf32> to vector<64x64xf32>
    %145 = arith.mulf %142, %144 : vector<64x64xf32>
    %146 = arith.addf %140, %145 : vector<64x64xf32>
    %c3_73 = arith.constant 3 : index
    %c0_74 = arith.constant 0 : index
    %c0_75 = arith.constant 0 : index
    %147 = vector.load %arg1[%c3_73, %c0_74, %c0_75] : memref<10x64x64xf32, #tpu.memory_space<vmem>>, vector<1x64x64xf32>
    %148 = vector.shape_cast %147 : vector<1x64x64xf32> to vector<64x64xf32>
    %c0_76 = arith.constant 0 : index
    %c23 = arith.constant 23 : index
    %149 = vector.load %arg3[%c0_76, %c23] : memref<64x128xf32, #tpu.memory_space<vmem>>, vector<64x1xf32>
    %150 = vector.broadcast %149 : vector<64x1xf32> to vector<64x64xf32>
    %151 = arith.mulf %148, %150 : vector<64x64xf32>
    %152 = arith.addf %146, %151 : vector<64x64xf32>
    %c4_77 = arith.constant 4 : index
    %c0_78 = arith.constant 0 : index
    %c0_79 = arith.constant 0 : index
    %153 = vector.load %arg1[%c4_77, %c0_78, %c0_79] : memref<10x64x64xf32, #tpu.memory_space<vmem>>, vector<1x64x64xf32>
    %154 = vector.shape_cast %153 : vector<1x64x64xf32> to vector<64x64xf32>
    %c0_80 = arith.constant 0 : index
    %c24 = arith.constant 24 : index
    %155 = vector.load %arg3[%c0_80, %c24] : memref<64x128xf32, #tpu.memory_space<vmem>>, vector<64x1xf32>
    %156 = vector.broadcast %155 : vector<64x1xf32> to vector<64x64xf32>
    %157 = arith.mulf %154, %156 : vector<64x64xf32>
    %158 = arith.addf %152, %157 : vector<64x64xf32>
    %c5 = arith.constant 5 : index
    %c0_81 = arith.constant 0 : index
    %c0_82 = arith.constant 0 : index
    %159 = vector.load %arg1[%c5, %c0_81, %c0_82] : memref<10x64x64xf32, #tpu.memory_space<vmem>>, vector<1x64x64xf32>
    %160 = vector.shape_cast %159 : vector<1x64x64xf32> to vector<64x64xf32>
    %c0_83 = arith.constant 0 : index
    %c25 = arith.constant 25 : index
    %161 = vector.load %arg3[%c0_83, %c25] : memref<64x128xf32, #tpu.memory_space<vmem>>, vector<64x1xf32>
    %162 = vector.broadcast %161 : vector<64x1xf32> to vector<64x64xf32>
    %163 = arith.mulf %160, %162 : vector<64x64xf32>
    %164 = arith.addf %158, %163 : vector<64x64xf32>
    %c6 = arith.constant 6 : index
    %c0_84 = arith.constant 0 : index
    %c0_85 = arith.constant 0 : index
    %165 = vector.load %arg1[%c6, %c0_84, %c0_85] : memref<10x64x64xf32, #tpu.memory_space<vmem>>, vector<1x64x64xf32>
    %166 = vector.shape_cast %165 : vector<1x64x64xf32> to vector<64x64xf32>
    %c0_86 = arith.constant 0 : index
    %c26 = arith.constant 26 : index
    %167 = vector.load %arg3[%c0_86, %c26] : memref<64x128xf32, #tpu.memory_space<vmem>>, vector<64x1xf32>
    %168 = vector.broadcast %167 : vector<64x1xf32> to vector<64x64xf32>
    %169 = arith.mulf %166, %168 : vector<64x64xf32>
    %170 = arith.addf %164, %169 : vector<64x64xf32>
    %c7 = arith.constant 7 : index
    %c0_87 = arith.constant 0 : index
    %c0_88 = arith.constant 0 : index
    %171 = vector.load %arg1[%c7, %c0_87, %c0_88] : memref<10x64x64xf32, #tpu.memory_space<vmem>>, vector<1x64x64xf32>
    %172 = vector.shape_cast %171 : vector<1x64x64xf32> to vector<64x64xf32>
    %c0_89 = arith.constant 0 : index
    %c27 = arith.constant 27 : index
    %173 = vector.load %arg3[%c0_89, %c27] : memref<64x128xf32, #tpu.memory_space<vmem>>, vector<64x1xf32>
    %174 = vector.broadcast %173 : vector<64x1xf32> to vector<64x64xf32>
    %175 = arith.mulf %172, %174 : vector<64x64xf32>
    %176 = arith.addf %170, %175 : vector<64x64xf32>
    %c8 = arith.constant 8 : index
    %c0_90 = arith.constant 0 : index
    %c0_91 = arith.constant 0 : index
    %177 = vector.load %arg1[%c8, %c0_90, %c0_91] : memref<10x64x64xf32, #tpu.memory_space<vmem>>, vector<1x64x64xf32>
    %178 = vector.shape_cast %177 : vector<1x64x64xf32> to vector<64x64xf32>
    %c0_92 = arith.constant 0 : index
    %c28 = arith.constant 28 : index
    %179 = vector.load %arg3[%c0_92, %c28] : memref<64x128xf32, #tpu.memory_space<vmem>>, vector<64x1xf32>
    %180 = vector.broadcast %179 : vector<64x1xf32> to vector<64x64xf32>
    %181 = arith.mulf %178, %180 : vector<64x64xf32>
    %182 = arith.addf %176, %181 : vector<64x64xf32>
    %c9 = arith.constant 9 : index
    %c0_93 = arith.constant 0 : index
    %c0_94 = arith.constant 0 : index
    %183 = vector.load %arg1[%c9, %c0_93, %c0_94] : memref<10x64x64xf32, #tpu.memory_space<vmem>>, vector<1x64x64xf32>
    %184 = vector.shape_cast %183 : vector<1x64x64xf32> to vector<64x64xf32>
    %c0_95 = arith.constant 0 : index
    %c29 = arith.constant 29 : index
    %185 = vector.load %arg3[%c0_95, %c29] : memref<64x128xf32, #tpu.memory_space<vmem>>, vector<64x1xf32>
    %186 = vector.broadcast %185 : vector<64x1xf32> to vector<64x64xf32>
    %187 = arith.mulf %184, %186 : vector<64x64xf32>
    %188 = arith.addf %182, %187 : vector<64x64xf32>
    %189 = arith.truncf %188 : vector<64x64xf32> to vector<64x64xbf16>
    %c2_96 = arith.constant 2 : index
    %c0_97 = arith.constant 0 : index
    %c0_98 = arith.constant 0 : index
    %190 = vector.load %arg4[%c2_96, %c0_97, %c0_98] : memref<3x256x128xbf16, #tpu.memory_space<vmem>>, vector<1x256x128xbf16>
    %191 = vector.shape_cast %190 : vector<1x256x128xbf16> to vector<256x128xbf16>
    %192 = vector.extract_strided_slice %191 {offsets = [0, 0], sizes = [192, 64], strides = [1, 1]} : vector<256x128xbf16> to vector<192x64xbf16>
    %193 = vector.extract_strided_slice %191 {offsets = [0, 64], sizes = [192, 1], strides = [1, 1]} : vector<256x128xbf16> to vector<192x1xbf16>
    %194 = vector.extract_strided_slice %191 {offsets = [192, 0], sizes = [64, 64], strides = [1, 1]} : vector<256x128xbf16> to vector<64x64xbf16>
    %cst_99 = arith.constant dense<0.000000e+00> : vector<192x64xf32>
    %195 = tpu.matmul %192, %189, %cst_99 {dimension_numbers = #tpu.dot_dimension_numbers<[1], [0], [0], [1], [0, 0, 1, 1], [], []>} : vector<192x64xbf16>, vector<64x64xbf16>, vector<192x64xf32> -> vector<192x64xf32>
    %196 = arith.extf %193 : vector<192x1xbf16> to vector<192x1xf32>
    %197 = vector.broadcast %196 : vector<192x1xf32> to vector<192x64xf32>
    %198 = arith.addf %195, %197 : vector<192x64xf32>
    %199 = vector.extract_strided_slice %198 {offsets = [0, 0], sizes = [64, 64], strides = [1, 1]} : vector<192x64xf32> to vector<64x64xf32>
    %200 = vector.extract_strided_slice %198 {offsets = [64, 0], sizes = [64, 64], strides = [1, 1]} : vector<192x64xf32> to vector<64x64xf32>
    %201 = vector.extract_strided_slice %198 {offsets = [128, 0], sizes = [64, 64], strides = [1, 1]} : vector<192x64xf32> to vector<64x64xf32>
    %202 = arith.truncf %199 : vector<64x64xf32> to vector<64x64xbf16>
    %203 = arith.truncf %200 : vector<64x64xf32> to vector<64x64xbf16>
    %cst_100 = arith.constant dense<0.000000e+00> : vector<64x64xf32>
    %204 = tpu.matmul %202, %203, %cst_100 {dimension_numbers = #tpu.dot_dimension_numbers<[0], [0], [1], [1], [0, 1, 1, 1], [], []>} : vector<64x64xbf16>, vector<64x64xbf16>, vector<64x64xf32> -> vector<64x64xf32>
    %cst_101 = arith.constant 1.250000e-01 : f32
    %205 = vector.broadcast %cst_101 : f32 to vector<64x64xf32>
    %206 = arith.mulf %204, %205 : vector<64x64xf32>
    %cst_102 = arith.constant 0.000000e+00 : f32
    %207 = vector.broadcast %cst_102 : f32 to vector<64x64xf32>
    %208 = arith.subf %207, %206 : vector<64x64xf32>
    %cst_103 = arith.constant 6.000000e+01 : f32
    %209 = vector.broadcast %cst_103 : f32 to vector<64x64xf32>
    %210 = arith.minimumf %208, %209 : vector<64x64xf32>
    %211 = math.exp %210 : vector<64x64xf32>
    %cst_104 = arith.constant 1.000000e+00 : f32
    %212 = vector.broadcast %cst_104 : f32 to vector<64x64xf32>
    %213 = arith.addf %212, %211 : vector<64x64xf32>
    %214 = tpu.reciprocal %213 {approx = true} : vector<64x64xf32> -> vector<64x64xf32>
    %c104 = arith.constant 104 : index
    %c0_105 = arith.constant 0 : index
    %215 = vector.load %arg5[%c104, %c0_105] : memref<112x128xf32, #tpu.memory_space<vmem>>, vector<2x64xf32>
    %c106 = arith.constant 106 : index
    %c0_106 = arith.constant 0 : index
    %216 = vector.load %arg5[%c106, %c0_106] : memref<112x128xf32, #tpu.memory_space<vmem>>, vector<2x64xf32>
    %217 = arith.truncf %215 : vector<2x64xf32> to vector<2x64xbf16>
    %218 = arith.truncf %214 : vector<64x64xf32> to vector<64x64xbf16>
    %cst_107 = arith.constant dense<0.000000e+00> : vector<2x64xf32>
    %219 = tpu.matmul %217, %218, %cst_107 {dimension_numbers = #tpu.dot_dimension_numbers<[1], [0], [0], [1], [0, 0, 1, 1], [], []>} : vector<2x64xbf16>, vector<64x64xbf16>, vector<2x64xf32> -> vector<2x64xf32>
    %220 = arith.mulf %219, %216 : vector<2x64xf32>
    %221 = arith.truncf %220 : vector<2x64xf32> to vector<2x64xbf16>
    %222 = arith.truncf %201 : vector<64x64xf32> to vector<64x64xbf16>
    %cst_108 = arith.constant dense<0.000000e+00> : vector<2x64xf32>
    %223 = tpu.matmul %221, %222, %cst_108 {dimension_numbers = #tpu.dot_dimension_numbers<[1], [1], [0], [0], [0, 0, 1, 0], [], []>} : vector<2x64xbf16>, vector<64x64xbf16>, vector<2x64xf32> -> vector<2x64xf32>
    %c85 = arith.constant 85 : index
    %c0_109 = arith.constant 0 : index
    %224 = vector.load %arg5[%c85, %c0_109] : memref<112x128xf32, #tpu.memory_space<vmem>>, vector<1x64xf32>
    %225 = arith.truncf %223 : vector<2x64xf32> to vector<2x64xbf16>
    %cst_110 = arith.constant dense<0.000000e+00> : vector<2x64xf32>
    %226 = tpu.matmul %225, %194, %cst_110 {dimension_numbers = #tpu.dot_dimension_numbers<[1], [1], [0], [0], [0, 0, 1, 0], [], []>} : vector<2x64xbf16>, vector<64x64xbf16>, vector<2x64xf32> -> vector<2x64xf32>
    %227 = vector.broadcast %224 : vector<1x64xf32> to vector<2x64xf32>
    %228 = arith.addf %226, %227 : vector<2x64xf32>
    %cst_111 = arith.constant 0.000000e+00 : f32
    %229 = vector.broadcast %cst_111 : f32 to vector<2x64xf32>
    %230 = arith.maximumf %228, %229 : vector<2x64xf32>
    %c82 = arith.constant 82 : index
    %c0_112 = arith.constant 0 : index
    %231 = vector.load %arg5[%c82, %c0_112] : memref<112x128xf32, #tpu.memory_space<vmem>>, vector<1x8xf32>
    %232 = vector.extract_strided_slice %231 {offsets = [0, 0], sizes = [1, 1], strides = [1, 1]} : vector<1x8xf32> to vector<1x1xf32>
    %233 = vector.broadcast %232 : vector<1x1xf32> to vector<2x64xf32>
    %234 = arith.mulf %58, %233 : vector<2x64xf32>
    %235 = vector.extract_strided_slice %231 {offsets = [0, 1], sizes = [1, 1], strides = [1, 1]} : vector<1x8xf32> to vector<1x1xf32>
    %236 = vector.broadcast %235 : vector<1x1xf32> to vector<2x64xf32>
    %237 = arith.mulf %129, %236 : vector<2x64xf32>
    %238 = arith.addf %234, %237 : vector<2x64xf32>
    %239 = vector.extract_strided_slice %231 {offsets = [0, 2], sizes = [1, 1], strides = [1, 1]} : vector<1x8xf32> to vector<1x1xf32>
    %240 = vector.broadcast %239 : vector<1x1xf32> to vector<2x64xf32>
    %241 = arith.mulf %230, %240 : vector<2x64xf32>
    %242 = arith.addf %238, %241 : vector<2x64xf32>
    %243 = vector.extract_strided_slice %231 {offsets = [0, 3], sizes = [1, 1], strides = [1, 1]} : vector<1x8xf32> to vector<1x1xf32>
    %244 = vector.broadcast %243 : vector<1x1xf32> to vector<2x64xf32>
    %245 = arith.addf %242, %244 : vector<2x64xf32>
    %c0_113 = arith.constant 0 : index
    %c0_114 = arith.constant 0 : index
    %246 = vector.load %arg5[%c0_113, %c0_114] : memref<112x128xf32, #tpu.memory_space<vmem>>, vector<16x64xf32>
    %c16 = arith.constant 16 : index
    %c0_115 = arith.constant 0 : index
    %247 = vector.load %arg5[%c16, %c0_115] : memref<112x128xf32, #tpu.memory_space<vmem>>, vector<64x16xf32>
    %c80 = arith.constant 80 : index
    %c0_116 = arith.constant 0 : index
    %248 = vector.load %arg5[%c80, %c0_116] : memref<112x128xf32, #tpu.memory_space<vmem>>, vector<1x16xf32>
    %c81 = arith.constant 81 : index
    %c0_117 = arith.constant 0 : index
    %249 = vector.load %arg5[%c81, %c0_117] : memref<112x128xf32, #tpu.memory_space<vmem>>, vector<1x64xf32>
    %250 = arith.truncf %245 : vector<2x64xf32> to vector<2x64xbf16>
    %251 = arith.truncf %246 : vector<16x64xf32> to vector<16x64xbf16>
    %cst_118 = arith.constant dense<0.000000e+00> : vector<2x16xf32>
    %252 = tpu.matmul %250, %251, %cst_118 {dimension_numbers = #tpu.dot_dimension_numbers<[1], [1], [0], [0], [0, 0, 1, 0], [], []>} : vector<2x64xbf16>, vector<16x64xbf16>, vector<2x16xf32> -> vector<2x16xf32>
    %253 = vector.broadcast %248 : vector<1x16xf32> to vector<2x16xf32>
    %254 = arith.addf %252, %253 : vector<2x16xf32>
    %cst_119 = arith.constant 0.000000e+00 : f32
    %255 = vector.broadcast %cst_119 : f32 to vector<2x16xf32>
    %256 = arith.maximumf %254, %255 : vector<2x16xf32>
    %257 = arith.truncf %256 : vector<2x16xf32> to vector<2x16xbf16>
    %258 = arith.truncf %247 : vector<64x16xf32> to vector<64x16xbf16>
    %cst_120 = arith.constant dense<0.000000e+00> : vector<2x64xf32>
    %259 = tpu.matmul %257, %258, %cst_120 {dimension_numbers = #tpu.dot_dimension_numbers<[1], [1], [0], [0], [0, 0, 1, 0], [], []>} : vector<2x16xbf16>, vector<64x16xbf16>, vector<2x64xf32> -> vector<2x64xf32>
    %260 = vector.broadcast %249 : vector<1x64xf32> to vector<2x64xf32>
    %261 = arith.addf %259, %260 : vector<2x64xf32>
    %cst_121 = arith.constant 0.000000e+00 : f32
    %262 = vector.broadcast %cst_121 : f32 to vector<2x64xf32>
    %263 = arith.subf %262, %261 : vector<2x64xf32>
    %cst_122 = arith.constant 6.000000e+01 : f32
    %264 = vector.broadcast %cst_122 : f32 to vector<2x64xf32>
    %265 = arith.minimumf %263, %264 : vector<2x64xf32>
    %266 = math.exp %265 : vector<2x64xf32>
    %cst_123 = arith.constant 1.000000e+00 : f32
    %267 = vector.broadcast %cst_123 : f32 to vector<2x64xf32>
    %268 = arith.addf %267, %266 : vector<2x64xf32>
    %cst_124 = arith.constant 1.000000e+00 : f32
    %269 = vector.broadcast %cst_124 : f32 to vector<2x64xf32>
    %270 = arith.divf %269, %268 : vector<2x64xf32>
    %271 = vector.extract_strided_slice %270 {offsets = [0, 0], sizes = [1, 64], strides = [1, 1]} : vector<2x64xf32> to vector<1x64xf32>
    %272 = vector.extract_strided_slice %270 {offsets = [1, 0], sizes = [1, 64], strides = [1, 1]} : vector<2x64xf32> to vector<1x64xf32>
    %273 = tpu.concatenate %271, %272 in 1 : vector<1x64xf32>, vector<1x64xf32> -> vector<1x128xf32>
    %c0_125 = arith.constant 0 : index
    %c0_126 = arith.constant 0 : index
    %274 = vector.load %arg2[%c0_125, %c0_126] : memref<32x128xf32, #tpu.memory_space<vmem>>, vector<32x128xf32>
    %275 = vector.broadcast %273 : vector<1x128xf32> to vector<32x128xf32>
    %276 = arith.mulf %274, %275 : vector<32x128xf32>
    %c0_127 = arith.constant 0 : index
    %c0_128 = arith.constant 0 : index
    %277 = vector.load %arg6[%c0_127, %c0_128] : memref<32x128xf32, #tpu.memory_space<vmem>>, vector<32x128xf32>
    tpu.vector_store %arg6[%c0_127, %c0_128], %276 {strides = array<i32>} : memref<32x128xf32, #tpu.memory_space<vmem>>, vector<32x128xf32>,
    return
  }
  func.func @transform_0(%arg0: i32) -> (i32, i32, i32) {
    %c0_i32 = arith.constant 0 : i32
    %c0_i32_0 = arith.constant 0 : i32
    %c0_i32_1 = arith.constant 0 : i32
    %c0_i32_2 = arith.constant 0 : i32
    return %c0_i32, %c0_i32_0, %c0_i32_1 : i32, i32, i32
  }
  func.func @transform_1(%arg0: i32) -> (i32, i32) {
    %c0_i32 = arith.constant 0 : i32
    %c0_i32_0 = arith.constant 0 : i32
    %c0_i32_1 = arith.constant 0 : i32
    return %c0_i32, %c0_i32_0 : i32, i32
  }
  func.func @transform_2(%arg0: i32) -> (i32, i32) {
    %c0_i32 = arith.constant 0 : i32
    %c0_i32_0 = arith.constant 0 : i32
    %c0_i32_1 = arith.constant 0 : i32
    return %c0_i32, %c0_i32_0 : i32, i32
  }
  func.func @transform_3(%arg0: i32) -> (i32, i32, i32) {
    %c0_i32 = arith.constant 0 : i32
    %c0_i32_0 = arith.constant 0 : i32
    %c0_i32_1 = arith.constant 0 : i32
    %c0_i32_2 = arith.constant 0 : i32
    return %c0_i32, %c0_i32_0, %c0_i32_1 : i32, i32, i32
  }
  func.func @transform_4(%arg0: i32) -> (i32, i32) {
    %c0_i32 = arith.constant 0 : i32
    %c0_i32_0 = arith.constant 0 : i32
    %c0_i32_1 = arith.constant 0 : i32
    return %c0_i32, %c0_i32_0 : i32, i32
  }
  func.func @transform_5(%arg0: i32) -> (i32, i32) {
    %c0_i32 = arith.constant 0 : i32
    %c0_i32_0 = arith.constant 0 : i32
    %c0_i32_1 = arith.constant 0 : i32
    return %c0_i32, %c0_i32_0 : i32, i32
  }
}

</mosaic_0001>

<bundles_post_ra>
// kernel: tpu_custom_call.1
= control target key start
LH: loop header
LB: loop body
LE: loop exit
PB: predicated region body
PF: predicated region fallthrough
CT: control target
= control target key end

     0   :  { %10 = vsyncpa [#allocation3], 0  ;;  %s5756_s0 = inlined_call_operand.hbm [shape: f32[10,64,64], index: 0, kind: input, shape index: {}]   ;;  %s5757_s1 = inlined_call_operand.hbm [shape: f32[32,128], index: 1, kind: input, shape index: {}]   ;;  %s5758_s2 = inlined_call_operand.hbm [shape: f32[64,128], index: 2, kind: input, shape index: {}]   ;;  %s5759_s3 = inlined_call_operand.hbm [shape: bf16[3,256,128], index: 3, kind: input, shape index: {}]   ;;  %s5760_s4 = inlined_call_operand.hbm [shape: f32[112,128], index: 4, kind: input, shape index: {}]   ;;  %s5761_s5 = inlined_call_operand.hbm [shape: f32[32,128], index: 5, kind: output, shape index: {}]  }
   0x1   :  { %11 = vsyncpa [#allocation6], 0 }
   0x2   :  { %12 = vsyncpa [#allocation9], 0 }
   0x3   :  { %13 = vsyncpa [#allocation4], 0  ;;  %s4765_s18 = smov [#allocation5]   ;;  %s4766_s20 = smov [#allocation8]  }
   0x4   :  { %s31_s19 = sshll.u32 %s4765_s18, 4  ;;  %s55_s21 = sshll.u32 %s4766_s20, 4  ;;  %s32_s19 = int_to_ptr.vmem [resolvable:$true] %s31_s19  ;;  %s4829_s21 = int_to_ptr.vmem [resolvable:$true] %s55_s21 }
   0x5   :  { %s4625_s24 = scalar_lea.hbm %s5757_s1, 512 }
   0x6   :  { %p4626_p0 = scmp.ne.s32.totalorder %s5757_s1, %s4625_s24  ;;  %p4629_p1 = scmp.lt.u32.totalorder %s4625_s24, %s5757_s1 }
   0x8   :  { %p4631_p2 = pnand %p4629_p1, %p4626_p0 }
   0xa   :  { %4634 = shalt.err (!%p4631_p2)
}
   0xb   :  { %s4635_s29 = scalar_lea.vmem %s32_s19, 512  ;;  %p4640_p4 = scmp.lt.s32.totalorder %s32_s19, %s32_s19 }
   0xc   :  { %p4636_p3 = scmp.ne.s32.totalorder %s32_s19, %s4635_s29  ;;  %p4641_p5 = scmp.lt.s32.totalorder %s4635_s29, %s4635_s29 }
   0xe   :  { %p4642_p6 = por %p4641_p5, %p4640_p4 }
  0x10   :  { %p4643_p7 = pnand %p4642_p6, %p4636_p3 }
  0x12   :  { %4646 = shalt.err (!%p4643_p7)
}
  0x13   :  { %s4767_s30 = smov 128   ;;  %s4768_s6 = smov 8  }
  0x14   :  { %37 = dma.hbm_to_vmem [thread:$0]  %s5757_s1, 512, %s32_s19, [#allocation6], %s4767_s30, %s4767_s30, %s4768_s6  }
  0x15   :  { %s4647_s11 = scalar_lea.hbm %s5759_s3, 6144 }
  0x16   :  { %p4648_p8 = scmp.ne.s32.totalorder %s5759_s3, %s4647_s11  ;;  %p4651_p9 = scmp.lt.u32.totalorder %s4647_s11, %s5759_s3 }
  0x18   :  { %p4653_p10 = pnand %p4651_p9, %p4648_p8 }
  0x1a   :  { %4656 = shalt.err (!%p4653_p10)
}
  0x1b   :  { %s4657_s16 = scalar_lea.vmem %s4829_s21, 6144  ;;  %p4662_p12 = scmp.lt.s32.totalorder %s4829_s21, %s4829_s21 }
  0x1c   :  { %p4658_p11 = scmp.ne.s32.totalorder %s4829_s21, %s4657_s16  ;;  %p4663_p13 = scmp.lt.s32.totalorder %s4657_s16, %s4657_s16 }
  0x1e   :  { %p4664_p0 = por %p4663_p13, %p4662_p12 }
  0x20   :  { %p4665_p1 = pnand %p4664_p0, %p4658_p11 }
  0x22   :  { %4668 = shalt.err (!%p4665_p1)
}
  0x23   :  { %s4769_s1 = smov 64   ;;  %s4770_s17 = smov 4  }
  0x24   :  { %61 = dma.hbm_to_vmem [thread:$0]  %s5759_s3, 6144, %s4829_s21, [#allocation9], %s4769_s1, %s4769_s1, %s4770_s17  }
  0x25   :  { %s4771_s20 = smov [#allocation2]   ;;  %s4772_s23 = smov [#allocation7]  }
  0x26   :  { %s19_s22 = sshll.u32 %s4771_s20, 4  ;;  %s43_s24 = sshll.u32 %s4772_s23, 4  ;;  %s20_s22 = int_to_ptr.vmem [resolvable:$true] %s19_s22  ;;  %s4865_s24 = int_to_ptr.vmem [resolvable:$true] %s43_s24 }
  0x27   :  { %s4669_s27 = scalar_lea.hbm %s5756_s0, 10240 }
  0x28   :  { %p4670_p2 = scmp.ne.s32.totalorder %s5756_s0, %s4669_s27  ;;  %p4673_p3 = scmp.lt.u32.totalorder %s4669_s27, %s5756_s0 }
  0x2a   :  { %p4675_p4 = pnand %p4673_p3, %p4670_p2 }
  0x2c   :  { %4678 = shalt.err (!%p4675_p4)
}
  0x2d   :  { %s4679_s3 = scalar_lea.vmem %s20_s22, 10240  ;;  %p4684_p6 = scmp.lt.s32.totalorder %s20_s22, %s20_s22 }
  0x2e   :  { %p4680_p5 = scmp.ne.s32.totalorder %s20_s22, %s4679_s3  ;;  %p4685_p7 = scmp.lt.s32.totalorder %s4679_s3, %s4679_s3 }
  0x30   :  { %p4686_p8 = por %p4685_p7, %p4684_p6 }
  0x32   :  { %p4687_p9 = pnand %p4686_p8, %p4680_p5 }
  0x34   :  { %4690 = shalt.err (!%p4687_p9)
}
  0x35   :  { %25 = dma.hbm_to_vmem [thread:$0]  %s5756_s0, 10240, %s20_s22, [#allocation3], %s4767_s30, %s4767_s30, %s4768_s6  }
  0x36   :  { %s4691_s12 = scalar_lea.hbm %s5758_s2, 1024 }
  0x37   :  { %p4692_p10 = scmp.ne.s32.totalorder %s5758_s2, %s4691_s12  ;;  %p4695_p11 = scmp.lt.u32.totalorder %s4691_s12, %s5758_s2 }
  0x39   :  { %p4697_p12 = pnand %p4695_p11, %p4692_p10 }
  0x3b   :  { %4700 = shalt.err (!%p4697_p12)
}
  0x3c   :  { %s4701_s17 = scalar_lea.vmem %s4865_s24, 1024  ;;  %p4706_p0 = scmp.lt.s32.totalorder %s4865_s24, %s4865_s24 }
  0x3d   :  { %p4702_p13 = scmp.ne.s32.totalorder %s4865_s24, %s4701_s17  ;;  %p4707_p1 = scmp.lt.s32.totalorder %s4701_s17, %s4701_s17 }
  0x3f   :  { %p4708_p2 = por %p4707_p1, %p4706_p0 }
  0x41   :  { %p4709_p3 = pnand %p4708_p2, %p4702_p13 }
  0x43   :  { %4712 = shalt.err (!%p4709_p3)
}
  0x44   :  { %49 = dma.hbm_to_vmem [thread:$0]  %s5758_s2, 1024, %s4865_s24, [#allocation6], %s4767_s30, %s4767_s30, %s4768_s6  }
  0x45   :  { %s4773_s19 = smov [#allocation10]   ;;  %s4713_s25 = scalar_lea.hbm %s5760_s4, 1792 }
  0x46   :  { %s67_s20 = sshll.u32 %s4773_s19, 4  ;;  %p4714_p4 = scmp.ne.s32.totalorder %s5760_s4, %s4713_s25  ;;  %s68_s20 = int_to_ptr.vmem [resolvable:$true] %s67_s20 }
  0x47   :  { %p4717_p5 = scmp.lt.u32.totalorder %s4713_s25, %s5760_s4 }
  0x49   :  { %p4719_p6 = pnand %p4717_p5, %p4714_p4 }
  0x4b   :  { %4722 = shalt.err (!%p4719_p6)
}
  0x4c   :  { %s4723_s7 = scalar_lea.vmem %s68_s20, 1792  ;;  %p4728_p8 = scmp.lt.s32.totalorder %s68_s20, %s68_s20 }
  0x4d   :  { %p4724_p7 = scmp.ne.s32.totalorder %s68_s20, %s4723_s7  ;;  %p4729_p9 = scmp.lt.s32.totalorder %s4723_s7, %s4723_s7 }
  0x4f   :  { %p4730_p10 = por %p4729_p9, %p4728_p8 }
  0x51   :  { %p4731_p11 = pnand %p4730_p10, %p4724_p7 }
  0x53   :  { %4734 = shalt.err (!%p4731_p11)
}
  0x54   :  { %73 = dma.hbm_to_vmem [thread:$0]  %s5760_s4, 1792, %s68_s20, [#allocation9], %s4767_s30, %s4767_s30, %s4768_s6  }
  0x55   :  { %4757 = dma.done.wait [#allocation3], 10240  }
  0x56   :  { %4758 = vsyncadd [#allocation3], 4294957056 }
  0x57   :  { %4759 = dma.done.wait [#allocation6], 1536  }
  0x58   :  { %4760 = vsyncadd [#allocation6], 4294965760 }
  0x59   :  { %4761 = dma.done.wait [#allocation9], 7936  }
  0x5a   :  { %4762 = vsyncadd [#allocation9], 4294959360  ;;  %v4774_v0 = vmov 1   ;;  %v4775_v1 = vmov 0   ;;  %v4917_v2 = vld [vmem:[#allocation7] sm:$0xff]  ;;  %v4921_v3 = vld [vmem:[#allocation7 + $0x8] sm:$0xff] }
  0x5b   :  { %4056 = vset.pattern.permute.xlu1 %v4774_v0  ;;  %4055 = vset.pattern.permute.xlu0 %v4775_v1  ;;  %v4923_v4 = vld [vmem:[#allocation7 + $0x18] sm:$0xff]  ;;  %v4776_v5 = vmov 2   ;;  %v4929_v6 = vld [vmem:[#allocation7 + $0x28] sm:$0xff]  ;;  %v4931_v7 = vld [vmem:[#allocation7 + $0x10] sm:$0xff]  ;;  %vm508_vm0 = vcmask 523264   ;;  %v4777_v19 = vmov 64  }
  0x5c   :  { %164 = vperm.xlu1 %4056, %v4917_v2   ;;  %108 = vperm.xlu0 %4055, %v4917_v2   ;;  %v4934_v8 = vld [vmem:[#allocation7 + $0x38] sm:$0xff]  ;;  %v4943_v9 = vld [vmem:[#allocation7 + $0x20] sm:$0xff]  ;;  %v4946_v10 = vld [vmem:[#allocation7 + $0x30] sm:$0xff]  ;;  %vm4784_vm1 = vmmov 0   ;;  %s4795_s4 = smov 127   ;;  %s4796_s21 = smov 126  }
  0x5d   :  { %v272_v11 = vld [vmem:[#allocation8] sm:$0xff]   ;;  %v4958_v14 = vld [vmem:[#allocation8 + $0x10] sm:$0xff]   ;;  %v4962_v18 = vld [vmem:[#allocation8 + $0x18] sm:$0xff]   ;;  %s4797_s9 = smov 125   ;;  %vm3403_vm2 = vcmask 130048   ;;  %s4798_s12 = smov [#allocation11]  }
  0x5e   :  { %3751 = vmatprep.mubr.msk.bf16.mxu0 %vm508_vm0, %v272_v11  ;;  %v304_v12 = vunpack.c.l.bf16 %v272_v11  ;;  %v305_v13 = vunpack.c.h.bf16 %v272_v11  ;;  %v308_v16 = vunpack.c.l.bf16 %v4958_v14  ;;  %v309_v17 = vunpack.c.h.bf16 %v4958_v14  ;;  %v4968_v23 = vld [vmem:[#allocation8 + $0x8] sm:$0xff]   ;;  %v4970_v24 = vld [vmem:[#allocation8 + $0x20] sm:$0xff]   ;;  %v4980_v34 = vld [vmem:[#allocation8 + $0x30] sm:$0xff]   ;;  %s3493_s13 = sshll.u32 %s4798_s12, 4  ;;  %s3494_s13 = int_to_ptr.vmem [resolvable:$true] %s3493_s13 }
  0x5f   :  { %v310_v21 = vunpack.c.l.bf16 %v4962_v18  ;;  %v311_v22 = vunpack.c.h.bf16 %v4962_v18  ;;  %v4972_v25 = vld [vmem:[#allocation8 + $0x28] sm:$0xff]   ;;  %v306_v26 = vunpack.c.l.bf16 %v4968_v23  ;;  %v307_v27 = vunpack.c.h.bf16 %v4968_v23  ;;  %v4982_v35 = vld [vmem:[#allocation8 + $0x38] sm:$0xff]   ;;  %v4988_v44 = vld [vmem:[#allocation8 + $0x40] sm:$0xff]   ;;  %p4740_p13 = scmp.lt.s32.totalorder %s3494_s13, %s3494_s13 }
  0x60   :  { %168 = vperm.xlu1 %4056, %v4921_v3   ;;  %113 = vperm.xlu0 %4055, %v4921_v3   ;;  %v4069_v15 = vpack.i.bf16 %v305_v13, %v304_v12  ;;  %v4080_v20 = vpack.i.bf16 %v309_v17, %v308_v16  ;;  %v314_v29 = vunpack.c.l.bf16 %v4972_v25  ;;  %v315_v30 = vunpack.c.h.bf16 %v4972_v25  ;;  %v4992_v51 = vld [vmem:[#allocation8 + $0x48] sm:$0xff]   ;;  %v4996_v57 = vld [vmem:[#allocation8 + $0x50] sm:$0xff]   ;;  %v5002_v62 = vld [vmem:[#allocation2 + $0x40] sm:$0xff] }
  0x61   :  { %v4085_v28 = vpack.i.bf16 %v311_v22, %v310_v21  ;;  %v312_v31 = vunpack.c.l.bf16 %v4970_v24  ;;  %v4075_v32 = vpack.i.bf16 %v307_v27, %v306_v26  ;;  %v313_v33 = vunpack.c.h.bf16 %v4970_v24  ;;  %v5010_v11 = vld [vmem:[#allocation2 + $0x8] sm:$0xff] }
  0x62   :  { %v316_v37 = vunpack.c.l.bf16 %v4980_v34  ;;  %v317_v38 = vunpack.c.h.bf16 %v4980_v34  ;;  %v4095_v39 = vpack.i.bf16 %v315_v30, %v314_v29  ;;  %v318_v40 = vunpack.c.l.bf16 %v4982_v35  ;;  %v5016_v17 = vld [vmem:[#allocation2 + $0x88] sm:$0xff] }
  0x63   :  { %v4090_v36 = vpack.i.bf16 %v313_v33, %v312_v31  ;;  %v319_v41 = vunpack.c.h.bf16 %v4982_v35  ;;  %v320_v47 = vunpack.c.l.bf16 %v4988_v44  ;;  %v321_v48 = vunpack.c.h.bf16 %v4988_v44 }
  0x64   :  { %4057 = vset.pattern.permute.xlu1 %v4776_v5  ;;  %123 = vperm.xlu0 %4055, %v4923_v4   ;;  %v4100_v45 = vpack.i.bf16 %v317_v38, %v316_v37  ;;  %v322_v53 = vunpack.c.l.bf16 %v4992_v51  ;;  %v323_v54 = vunpack.c.h.bf16 %v4992_v51  ;;  %v324_v59 = vunpack.c.l.bf16 %v4996_v57  ;;  %v157_v37 = vld [vmem:[#allocation2 + $0x50] sm:$0xff] }
  0x65   :  { %225 = vperm.xlu1 %4057, %v4921_v3   ;;  %v4105_v46 = vpack.i.bf16 %v319_v41, %v318_v40  ;;  %v4110_v52 = vpack.i.bf16 %v321_v48, %v320_v47  ;;  %v325_v60 = vunpack.c.h.bf16 %v4996_v57  ;;  %v5026_v41 = vld [vmem:[#allocation2 + $0x10] sm:$0xff] }
  0x66   :  { %v4115_v58 = vpack.i.bf16 %v323_v54, %v322_v53 }
  0x67   :  { %v4120_v12 = vpack.i.bf16 %v325_v60, %v324_v59 }
  0x68   :  { %133 = vperm.xlu0 %4055, %v4929_v6  }
  0x69   :  { %4058 = vset.pattern.permute.xlu1 %v4775_v1 }
  0x6a   :  { %118 = vperm.xlu1 %4058, %v4931_v7  }
  0x6c   :  { %143 = vperm.xlu0 %4055, %v4934_v8  }
  0x6e   :  { %4059 = vset.pattern.permute.xlu1 %v4774_v0 }
  0x6f   :  { %172 = vperm.xlu1 %4059, %v4931_v7  }
  0x70   :  { %4065 = vset.pattern.permute.xlu0 %v4776_v5 }
  0x71   :  { %221 = vperm.xlu0 %4065, %v4917_v2  }
  0x73   :  { %176 = vperm.xlu1 %4059, %v4923_v4  }
  0x75   :  { %229 = vperm.xlu0 %4065, %v4931_v7  }
  0x77   :  { %4060 = vset.pattern.permute.xlu1 %v4776_v5 }
  0x78   :  { %233 = vperm.xlu1 %4060, %v4923_v4  }
  0x79   :  { %237 = vperm.xlu0 %4065, %v4943_v9  }
  0x7c   :  { %4061 = vset.pattern.permute.xlu1 %v4775_v1 }
  0x7d   :  { %128 = vperm.xlu1 %4061, %v4943_v9   ;;  %245 = vperm.xlu0 %4065, %v4946_v10  }
  0x81   :  { %4062 = vset.pattern.permute.xlu1 %v4774_v0  ;;  %4074 = vset.pattern.permute.xlu0 %v4777_v19 }
  0x82   :  { %180 = vperm.xlu1 %4062, %v4943_v9   ;;  %4076 = vperm.xlu0 %4074, %v4075_v32  }
  0x86   :  { %184 = vperm.xlu1 %4062, %v4929_v6   ;;  %4091 = vperm.xlu0 %4074, %v4090_v36   ;;  %v93_v36 = vld [vmem:[#allocation2 + $0x18] sm:$0xff] }
  0x8a   :  { %4063 = vset.pattern.permute.xlu1 %v4776_v5  ;;  %4101 = vperm.xlu0 %4074, %v4100_v45  }
  0x8b   :  { %241 = vperm.xlu1 %4063, %v4929_v6  }
  0x8f   :  { %4064 = vset.pattern.permute.xlu1 %v4775_v1  ;;  %v5006_v1 = vld [vmem:[#allocation2] sm:$0xff] }
  0x90   :  { %138 = vperm.xlu1 %4064, %v4946_v10  }
  0x94   :  { %4066 = vset.pattern.permute.xlu1 %v4774_v0  ;;  %v5004_v0 = vld [vmem:[#allocation8 + $0x58] sm:$0xff]  }
  0x95   :  { %188 = vperm.xlu1 %4066, %v4946_v10   ;;  %v326_v13 = vunpack.c.l.bf16 %v5004_v0 }
  0x99   :  { %192 = vperm.xlu1 %4066, %v4934_v8  }
  0x9d   :  { %4067 = vset.pattern.permute.xlu1 %v4776_v5  ;;  %v5008_v5 = vld [vmem:[#allocation2 + $0x48] sm:$0xff] }
  0x9e   :  { %249 = vperm.xlu1 %4067, %v4934_v8  }
  0xa2   :  { %4068 = vset.pattern.permute.xlu1 %v4777_v19 }
  0xa3   :  { %4070 = vperm.xlu1 %4068, %v4069_v15   ;;  %v327_v15 = vunpack.c.h.bf16 %v5004_v0 }
  0xa5   :  { %v4125_v29 = vpack.i.bf16 %v327_v15, %v326_v13 }
  0xa7   :  { %4081 = vperm.xlu1 %4068, %v4080_v20  }
  0xab   :  { %4086 = vperm.xlu1 %4068, %v4085_v28   ;;  %v5022_v28 = vld [vmem:[#allocation2 + $0x80] sm:$0xff] }
  0xaf   :  { %4096 = vperm.xlu1 %4068, %v4095_v39   ;;  %v158_v39 = vld [vmem:[#allocation2 + $0x58] sm:$0xff] }
  0xb3   :  { %4106 = vperm.xlu1 %4068, %v4105_v46  }
  0xb7   :  { %4111 = vperm.xlu1 %4068, %v4110_v52  }
  0xbb   :  { %4116 = vperm.xlu1 %4068, %v4115_v58  }
  0xbf   :  { %4121 = vperm.xlu1 %4068, %v4120_v12  }
  0xc3   :  { %4126 = vperm.xlu1 %4068, %v4125_v29   ;;  %v5042_v29 = vld [vmem:[#allocation2 + $0x28] sm:$0xff] }
  0xdb   :  { %v165_v42 = vpop.permute.xlu1 %164  ;;  %v109_v43 = vpop.permute.xlu0 %108 }
  0xdc   :  { %v195_v20 = vmul.f32 %v165_v42, %v5002_v62  ;;  %v146_v21 = vmul.f32 %v109_v43, %v5006_v1  ;;  %v5028_v42 = vld [vmem:[#allocation2 + $0x90] sm:$0xff] }
  0xde   :  { %v203_v32 = vadd.f32 %v195_v20, %v146_v21  ;;  %v5035_v21 = vld [vmem:[#allocation2 + $0x60] sm:$0xff] }
  0xdf   :  { %v169_v49 = vpop.permute.xlu1 %168  ;;  %v114_v50 = vpop.permute.xlu0 %113 }
  0xe0   :  { %v196_v22 = vmul.f32 %v169_v49, %v5008_v5  ;;  %v147_v26 = vmul.f32 %v114_v50, %v5010_v11  ;;  %v5030_v50 = vld [vmem:[#allocation2 + $0x98] sm:$0xff] }
  0xe2   :  { %v204_v33 = vadd.f32 %v196_v22, %v147_v26  ;;  %v5037_v22 = vld [vmem:[#allocation2 + $0x20] sm:$0xff] }
  0xe3   :  { %v124_v55 = vpop.permute.xlu0 %123 }
  0xe4   :  { %v226_v56 = vpop.permute.xlu1 %225  ;;  %v149_v46 = vmul.f32 %v124_v55, %v93_v36  ;;  %v5048_v36 = vld [vmem:[#allocation2 + $0xa8] sm:$0xff] }
  0xe5   :  { %v253_v30 = vmul.f32 %v226_v56, %v5016_v17 }
  0xe7   :  { %v5000_v61 = vpop.permute.xlu0 %133  ;;  %v261_v45 = vadd.f32 %v253_v30, %v204_v33  ;;  %v5044_v30 = vld [vmem:[#allocation2 + $0xa0] sm:$0xff] }
  0xe9   :  { %v119_v63 = vpop.permute.xlu1 %118 }
  0xea   :  { %v148_v53 = vmul.f32 %v119_v63, %v5026_v41  ;;  %v5039_v63 = vld [vmem:[#allocation2 + $0x68] sm:$0xff] }
  0xeb   :  { %v5014_v16 = vpop.permute.xlu0 %143 }
  0xee   :  { %v173_v27 = vpop.permute.xlu1 %172 }
  0xef   :  { %v197_v47 = vmul.f32 %v173_v27, %v157_v37  ;;  %v151_v37 = vmul.f32 %v5000_v61, %v5042_v29 }
  0xf0   :  { %v222_v31 = vpop.permute.xlu0 %221 }
  0xf1   :  { %v252_v38 = vmul.f32 %v222_v31, %v5022_v28  ;;  %v205_v58 = vadd.f32 %v197_v47, %v148_v53  ;;  %v5054_v53 = vld [vmem:[#allocation2 + $0x70] sm:$0xff] }
  0xf2   :  { %v177_v40 = vpop.permute.xlu1 %176 }
  0xf3   :  { %v260_v43 = vadd.f32 %v252_v38, %v203_v32  ;;  %v198_v48 = vmul.f32 %v177_v40, %v158_v39 }
  0xf4   :  { %v230_v49 = vpop.permute.xlu0 %229 }
  0xf5   :  { %v268_v52 = vpack.c.bf16 %v261_v45, %v260_v43  ;;  %v254_v54 = vmul.f32 %v230_v49, %v5028_v42  ;;  %v206_v59 = vadd.f32 %v198_v48, %v149_v46 }
  0xf7   :  { %v234_v56 = vpop.permute.xlu1 %233  ;;  %3743 = vmatprep.subr.bf16.mxu0 %v268_v52  ;;  %v262_v12 = vadd.f32 %v254_v54, %v205_v58  ;;  %v5056_v54 = vld [vmem:[#allocation2 + $0x30] sm:$0xff] }
  0xf8   :  { %v255_v60 = vmul.f32 %v234_v56, %v5030_v50  ;;  %3744 = vmatpush3.bf16.msra.mxu0 %v268_v52  ;;  %v238_v31 = vpop.permute.xlu0 %237  ;;  %v5058_v56 = vld [vmem:[#allocation2 + $0x78] sm:$0xff] }
  0xf9   :  { %v256_v39 = vmul.f32 %v238_v31, %v5044_v30 }
  0xfa   :  { %v263_v13 = vadd.f32 %v255_v60, %v206_v59  ;;  %v5061_v59 = vld [vmem:[#allocation2 + $0x38] sm:$0xff] }
  0xfc   :  { %v129_v55 = vpop.permute.xlu1 %128  ;;  %v269_v15 = vpack.c.bf16 %v263_v13, %v262_v12  ;;  %v5065_v13 = vld [vmem:[#allocation2 + $0xb0] sm:$0xff] }
  0xfd   :  { %v150_v32 = vmul.f32 %v129_v55, %v5037_v22  ;;  %v246_v55 = vpop.permute.xlu0 %245 }
  0xfe   :  { %3745 = vmatprep.subr.bf16.mxu0 %v269_v15  ;;  %v258_v31 = vmul.f32 %v246_v55, %v5065_v13 }
  0xff   :  { %3746 = vmatpush3.bf16.msra.mxu0 %v269_v15  ;;  %v5067_v15 = vld [vmem:[#allocation2 + $0xb8] sm:$0xff] }
 0x101   :  { %v181_v20 = vpop.permute.xlu1 %180 }
 0x102   :  { %v199_v26 = vmul.f32 %v181_v20, %v5035_v21  ;;  %v153_v20 = vmul.f32 %v5014_v16, %v5061_v59 }
 0x104   :  { %v207_v38 = vadd.f32 %v199_v26, %v150_v32 }
 0x105   :  { %v185_v27 = vpop.permute.xlu1 %184 }
 0x106   :  { %v200_v33 = vmul.f32 %v185_v27, %v5039_v63  ;;  %v264_v46 = vadd.f32 %v256_v39, %v207_v38 }
 0x108   :  { %v208_v43 = vadd.f32 %v200_v33, %v151_v37 }
 0x10a   :  { %v242_v40 = vpop.permute.xlu1 %241 }
 0x10b   :  { %v257_v45 = vmul.f32 %v242_v40, %v5048_v36 }
 0x10d   :  { %v265_v47 = vadd.f32 %v257_v45, %v208_v43 }
 0x10f   :  { %v139_v48 = vpop.permute.xlu1 %138  ;;  %v270_v49 = vpack.c.bf16 %v265_v47, %v264_v46  ;;  %v4780_v46 = vmov 11  }
 0x110   :  { %v152_v60 = vmul.f32 %v139_v48, %v5056_v54 }
 0x111   :  { %3747 = vmatprep.subr.bf16.mxu0 %v270_v49 }
 0x112   :  { %3748 = vmatpush3.bf16.msra.mxu0 %v270_v49 }
 0x114   :  { %v189_v52 = vpop.permute.xlu1 %188 }
 0x115   :  { %v201_v61 = vmul.f32 %v189_v52, %v5054_v53 }
 0x117   :  { %v209_v26 = vadd.f32 %v201_v61, %v152_v60 }
 0x118   :  { %v193_v58 = vpop.permute.xlu1 %192 }
 0x119   :  { %v202_v12 = vmul.f32 %v193_v58, %v5058_v56  ;;  %v266_v37 = vadd.f32 %v258_v31, %v209_v26 }
 0x11b   :  { %v210_v32 = vadd.f32 %v202_v12, %v153_v20 }
 0x11d   :  { %v250_v27 = vpop.permute.xlu1 %249 }
 0x11e   :  { %v259_v33 = vmul.f32 %v250_v27, %v5067_v15 }
 0x120   :  { %v267_v38 = vadd.f32 %v259_v33, %v210_v32  ;;  %v4781_v32 = vmov 12  }
 0x122   :  { %v271_v39 = vpack.c.bf16 %v267_v38, %v266_v37 }
 0x124   :  { %3749 = vmatprep.subr.bf16.mxu0 %v271_v39 }
 0x125   :  { %3750 = vmatpush3.bf16.msra.mxu0 %v271_v39 }
 0x128   :  { %3752 = vmatmul.mubr.msk.bf16.vlgmr.msra.gmra.mrb[0].mxu0 %vm508_vm0, %v4968_v23 }
 0x129   :  { %3755 = vmatprep.mubr.msk.bf16.mxu0 %vm508_vm0, %v4958_v14  ;;  %v4778_v14 = vmov 0.0  }
 0x12a   :  { %3803 = vmatprep.subr.bf16.mxu0 %v4778_v14 }
 0x130   :  { %3756 = vmatmul.mubr.msk.bf16.gmra.mrb[4].mxu0 %vm508_vm0, %v4962_v18  ;;  %v4071_v18 = vpop.permute.xlu1 %4070 }
 0x131   :  { %3759 = vmatprep.mubr.msk.bf16.mxu0 %vm508_vm0, %v4970_v24  ;;  %v4077_v24 = vpop.permute.xlu0 %4076 }
 0x134   :  { %v4082_v23 = vpop.permute.xlu1 %4081 }
 0x135   :  { %v4092_v37 = vpop.permute.xlu0 %4091 }
 0x138   :  { %3760 = vmatmul.mubr.msk.bf16.gmra.mrb[8].mxu0 %vm508_vm0, %v4972_v25  ;;  %v4779_v25 = vmov 10  }
 0x139   :  { %3763 = vmatprep.mubr.msk.bf16.mxu0 %vm508_vm0, %v4980_v34  ;;  %4130 = vset.pattern.permute.xlu1 %v4779_v25 }
 0x13a   :  { %1025 = vperm.xlu1 %4130, %v4917_v2  }
 0x13e   :  { %1029 = vperm.xlu1 %4130, %v4921_v3  }
 0x140   :  { %3764 = vmatmul.mubr.msk.bf16.gmra.mrb[12].mxu0 %vm508_vm0, %v4982_v35 }
 0x141   :  { %3767 = vmatprep.mubr.msk.bf16.mxu0 %vm508_vm0, %v4988_v44  ;;  %v4087_v44 = vpop.permute.xlu1 %4086 }
 0x142   :  { %4131 = vset.pattern.permute.xlu1 %v4780_v46 }
 0x143   :  { %1065 = vperm.xlu1 %4131, %v4917_v2  }
 0x145   :  { %v4097_v48 = vpop.permute.xlu1 %4096 }
 0x147   :  { %1069 = vperm.xlu1 %4131, %v4921_v3  }
 0x148   :  { %3768 = vmatmul.mubr.msk.bf16.gmra.mrb[16].mxu0 %vm508_vm0, %v4992_v51 }
 0x149   :  { %3771 = vmatprep.mubr.msk.bf16.mxu0 %vm508_vm0, %v4996_v57  ;;  %v4107_v27 = vpop.permute.xlu1 %4106 }
 0x14b   :  { %4132 = vset.pattern.permute.xlu1 %v4781_v32 }
 0x14c   :  { %1113 = vperm.xlu1 %4132, %v4917_v2  }
 0x150   :  { %3772 = vmatmul.mubr.msk.bf16.gmra.mrb[20].mxu0 %vm508_vm0, %v5004_v0  ;;  %1117 = vperm.xlu1 %4132, %v4921_v3  }
 0x151   :  { %3811 = vmatprep.mubr.msk.bf16.mxu0 %vm4784_vm1, %v4778_v14 }
 0x154   :  { %4133 = vset.pattern.permute.xlu1 %v4779_v25 }
 0x155   :  { %1033 = vperm.xlu1 %4133, %v4931_v7  }
 0x159   :  { %4134 = vset.pattern.permute.xlu1 %v4780_v46 }
 0x15a   :  { %1073 = vperm.xlu1 %4134, %v4931_v7  }
 0x15e   :  { %1077 = vperm.xlu1 %4134, %v4923_v4  }
 0x1fb   :  { %v3753_v34 = vpop.f32.mrb[0].mxu0 }
 0x1fc   :  { %v579_v35 = vpop.f32.mrb[1].mxu0  ;;  %v4553_v57 = vadd.low.f32.bf16 %v3753_v34, %v4077_v24 }
 0x1fd   :  { %v3754_v51 = vpop.f32.mrb[2].mxu0  ;;  %v4555_v40 = vadd.low.f32.bf16 %v579_v35, %v4071_v18 }
 0x1fe   :  { %v4554_v16 = vadd.high.f32.bf16 %v3754_v51, %v4077_v24  ;;  %v582_v0 = vpop.f32.mrb[3].mxu0 }
 0x1ff   :  { %v4556_v43 = vadd.high.f32.bf16 %v582_v0, %v4071_v18 }
 0x200   :  { %v675_v45 = vpack.c.bf16 %v4554_v16, %v4553_v57  ;;  %v4102_v16 = vpop.permute.xlu0 %4101 }
 0x201   :  { %v674_v47 = vpack.c.bf16 %v4556_v43, %v4555_v40 }
 0x203   :  { %v3757_v49 = vpop.f32.mrb[4].mxu0  ;;  %682 = vxpose.xlu0.c.b16.start [1/4] (short) (narrow) %v674_v47, 64 }
 0x204   :  { %v595_v52 = vpop.f32.mrb[5].mxu0  ;;  %v4557_v58 = vadd.low.f32.bf16 %v3757_v49, %v4087_v44 }
 0x205   :  { %v3758_v61 = vpop.f32.mrb[6].mxu0  ;;  %v4559_v55 = vadd.low.f32.bf16 %v595_v52, %v4082_v23 }
 0x206   :  { %v4558_v60 = vadd.high.f32.bf16 %v3758_v61, %v4087_v44  ;;  %v598_v12 = vpop.f32.mrb[7].mxu0 }
 0x207   :  { %v4560_v20 = vadd.high.f32.bf16 %v598_v12, %v4082_v23  ;;  %683 = vxpose.xlu0.c.b16.cont [2/4] (short) (narrow) %v675_v45, 64  ;;  %v4112_v23 = vpop.permute.xlu1 %4111 }
 0x208   :  { %v677_v26 = vpack.c.bf16 %v4558_v60, %v4557_v58 }
 0x209   :  { %v676_v31 = vpack.c.bf16 %v4560_v20, %v4559_v55 }
 0x20b   :  { %v3761_v33 = vpop.f32.mrb[8].mxu0  ;;  %684 = vxpose.xlu0.c.b16.cont [3/4] (short) (narrow) %v676_v31, 64  ;;  %v4117_v43 = vpop.permute.xlu1 %4116 }
 0x20c   :  { %v611_v38 = vpop.f32.mrb[9].mxu0  ;;  %v4561_v18 = vadd.low.f32.bf16 %v3761_v33, %v4097_v48 }
 0x20d   :  { %v3762_v39 = vpop.f32.mrb[10].mxu0  ;;  %v4563_v35 = vadd.low.f32.bf16 %v611_v38, %v4092_v37 }
 0x20e   :  { %v4562_v24 = vadd.high.f32.bf16 %v3762_v39, %v4097_v48  ;;  %v614_v34 = vpop.f32.mrb[11].mxu0 }
 0x20f   :  { %v4564_v44 = vadd.high.f32.bf16 %v614_v34, %v4092_v37  ;;  %685 = vxpose.xlu0.c.b16.end [4/4] (short) (narrow) %v677_v26, 64  ;;  %v4122_v12 = vpop.permute.xlu1 %4121 }
 0x210   :  { %v679_v51 = vpack.c.bf16 %v4562_v24, %v4561_v18 }
 0x211   :  { %v678_v57 = vpack.c.bf16 %v4564_v44, %v4563_v35 }
 0x213   :  { %v3765_v0 = vpop.f32.mrb[12].mxu0  ;;  %3775 = vmatprep.subr.bf16.mxu1 %v678_v57  ;;  %v4127_v18 = vpop.permute.xlu1 %4126 }
 0x214   :  { %v627_v40 = vpop.f32.mrb[13].mxu0  ;;  %3776 = vmatpush3.bf16.msra.mxu1 %v678_v57  ;;  %v4565_v47 = vadd.low.f32.bf16 %v3765_v0, %v4107_v27 }
 0x215   :  { %v3766_v45 = vpop.f32.mrb[14].mxu0  ;;  %3777 = vmatprep.subr.bf16.mxu1 %v679_v51  ;;  %v4567_v52 = vadd.low.f32.bf16 %v627_v40, %v4102_v16 }
 0x216   :  { %v4566_v48 = vadd.high.f32.bf16 %v3766_v45, %v4107_v27  ;;  %v630_v49 = vpop.f32.mrb[15].mxu0 }
 0x217   :  { %v4568_v61 = vadd.high.f32.bf16 %v630_v49, %v4102_v16 }
 0x218   :  { %v681_v58 = vpack.c.bf16 %v4566_v48, %v4565_v47  ;;  %3778 = vmatpush3.bf16.msra.mxu1 %v679_v51 }
 0x219   :  { %v680_v60 = vpack.c.bf16 %v4568_v61, %v4567_v52 }
 0x21b   :  { %v3769_v55 = vpop.f32.mrb[16].mxu0  ;;  %3779 = vmatprep.subr.bf16.mxu1 %v680_v60 }
 0x21c   :  { %v643_v20 = vpop.f32.mrb[17].mxu0  ;;  %3780 = vmatpush3.bf16.msra.mxu1 %v680_v60  ;;  %v4569_v27 = vadd.low.f32.bf16 %v3769_v55, %v4117_v43  ;;  %v4783_v55 = vmov 14  }
 0x21d   :  { %v3770_v26 = vpop.f32.mrb[18].mxu0  ;;  %3781 = vmatprep.subr.bf16.mxu1 %v681_v58  ;;  %v4571_v37 = vadd.low.f32.bf16 %v643_v20, %v4112_v23 }
 0x21e   :  { %v4570_v31 = vadd.high.f32.bf16 %v3770_v26, %v4117_v43  ;;  %v646_v33 = vpop.f32.mrb[19].mxu0 }
 0x21f   :  { %v4572_v38 = vadd.high.f32.bf16 %v646_v33, %v4112_v23 }
 0x220   :  { %v884_v39 = vpack.c.bf16 %v4570_v31, %v4569_v27  ;;  %3782 = vmatpush3.bf16.msra.mxu1 %v681_v58 }
 0x221   :  { %v883_v24 = vpack.c.bf16 %v4572_v38, %v4571_v37  ;;  %3791 = vmatprep.subr.bf16.mxu1 %v4778_v14 }
 0x222   :  { %v894_v47 = vsel %vm508_vm0, %v884_v39, 0 }
 0x223   :  { %v3773_v34 = vpop.f32.mrb[20].mxu0  ;;  %v891_v35 = vsel %vm508_vm0, %v883_v24, 0 }
 0x224   :  { %v659_v44 = vpop.f32.mrb[21].mxu0  ;;  %3804 = vmatpush3.bf16.xpose.msra.mxu0 %v891_v35  ;;  %v4573_v57 = vadd.low.f32.bf16 %v3773_v34, %v4127_v18 }
 0x225   :  { %v3774_v51 = vpop.f32.mrb[22].mxu0  ;;  %3805 = vmatprep.subr.bf16.mxu0 %v4778_v14  ;;  %v4575_v40 = vadd.low.f32.bf16 %v659_v44, %v4122_v12 }
 0x226   :  { %v4574_v16 = vadd.high.f32.bf16 %v3774_v51, %v4127_v18  ;;  %v662_v0 = vpop.f32.mrb[23].mxu0 }
 0x227   :  { %v4576_v43 = vadd.high.f32.bf16 %v662_v0, %v4122_v12  ;;  %v4782_v12 = vmov 13  }
 0x228   :  { %v886_v23 = vpack.c.bf16 %v4574_v16, %v4573_v57  ;;  %4137 = vset.pattern.permute.xlu1 %v4782_v12  ;;  %4135 = vset.pattern.permute.xlu0 %v4782_v12 }
 0x229   :  { %v885_v45 = vpack.c.bf16 %v4576_v43, %v4575_v40  ;;  %1174 = vperm.xlu1 %4137, %v4921_v3   ;;  %1170 = vperm.xlu0 %4135, %v4917_v2  }
 0x22a   :  { %v900_v49 = vsel %vm508_vm0, %v886_v23, 0 }
 0x22b   :  { %v897_v48 = vsel %vm508_vm0, %v885_v45, 0 }
 0x22c   :  { %3806 = vmatpush3.bf16.xpose.msra.mxu0 %v894_v47 }
 0x22d   :  { %3807 = vmatprep.subr.bf16.mxu0 %v4778_v14  ;;  %4138 = vset.pattern.permute.xlu1 %v4781_v32 }
 0x22e   :  { %4136 = vset.pattern.permute.xlu0 %v4779_v25  ;;  %1121 = vperm.xlu1 %4138, %v4931_v7  }
 0x22f   :  { %1037 = vperm.xlu0 %4136, %v4923_v4  }
 0x232   :  { %4139 = vset.pattern.permute.xlu1 %v4783_v55 }
 0x233   :  { %1041 = vperm.xlu0 %4136, %v4943_v9   ;;  %1227 = vperm.xlu1 %4139, %v4917_v2   ;;  %v1026_v2 = vpop.permute.xlu1 %1025 }
 0x234   :  { %3808 = vmatpush3.bf16.xpose.msra.mxu0 %v897_v48 }
 0x235   :  { %3809 = vmatprep.subr.bf16.mxu0 %v4778_v14 }
 0x237   :  { %4140 = vset.pattern.permute.xlu0 %v4781_v32  ;;  %1231 = vperm.xlu1 %4139, %v4921_v3   ;;  %v1030_v3 = vpop.permute.xlu1 %1029 }
 0x238   :  { %1125 = vperm.xlu0 %4140, %v4923_v4   ;;  %v1057_v34 = vmul.f32 %v1030_v3, %v5010_v11  ;;  %v1162_v3 = vld [vmem:[#allocation2 + $0xc8] sm:$0xff] }
 0x23b   :  { %4141 = vset.pattern.permute.xlu1 %v4779_v25 }
 0x23c   :  { %3810 = vmatpush3.bf16.xpose.msra.mxu0 %v900_v49  ;;  %1129 = vperm.xlu0 %4140, %v4943_v9   ;;  %v1161_v49 = vld [vmem:[#allocation2 + $0xc0] sm:$0xff] }
 0x23d   :  { %1045 = vperm.xlu1 %4141, %v4929_v6  }
 0x240   :  { %4144 = vset.pattern.permute.xlu0 %v4780_v46 }
 0x241   :  { %4142 = vset.pattern.permute.xlu1 %v4780_v46  ;;  %1085 = vperm.xlu0 %4144, %v4929_v6  }
 0x242   :  { %1081 = vperm.xlu1 %4142, %v4943_v9  }
 0x245   :  { %1089 = vperm.xlu0 %4144, %v4946_v10  }
 0x246   :  { %4143 = vset.pattern.permute.xlu1 %v4782_v12 }
 0x247   :  { %1178 = vperm.xlu1 %4143, %v4931_v7  }
 0x249   :  { %4148 = vset.pattern.permute.xlu0 %v4783_v55 }
 0x24a   :  { %1239 = vperm.xlu0 %4148, %v4923_v4  }
 0x24b   :  { %1182 = vperm.xlu1 %4143, %v4923_v4   ;;  %v1066_v4 = vpop.permute.xlu1 %1065 }
 0x24e   :  { %1243 = vperm.xlu0 %4148, %v4943_v9  }
 0x24f   :  { %4145 = vset.pattern.permute.xlu1 %v4781_v32 }
 0x250   :  { %1133 = vperm.xlu1 %4145, %v4929_v6  }
 0x252   :  { %4152 = vset.pattern.permute.xlu0 %v4782_v12 }
 0x253   :  { %1190 = vperm.xlu0 %4152, %v4929_v6  }
 0x254   :  { %4146 = vset.pattern.permute.xlu1 %v4783_v55 }
 0x255   :  { %1235 = vperm.xlu1 %4146, %v4931_v7   ;;  %v1070_v7 = vpop.permute.xlu1 %1069 }
 0x256   :  { %v1097_v35 = vmul.f32 %v1070_v7, %v5008_v5 }
 0x257   :  { %1198 = vperm.xlu0 %4152, %v4934_v8  }
 0x258   :  { %v1105_v48 = vadd.f32 %v1097_v35, %v1057_v34 }
 0x259   :  { %4147 = vset.pattern.permute.xlu1 %v4779_v25 }
 0x25a   :  { %1049 = vperm.xlu1 %4147, %v4946_v10  }
 0x25b   :  { %4156 = vset.pattern.permute.xlu0 %v4777_v19 }
 0x25e   :  { %1053 = vperm.xlu1 %4147, %v4934_v8  }
 0x262   :  { %4149 = vset.pattern.permute.xlu1 %v4780_v46 }
 0x263   :  { %1093 = vperm.xlu1 %4149, %v4934_v8  }
 0x267   :  { %4150 = vset.pattern.permute.xlu1 %v4782_v12 }
 0x268   :  { %1186 = vperm.xlu1 %4150, %v4943_v9   ;;  %v1114_v9 = vpop.permute.xlu1 %1113 }
 0x269   :  { %v690_v52 = vpop.trf.xlu0  ;;  %v1144_v43 = vmul.f32 %v1114_v9, %v5022_v28 }
 0x26a   :  { %3783 = vmatprep.mubr.msk.bf16.mxu1 %vm508_vm0, %v690_v52 }
 0x26c   :  { %4151 = vset.pattern.permute.xlu1 %v4781_v32  ;;  %v1118_v25 = vpop.permute.xlu1 %1117 }
 0x26d   :  { %v691_v61 = vpop.trf.xlu0  ;;  %1137 = vperm.xlu1 %4151, %v4946_v10  }
 0x26e   :  { %3784 = vmatmul.mubr.msk.bf16.vlgmr.msra.gmra.mrb[0].mxu1 %vm508_vm0, %v691_v61 }
 0x270   :  { %v5169_v46 = vpop.permute.xlu1 %1033 }
 0x271   :  { %v692_v58 = vpop.trf.xlu0  ;;  %1141 = vperm.xlu1 %4151, %v4934_v8  }
 0x272   :  { %3787 = vmatprep.mubr.msk.bf16.mxu1 %vm508_vm0, %v692_v58  ;;  %v1145_v58 = vmul.f32 %v1118_v25, %v5016_v17 }
 0x274   :  { %v5171_v32 = vpop.permute.xlu1 %1073  ;;  %v1153_v17 = vadd.f32 %v1145_v58, %v1105_v48 }
 0x275   :  { %v693_v60 = vpop.trf.xlu0  ;;  %4153 = vset.pattern.permute.xlu1 %v4783_v55 }
 0x276   :  { %3788 = vmatmul.mubr.msk.bf16.gmra.mrb[4].mxu1 %vm508_vm0, %v693_v60  ;;  %1247 = vperm.xlu1 %4153, %v4929_v6  }
 0x277   :  { %3799 = vmatprep.mubr.msk.bf16.mxu1 %vm4784_vm1, %v4778_v14 }
 0x278   :  { %v5173_v6 = vpop.permute.xlu1 %1077 }
 0x27a   :  { %4154 = vset.pattern.permute.xlu1 %v4782_v12 }
 0x27b   :  { %1194 = vperm.xlu1 %4154, %v4946_v10  }
 0x27f   :  { %4155 = vset.pattern.permute.xlu1 %v4783_v55 }
 0x280   :  { %1251 = vperm.xlu1 %4155, %v4946_v10   ;;  %v1056_v10 = vmul.f32 %v1026_v2, %v5006_v1 }
 0x284   :  { %1255 = vperm.xlu1 %4155, %v4934_v8   ;;  %v1096_v8 = vmul.f32 %v1066_v4, %v5002_v62 }
 0x286   :  { %v1104_v40 = vadd.f32 %v1096_v8, %v1056_v10 }
 0x288   :  { %4162 = vset.pattern.permute.xlu1 %v4777_v19  ;;  %v1152_v2 = vadd.f32 %v1144_v43, %v1104_v40 }
 0x2a8   :  { %v1175_v44 = vpop.permute.xlu1 %1174  ;;  %v1171_v52 = vpop.permute.xlu0 %1170 }
 0x2a9   :  { %v1202_v25 = vmul.f32 %v1175_v44, %v1162_v3 }
 0x2ad   :  { %v5181_v60 = vpop.permute.xlu1 %1121 }
 0x341   :  { %v3785_v20 = vpop.f32.mrb[0].mxu1 }
 0x342   :  { %v777_v26 = vmul.f32 0.125, %v3785_v20  ;;  %v744_v27 = vpop.f32.mrb[1].mxu1  ;;  %v1201_v20 = vmul.f32 %v1171_v52, %v1161_v49 }
 0x343   :  { %v775_v31 = vmul.f32 0.125, %v744_v27  ;;  %v3786_v33 = vpop.f32.mrb[2].mxu1 }
 0x344   :  { %v785_v37 = vsub.f32 0.0, %v777_v26  ;;  %v778_v38 = vmul.f32 0.125, %v3786_v33  ;;  %v747_v39 = vpop.f32.mrb[3].mxu1  ;;  %v1209_v34 = vadd.f32 %v1201_v20, %v1152_v2 }
 0x345   :  { %v783_v18 = vsub.f32 0.0, %v775_v31  ;;  %v776_v24 = vmul.f32 0.125, %v747_v39  ;;  %v1218_v31 = vld [vmem:[#allocation2 + $0x100] sm:$0xff] }
 0x346   :  { %v793_v51 = vmin.f32 %v785_v37, 60.0  ;;  %v786_v57 = vsub.f32 0.0, %v778_v38  ;;  %v1228_v38 = vpop.permute.xlu1 %1227 }
 0x347   :  { %v791_v16 = vmin.f32 %v783_v18, 60.0  ;;  %v784_v0 = vsub.f32 0.0, %v776_v24  ;;  %v1258_v24 = vmul.f32 %v1228_v38, %v1218_v31 }
 0x348   :  { %v803_v1 = vmul.f32 1.442695, %v793_v51  ;;  %v794_v23 = vmin.f32 %v786_v57, 60.0  ;;  %v1219_v57 = vld [vmem:[#allocation2 + $0x108] sm:$0xff] }
 0x349   :  { %v799_v62 = vmul.f32 1.442695, %v791_v16  ;;  %v792_v45 = vmin.f32 %v784_v0, 60.0  ;;  %v3789_v47 = vpop.f32.mrb[4].mxu1  ;;  %v1210_v0 = vadd.f32 %v1202_v25, %v1153_v17 }
 0x34a   :  { %4414 = vpow2.f32 %v803_v1  ;;  %v805_v11 = vmul.f32 1.442695, %v794_v23  ;;  %v781_v61 = vmul.f32 0.125, %v3789_v47  ;;  %v760_v5 = vpop.f32.mrb[5].mxu1  ;;  %v1232_v43 = vpop.permute.xlu1 %1231  ;;  %v1266_v23 = vadd.f32 %v1258_v24, %v1209_v34  ;;  %v5195_v34 = vld [vmem:[#allocation8 + $0x80] sm:$0xff]  }
 0x34b   :  { %4416 = vpow2.f32 %v799_v62  ;;  %v801_v12 = vmul.f32 1.442695, %v792_v45  ;;  %v779_v55 = vmul.f32 0.125, %v760_v5  ;;  %v3790_v28 = vpop.f32.mrb[6].mxu1  ;;  %v1259_v44 = vmul.f32 %v1232_v43, %v1219_v57  ;;  %v5201_v57 = vld [vmem:[#allocation8 + $0x98] sm:$0xff]  }
 0x34c   :  { %4418 = vpow2.f32 %v805_v11  ;;  %v789_v4 = vsub.f32 0.0, %v781_v61  ;;  %v782_v7 = vmul.f32 0.125, %v3790_v28  ;;  %v763_v9 = vpop.f32.mrb[7].mxu1 }
 0x34d   :  { %4420 = vpow2.f32 %v801_v12  ;;  %v787_v26 = vsub.f32 0.0, %v779_v55  ;;  %v780_v27 = vmul.f32 0.125, %v763_v9  ;;  %v1267_v49 = vadd.f32 %v1259_v44, %v1210_v0 }
 0x34e   :  { %v797_v33 = vmin.f32 %v789_v4, 60.0  ;;  %v790_v10 = vsub.f32 0.0, %v782_v7  ;;  %v5193_v24 = vpop.permute.xlu1 %1045  ;;  %v1312_v0 = vunpack.c.h.bf16 %v5195_v34 }
 0x34f   :  { %v795_v8 = vmin.f32 %v787_v26, 60.0  ;;  %v788_v37 = vsub.f32 0.0, %v780_v27  ;;  %v5183_v5 = vpack.c.bf16 %v1267_v49, %v1266_v23  ;;  %v1318_v23 = vunpack.c.h.bf16 %v5201_v57 }
 0x350   :  { %v811_v39 = vmul.f32 1.442695, %v797_v33  ;;  %v798_v18 = vmin.f32 %v790_v10, 60.0 }
 0x351   :  { %v807_v35 = vmul.f32 1.442695, %v795_v8  ;;  %v796_v51 = vmin.f32 %v788_v37, 60.0  ;;  %3827 = vmatprep.subr.bf16.mxu0 %v5183_v5 }
 0x352   :  { %4422 = vpow2.f32 %v811_v39  ;;  %v813_v16 = vmul.f32 1.442695, %v798_v18  ;;  %v831_v39 = vld [vmem:[#allocation10 + $0x58] sm:$0x3] }
 0x353   :  { %4424 = vpow2.f32 %v807_v35  ;;  %v809_v40 = vmul.f32 1.442695, %v796_v51  ;;  %v833_v18 = vpack.c.bf16 %v831_v39, %v831_v39  ;;  %v5197_v35 = vld [vmem:[#allocation8 + $0x88] sm:$0xff]   ;;  %v5199_v51 = vld [vmem:[#allocation8 + $0x90] sm:$0xff]  }
 0x354   :  { %v4415_v1 = vpop.eup %4414  ;;  %4426 = vpow2.f32 %v813_v16  ;;  %v1311_v16 = vunpack.c.l.bf16 %v5195_v34  ;;  %v1314_v43 = vunpack.c.h.bf16 %v5197_v35  ;;  %v1315_v44 = vunpack.c.l.bf16 %v5199_v51 }
 0x355   :  { %v4417_v62 = vpop.eup %4416  ;;  %v817_v45 = vadd.f32 1.0, %v4415_v1  ;;  %4428 = vpow2.f32 %v809_v40  ;;  %v1313_v40 = vunpack.c.l.bf16 %v5197_v35  ;;  %v1317_v1 = vunpack.c.l.bf16 %v5201_v57 }
 0x356   :  { %v4419_v47 = vpop.eup %4418  ;;  %v815_v48 = vadd.f32 1.0, %v4417_v62  ;;  %v1316_v62 = vunpack.c.h.bf16 %v5199_v51 }
 0x357   :  { %v4421_v52 = vpop.eup %4420  ;;  %4430 = vrcp.f32 %v817_v45  ;;  %v818_v11 = vadd.f32 1.0, %v4419_v47  ;;  %v4350_v45 = vld [vmem:[#allocation8 + $0x60] sm:$0xff]   ;;  %v5211_v47 = vld [vmem:[#allocation8 + $0xa8] sm:$0xff]   ;;  %v4163_v49 = vpack.i.bf16 %v1314_v43, %v1313_v40  ;;  %v1038_v43 = vpop.permute.xlu0 %1037 }
 0x358   :  { %4432 = vrcp.f32 %v815_v48  ;;  %v816_v61 = vadd.f32 1.0, %v4421_v52  ;;  %v4157_v48 = vpack.i.bf16 %v1312_v0, %v1311_v16  ;;  %v5213_v52 = vld [vmem:[#allocation8 + $0xa0] sm:$0xff]   ;;  %v4353_v0 = vld [vmem:[#allocation8 + $0x78] sm:$0xff]  }
 0x359   :  { %4434 = vrcp.f32 %v818_v11  ;;  %v1321_v11 = vunpack.c.l.bf16 %v5211_v47  ;;  %4164 = vperm.xlu1 %4162, %v4163_v49   ;;  %v981_v40 = vsel %vm508_vm0, %v4353_v0, 0 }
 0x35a   :  { %4436 = vrcp.f32 %v816_v61  ;;  %v1322_v61 = vunpack.c.h.bf16 %v5211_v47  ;;  %4158 = vperm.xlu0 %4156, %v4157_v48  }
 0x35c   :  { %v4423_v58 = vpop.eup %4422 }
 0x35d   :  { %v4425_v12 = vpop.eup %4424  ;;  %v821_v55 = vadd.f32 1.0, %v4423_v58  ;;  %v4173_v58 = vpack.i.bf16 %v1318_v23, %v1317_v1 }
 0x35e   :  { %v4427_v28 = vpop.eup %4426  ;;  %v819_v2 = vadd.f32 1.0, %v4425_v12  ;;  %v4168_v12 = vpack.i.bf16 %v1316_v62, %v1315_v44  ;;  %v1042_v44 = vpop.permute.xlu0 %1041 }
 0x35f   :  { %v4429_v3 = vpop.eup %4428  ;;  %4438 = vrcp.f32 %v821_v55  ;;  %v822_v4 = vadd.f32 1.0, %v4427_v28  ;;  %v1319_v55 = vunpack.c.l.bf16 %v5213_v52  ;;  %v1320_v28 = vunpack.c.h.bf16 %v5213_v52  ;;  %4174 = vperm.xlu0 %4156, %v4173_v58  }
 0x360   :  { %4440 = vrcp.f32 %v819_v2  ;;  %v820_v7 = vadd.f32 1.0, %v4429_v3  ;;  %v1082_v2 = vpop.permute.xlu1 %1081  ;;  %v972_v3 = vsel %vm508_vm0, %v4350_v45, 0  ;;  %4169 = vperm.xlu1 %4162, %v4168_v12  }
 0x361   :  { %v4431_v9 = vpop.eup %4430  ;;  %4442 = vrcp.f32 %v822_v4  ;;  %v5220_v4 = vld [vmem:[#allocation8 + $0xb8] sm:$0xff]  }
 0x362   :  { %v4433_v20 = vpop.eup %4432  ;;  %4444 = vrcp.f32 %v820_v7  ;;  %v5222_v7 = vld [vmem:[#allocation8 + $0xb0] sm:$0xff]   ;;  %v1126_v45 = vpop.permute.xlu0 %1125 }
 0x363   :  { %v4435_v26 = vpop.eup %4434 }
 0x364   :  { %v4437_v27 = vpop.eup %4436  ;;  %v835_v31 = vpack.c.bf16 %v4435_v26, %v4431_v9  ;;  %v4183_v9 = vpack.i.bf16 %v1322_v61, %v1321_v11  ;;  %v4351_v26 = vld [vmem:[#allocation8 + $0x68] sm:$0xff]  }
 0x365   :  { %v834_v33 = vpack.c.bf16 %v4437_v27, %v4433_v20  ;;  %v1325_v20 = vunpack.c.l.bf16 %v5220_v4  ;;  %v4178_v27 = vpack.i.bf16 %v1320_v28, %v1319_v55  ;;  %v1058_v28 = vmul.f32 %v5169_v46, %v5026_v41 }
 0x366   :  { %4184 = vperm.xlu0 %4156, %v4183_v9   ;;  %v1130_v49 = vpop.permute.xlu0 %1129  ;;  %v1060_v41 = vmul.f32 %v1042_v44, %v5037_v22  ;;  %v1100_v46 = vmul.f32 %v1082_v2, %v5035_v21 }
 0x367   :  { %3792 = vmatpush3.bf16.msra.mxu1 %v834_v33  ;;  %v1323_v33 = vunpack.c.l.bf16 %v5222_v7  ;;  %4179 = vperm.xlu1 %4162, %v4178_v27   ;;  %v1148_v21 = vmul.f32 %v1130_v49, %v5044_v30  ;;  %v5273_v49 = vld [vmem:[#allocation2 + $0xe0] sm:$0xff] }
 0x368   :  { %3793 = vmatprep.subr.bf16.mxu1 %v4778_v14 }
 0x369   :  { %v4439_v10 = vpop.eup %4438 }
 0x36a   :  { %v4441_v17 = vpop.eup %4440  ;;  %v1086_v61 = vpop.permute.xlu0 %1085 }
 0x36b   :  { %v4443_v25 = vpop.eup %4442  ;;  %3794 = vmatpush3.bf16.msra.mxu1 %v835_v31  ;;  %v1326_v31 = vunpack.c.h.bf16 %v5220_v4  ;;  %v1101_v0 = vmul.f32 %v1086_v61, %v5039_v63 }
 0x36c   :  { %v4445_v8 = vpop.eup %4444  ;;  %3795 = vmatprep.subr.bf16.mxu1 %v4778_v14  ;;  %v837_v37 = vpack.c.bf16 %v4443_v25, %v4439_v10  ;;  %v1324_v10 = vunpack.c.h.bf16 %v5222_v7  ;;  %v975_v25 = vsel %vm508_vm0, %v4351_v26, 0  ;;  %v5240_v26 = vld [vmem:[#allocation2 + $0x58] sm:$0xff] }
 0x36d   :  { %v836_v38 = vpack.c.bf16 %v4445_v8, %v4441_v17  ;;  %v1179_v17 = vpop.permute.xlu1 %1178  ;;  %v4193_v8 = vpack.i.bf16 %v1326_v31, %v1325_v20  ;;  %v1099_v27 = vmul.f32 %v5240_v26, %v5173_v6  ;;  %v5244_v31 = vld [vmem:[#allocation2 + $0x18] sm:$0xff]  ;;  %v1147_v6 = vmul.f32 %v1126_v45, %v5030_v50  ;;  %v5267_v45 = vld [vmem:[#allocation2 + $0xe8] sm:$0xff] }
 0x36e   :  { %v1090_v12 = vpop.permute.xlu0 %1089  ;;  %v5263_v50 = vld [vmem:[#allocation2 + $0x118] sm:$0xff] }
 0x36f   :  { %3796 = vmatpush3.bf16.msra.mxu1 %v836_v38  ;;  %v4352_v38 = vld [vmem:[#allocation8 + $0x70] sm:$0xff]   ;;  %4194 = vperm.xlu0 %4156, %v4193_v8  }
 0x370   :  { %3797 = vmatprep.subr.bf16.mxu1 %v4778_v14 }
 0x371   :  { %v1183_v39 = vpop.permute.xlu1 %1182 }
 0x372   :  { %v1240_v20 = vpop.permute.xlu0 %1239 }
 0x373   :  { %3798 = vmatpush3.bf16.msra.mxu1 %v837_v37  ;;  %v4188_v37 = vpack.i.bf16 %v1324_v10, %v1323_v33  ;;  %v1059_v33 = vmul.f32 %v5244_v31, %v1038_v43 }
 0x374   :  { %3815 = vmatprep.subr.bf16.mxu1 %v4778_v14 }
 0x375   :  { %4189 = vperm.xlu1 %4162, %v4188_v37   ;;  %v1134_v16 = vpop.permute.xlu1 %1133  ;;  %v1107_v37 = vadd.f32 %v1099_v27, %v1059_v33  ;;  %v1261_v33 = vmul.f32 %v1240_v20, %v5263_v50  ;;  %v5285_v20 = vld [vmem:[#allocation2 + $0xf0] sm:$0xff] }
 0x376   :  { %3800 = vmatmul.mubr.msk.bf16.vlgmr.msra.gmra.mrb[8].mxu1 %vm508_vm0, %v833_v18  ;;  %v978_v18 = vsel %vm508_vm0, %v4352_v38, 0  ;;  %v1244_v8 = vpop.permute.xlu0 %1243  ;;  %v1061_v38 = vmul.f32 %v5193_v24, %v5042_v29  ;;  %v1149_v29 = vmul.f32 %v1134_v16, %v5048_v36 }
 0x377   :  { %3823 = vmatprep.mubr.msk.bf16.mxu1 %vm4784_vm1, %v4778_v14  ;;  %v1155_v2 = vadd.f32 %v1147_v6, %v1107_v37  ;;  %v832_v37 = vld [vmem:[#allocation10 + $0x5a] sm:$0x3] }
 0x379   :  { %v1236_v1 = vpop.permute.xlu1 %1235 }
 0x37a   :  { %v1191_v61 = vpop.permute.xlu0 %1190 }
 0x37c   :  { %3816 = vmatpush3.bf16.xpose.msra.mxu1 %v972_v3  ;;  %v5236_v3 = vld [vmem:[#allocation2 + $0x50] sm:$0xff] }
 0x37d   :  { %3817 = vmatprep.subr.bf16.mxu1 %v4778_v14  ;;  %v1050_v23 = vpop.permute.xlu1 %1049  ;;  %v1098_v9 = vmul.f32 %v5236_v3, %v5171_v32 }
 0x37e   :  { %v1062_v30 = vmul.f32 %v1050_v23, %v5056_v54 }
 0x37f   :  { %v1106_v10 = vadd.f32 %v1098_v9, %v1058_v28  ;;  %v1109_v28 = vadd.f32 %v1101_v0, %v1061_v38  ;;  %v5270_v9 = vld [vmem:[#allocation2 + $0x110] sm:$0xff] }
 0x381   :  { %v1054_v62 = vpop.permute.xlu1 %1053  ;;  %v1157_v16 = vadd.f32 %v1149_v29, %v1109_v28 }
 0x382   :  { %v1063_v24 = vmul.f32 %v1054_v62, %v5061_v59  ;;  %v1206_v59 = vmul.f32 %v1191_v61, %v5267_v45 }
 0x384   :  { %3818 = vmatpush3.bf16.xpose.msra.mxu1 %v975_v25  ;;  %v1146_v25 = vmul.f32 %v5181_v60, %v5028_v42  ;;  %v1108_v42 = vadd.f32 %v1100_v46, %v1060_v41  ;;  %v1199_v41 = vpop.permute.xlu0 %1198  ;;  %v5283_v46 = vld [vmem:[#allocation2 + $0x128] sm:$0xff]  ;;  %v1214_v6 = vadd.f32 %v1206_v59, %v1157_v16  ;;  %v1295_v59 = vld [vmem:[#allocation8 + $0xc0] sm:$0xff]  }
 0x385   :  { %3819 = vmatprep.subr.bf16.mxu1 %v4778_v14  ;;  %v1094_v48 = vpop.permute.xlu1 %1093 }
 0x386   :  { %v1154_v43 = vadd.f32 %v1146_v25, %v1106_v10  ;;  %v1103_v63 = vmul.f32 %v1094_v48, %v5058_v56  ;;  %v1156_v27 = vadd.f32 %v1148_v21, %v1108_v42  ;;  %v1260_v56 = vmul.f32 %v1236_v1, %v5270_v9  ;;  %v1168_v25 = vld [vmem:[#allocation2 + $0xf8] sm:$0xff] }
 0x387   :  { %v1208_v42 = vmul.f32 %v1199_v41, %v1168_v25 }
 0x388   :  { %v1111_v62 = vadd.f32 %v1103_v63, %v1063_v24 }
 0x389   :  { %v1187_v11 = vpop.permute.xlu1 %1186 }
 0x38a   :  { %v1205_v48 = vmul.f32 %v1187_v11, %v5273_v49 }
 0x38c   :  { %3820 = vmatpush3.bf16.xpose.msra.mxu1 %v978_v18  ;;  %v5254_v18 = vld [vmem:[#allocation2 + $0xd0] sm:$0xff]  ;;  %v1213_v0 = vadd.f32 %v1205_v48, %v1156_v27  ;;  %v1328_v48 = vunpack.c.h.bf16 %v1295_v59 }
 0x38d   :  { %3821 = vmatprep.subr.bf16.mxu1 %v4778_v14  ;;  %v1138_v58 = vpop.permute.xlu1 %1137  ;;  %v1203_v22 = vmul.f32 %v1179_v17, %v5254_v18  ;;  %v1102_v17 = vmul.f32 %v1090_v12, %v5054_v53  ;;  %v5279_v53 = vld [vmem:[#allocation2 + $0x120] sm:$0xff] }
 0x38e   :  { %v1150_v10 = vmul.f32 %v1138_v58, %v5065_v13  ;;  %v1262_v1 = vmul.f32 %v1244_v8, %v5279_v53 }
 0x38f   :  { %v1110_v23 = vadd.f32 %v1102_v17, %v1062_v30 }
 0x390   :  { %v1270_v63 = vadd.f32 %v1262_v1, %v1213_v0  ;;  %v1301_v0 = vld [vmem:[#allocation8 + $0xd8] sm:$0xff]  }
 0x391   :  { %v1142_v55 = vpop.permute.xlu1 %1141 }
 0x392   :  { %v1151_v12 = vmul.f32 %v1142_v55, %v5067_v15  ;;  %v1158_v55 = vadd.f32 %v1150_v10, %v1110_v23  ;;  %v1299_v10 = vld [vmem:[#allocation8 + $0xd0] sm:$0xff]  }
 0x394   :  { %3822 = vmatpush3.bf16.xpose.msra.mxu1 %v981_v40  ;;  %v5257_v40 = vld [vmem:[#allocation2 + $0xd8] sm:$0xff] }
 0x395   :  { %v1248_v32 = vpop.permute.xlu1 %1247  ;;  %v1204_v44 = vmul.f32 %v1183_v39, %v5257_v40  ;;  %v1211_v39 = vadd.f32 %v1203_v22, %v1154_v43  ;;  %v1159_v43 = vadd.f32 %v1151_v12, %v1111_v62  ;;  %v1327_v62 = vunpack.c.l.bf16 %v1295_v59  ;;  %v3303_v12 = vld [vmem:[#allocation10 + $0x52] sm:$0x1] }
 0x396   :  { %v1263_v22 = vmul.f32 %v1248_v32, %v5283_v46  ;;  %4013 = vpush %v3303_v12 }
 0x397   :  { %v1212_v36 = vadd.f32 %v1204_v44, %v1155_v2  ;;  %v1268_v11 = vadd.f32 %v1260_v56, %v1211_v39  ;;  %v5290_v2 = vld [vmem:[#allocation2 + $0x130] sm:$0xff]  ;;  %v1225_v44 = vld [vmem:[#allocation2 + $0x138] sm:$0xff]  ;;  %v1216_v61 = vadd.f32 %v1208_v42, %v1159_v43  ;;  %v1297_v56 = vld [vmem:[#allocation8 + $0xc8] sm:$0xff]  }
 0x398   :  { %v1271_v30 = vadd.f32 %v1263_v22, %v1214_v6  ;;  %v1330_v23 = vunpack.c.h.bf16 %v1297_v56  ;;  %v1331_v6 = vunpack.c.l.bf16 %v1299_v10 }
 0x399   :  { %v1195_v60 = vpop.permute.xlu1 %1194  ;;  %v1269_v38 = vadd.f32 %v1261_v33, %v1212_v36 }
 0x39a   :  { %v1207_v13 = vmul.f32 %v1195_v60, %v5285_v20  ;;  %v1276_v16 = vpack.c.bf16 %v1271_v30, %v1270_v63 }
 0x39b   :  { %v1275_v17 = vpack.c.bf16 %v1269_v38, %v1268_v11  ;;  %v1332_v11 = vunpack.c.h.bf16 %v1299_v10 }
 0x39c   :  { %v1215_v39 = vadd.f32 %v1207_v13, %v1158_v55  ;;  %v1333_v13 = vunpack.c.l.bf16 %v1301_v0 }
 0x39d   :  { %v1252_v54 = vpop.permute.xlu1 %1251 }
 0x39e   :  { %v1264_v27 = vmul.f32 %v1252_v54, %v5290_v2  ;;  %v1329_v54 = vunpack.c.l.bf16 %v1297_v56 }
 0x3a0   :  { %v1272_v32 = vadd.f32 %v1264_v27, %v1215_v39  ;;  %v4206_v1 = vpack.i.bf16 %v1330_v23, %v1329_v54 }
 0x3a1   :  { %v1256_v28 = vpop.permute.xlu1 %1255 }
 0x3a2   :  { %v1265_v36 = vmul.f32 %v1256_v28, %v1225_v44  ;;  %v4211_v44 = vpack.i.bf16 %v1332_v11, %v1331_v6  ;;  %v1334_v28 = vunpack.c.h.bf16 %v1301_v0 }
 0x3a4   :  { %v1273_v60 = vadd.f32 %v1265_v36, %v1216_v61  ;;  %v4225_v61 = vpack.i.bf16 %v1334_v28, %v1333_v13  ;;  %v4788_v28 = vmov 23  }
 0x3a6   :  { %v1277_v33 = vpack.c.bf16 %v1273_v60, %v1272_v32 }
 0x3c7   :  { %s4014_s8 = spop %4013 }
 0x3d8   :  { %v4165_v41 = vpop.permute.xlu1 %4164 }
 0x3d9   :  { %v4159_v25 = vpop.permute.xlu0 %4158 }
 0x449   :  { %v875_v15 = vpop.f32.mrb[8].mxu1 }
 0x44a   :  { %v881_v58 = vmul.f32 %v875_v15, %v832_v37  ;;  %v3801_v21 = vpop.f32.mrb[9].mxu1  ;;  %v4201_v37 = vpack.i.bf16 %v1328_v48, %v1327_v62 }
 0x44b   :  { %v878_v29 = vpop.f32.mrb[10].mxu1 }
 0x44c   :  { %v882_v24 = vpack.c.bf16 %v881_v58, %v881_v58  ;;  %v3802_v8 = vpop.f32.mrb[11].mxu1 }
 0x44d   :  { %v4175_v8 = vpop.permute.xlu0 %4174 }
 0x44e   :  { %3812 = vmatmul.mubr.msk.bf16.vlgmr.msra.gmra.mrb[24].mxu0 %vm508_vm0, %v882_v24 }
 0x44f   :  { %3828 = vmatpush3.bf16.msra.mxu0 %v5183_v5  ;;  %3835 = vmatprep.mubr.msk.bf16.mxu0 %vm508_vm0, %v5195_v34  ;;  %v4785_v5 = vmov 20   ;;  %v5313_v34 = vld [vmem:[#allocation7] sm:$0xff] }
 0x450   :  { %3829 = vmatprep.subr.bf16.mxu0 %v1275_v17  ;;  %4198 = vset.pattern.permute.xlu0 %v4785_v5 }
 0x451   :  { %2031 = vperm.xlu0 %4198, %v5313_v34  }
 0x453   :  { %3830 = vmatpush3.bf16.msra.mxu0 %v1275_v17  ;;  %v4170_v17 = vpop.permute.xlu1 %4169 }
 0x454   :  { %3831 = vmatprep.subr.bf16.mxu0 %v1276_v16 }
 0x457   :  { %3832 = vmatpush3.bf16.msra.mxu0 %v1276_v16 }
 0x458   :  { %3833 = vmatprep.subr.bf16.mxu0 %v1277_v33 }
 0x45b   :  { %3834 = vmatpush3.bf16.msra.mxu0 %v1277_v33 }
 0x45c   :  { %3887 = vmatprep.subr.bf16.mxu0 %v4778_v14 }
 0x45e   :  { %3836 = vmatmul.mubr.msk.bf16.vlgmr.msra.gmra.mrb[28].mxu0 %vm508_vm0, %v5197_v35  ;;  %v5316_v35 = vld [vmem:[#allocation7 + $0x8] sm:$0xff] }
 0x45f   :  { %3839 = vmatprep.mubr.msk.bf16.mxu0 %vm508_vm0, %v5199_v51  ;;  %2035 = vperm.xlu0 %4198, %v5316_v35   ;;  %v5319_v51 = vld [vmem:[#allocation7 + $0x10] sm:$0xff] }
 0x463   :  { %2039 = vperm.xlu0 %4198, %v5319_v51  }
 0x466   :  { %3840 = vmatmul.mubr.msk.bf16.gmra.mrb[32].mxu0 %vm508_vm0, %v5201_v57 }
 0x467   :  { %3843 = vmatprep.mubr.msk.bf16.mxu0 %vm508_vm0, %v5213_v52  ;;  %4200 = vset.pattern.permute.xlu0 %v4777_v19 }
 0x468   :  { %4202 = vperm.xlu0 %4200, %v4201_v37  }
 0x46c   :  { %4207 = vperm.xlu0 %4200, %v4206_v1   ;;  %v4787_v1 = vmov 22  }
 0x46e   :  { %3844 = vmatmul.mubr.msk.bf16.gmra.mrb[36].mxu0 %vm508_vm0, %v5211_v47 }
 0x46f   :  { %3847 = vmatprep.mubr.msk.bf16.mxu0 %vm508_vm0, %v5222_v7 }
 0x470   :  { %4212 = vperm.xlu0 %4200, %v4211_v44   ;;  %v5345_v44 = vld [vmem:[#allocation7 + $0x30] sm:$0xff] }
 0x474   :  { %4226 = vperm.xlu0 %4200, %v4225_v61   ;;  %v4791_v61 = vmov 25  }
 0x476   :  { %3848 = vmatmul.mubr.msk.bf16.gmra.mrb[40].mxu0 %vm508_vm0, %v5220_v4 }
 0x477   :  { %3851 = vmatprep.mubr.msk.bf16.mxu0 %vm508_vm0, %v1295_v59 }
 0x47e   :  { %3852 = vmatmul.mubr.msk.bf16.gmra.mrb[44].mxu0 %vm508_vm0, %v1297_v56 }
 0x47f   :  { %3855 = vmatprep.mubr.msk.bf16.mxu0 %vm508_vm0, %v1299_v10 }
 0x486   :  { %3856 = vmatmul.mubr.msk.bf16.gmra.mrb[48].mxu0 %vm508_vm0, %v1301_v0  ;;  %v5335_v0 = vld [vmem:[#allocation7 + $0x18] sm:$0xff] }
 0x487   :  { %3895 = vmatprep.mubr.msk.bf16.mxu0 %vm4784_vm1, %v4778_v14 }
 0x521   :  { %v936_v57 = vpop.f32.mrb[24].mxu0 }
 0x522   :  { %v943_v47 = vpack.c.bf16 %v936_v57, %v936_v57  ;;  %v3813_v52 = vpop.f32.mrb[25].mxu0 }
 0x523   :  { %v939_v4 = vpop.f32.mrb[26].mxu0 }
 0x524   :  { %v3814_v7 = vpop.f32.mrb[27].mxu0  ;;  %3824 = vmatmul.mubr.msk.bf16.vlgmr.msra.gmra.mrb[12].mxu1 %vm508_vm0, %v943_v47  ;;  %v4185_v47 = vpop.permute.xlu0 %4184  ;;  %v4786_v4 = vmov 21  }
 0x525   :  { %4230 = vset.pattern.permute.xlu0 %v4786_v4  ;;  %v4180_v7 = vpop.permute.xlu1 %4179 }
 0x526   :  { %2071 = vperm.xlu0 %4230, %v5313_v34  }
 0x529   :  { %v4190_v37 = vpop.permute.xlu1 %4189 }
 0x52a   :  { %2075 = vperm.xlu0 %4230, %v5316_v35  }
 0x52e   :  { %2083 = vperm.xlu0 %4230, %v5335_v0  }
 0x531   :  { %v3837_v38 = vpop.f32.mrb[28].mxu0 }
 0x532   :  { %v1585_v43 = vpop.f32.mrb[29].mxu0  ;;  %v4577_v15 = vadd.low.f32.bf16 %v3837_v38, %v4165_v41 }
 0x533   :  { %v3838_v42 = vpop.f32.mrb[30].mxu0  ;;  %v4579_v58 = vadd.low.f32.bf16 %v1585_v43, %v4159_v25 }
 0x534   :  { %v4578_v55 = vadd.high.f32.bf16 %v3838_v42, %v4165_v41  ;;  %v1588_v22 = vpop.f32.mrb[31].mxu0 }
 0x535   :  { %v4580_v21 = vadd.high.f32.bf16 %v1588_v22, %v4159_v25  ;;  %v4195_v25 = vpop.permute.xlu0 %4194 }
 0x536   :  { %v1681_v29 = vpack.c.bf16 %v4578_v55, %v4577_v15 }
 0x537   :  { %v1680_v24 = vpack.c.bf16 %v4580_v21, %v4579_v58  ;;  %v5340_v21 = vld [vmem:[#allocation7 + $0x20] sm:$0xff] }
 0x538   :  { %2087 = vperm.xlu0 %4230, %v5340_v21  }
 0x539   :  { %v3841_v63 = vpop.f32.mrb[32].mxu0  ;;  %1688 = vxpose.xlu1.c.b16.start [1/4] (short) (narrow) %v1680_v24, 64  ;;  %v4789_v24 = vmov 24  }
 0x53a   :  { %v1601_v30 = vpop.f32.mrb[33].mxu0  ;;  %v4581_v27 = vadd.low.f32.bf16 %v3841_v63, %v4175_v8  ;;  %v4790_v63 = vmov 28  }
 0x53b   :  { %v3842_v39 = vpop.f32.mrb[34].mxu0  ;;  %v4583_v60 = vadd.low.f32.bf16 %v1601_v30, %v4170_v17  ;;  %v4793_v30 = vmov 26  }
 0x53c   :  { %v4582_v36 = vadd.high.f32.bf16 %v3842_v39, %v4175_v8  ;;  %v1604_v32 = vpop.f32.mrb[35].mxu0  ;;  %2095 = vperm.xlu0 %4230, %v5345_v44   ;;  %v5364_v8 = vld [vmem:[#allocation7 + $0x38] sm:$0xff]  ;;  %v2032_v39 = vpop.permute.xlu0 %2031 }
 0x53d   :  { %v4584_v16 = vadd.high.f32.bf16 %v1604_v32, %v4170_v17  ;;  %1689 = vxpose.xlu1.c.b16.cont [2/4] (short) (narrow) %v1681_v29, 64  ;;  %v5354_v29 = vld [vmem:[#allocation7 + $0x28] sm:$0xff]  ;;  %v4792_v17 = vmov 27  }
 0x53e   :  { %v1683_v33 = vpack.c.bf16 %v4582_v36, %v4581_v27 }
 0x53f   :  { %v1682_v57 = vpack.c.bf16 %v4584_v16, %v4583_v60  ;;  %v4794_v60 = vmov 29  }
 0x540   :  { %4235 = vset.pattern.permute.xlu0 %v4788_v28 }
 0x541   :  { %v3845_v52 = vpop.f32.mrb[36].mxu0  ;;  %1690 = vxpose.xlu1.c.b16.cont [3/4] (short) (narrow) %v1682_v57, 64  ;;  %2179 = vperm.xlu0 %4235, %v5335_v0  }
 0x542   :  { %v1617_v59 = vpop.f32.mrb[37].mxu0  ;;  %v4585_v62 = vadd.low.f32.bf16 %v3845_v52, %v4185_v47 }
 0x543   :  { %v3846_v56 = vpop.f32.mrb[38].mxu0  ;;  %v4587_v54 = vadd.low.f32.bf16 %v1617_v59, %v4180_v7 }
 0x544   :  { %v4586_v48 = vadd.high.f32.bf16 %v3846_v56, %v4185_v47  ;;  %v1620_v12 = vpop.f32.mrb[39].mxu0 }
 0x545   :  { %v4588_v23 = vadd.high.f32.bf16 %v1620_v12, %v4180_v7  ;;  %1691 = vxpose.xlu1.c.b16.end [4/4] (short) (narrow) %v1683_v33, 64  ;;  %2187 = vperm.xlu0 %4235, %v5354_v29   ;;  %v4525_v7 = vld [vmem:[#allocation2] sm:$0xff] }
 0x546   :  { %v1685_v10 = vpack.c.bf16 %v4586_v48, %v4585_v62  ;;  %v2062_v59 = vmul.f32 %v4525_v7, %v2032_v39  ;;  %v4526_v62 = vld [vmem:[#allocation2 + $0x40] sm:$0xff] }
 0x547   :  { %v1684_v41 = vpack.c.bf16 %v4588_v23, %v4587_v54 }
 0x549   :  { %v3849_v38 = vpop.f32.mrb[40].mxu0  ;;  %3859 = vmatprep.subr.bf16.mxu1 %v1684_v41  ;;  %4199 = vset.pattern.permute.xlu1 %v4787_v1 }
 0x54a   :  { %v1633_v6 = vpop.f32.mrb[41].mxu0  ;;  %3860 = vmatpush3.bf16.msra.mxu1 %v1684_v41  ;;  %2123 = vperm.xlu1 %4199, %v5316_v35   ;;  %v4589_v43 = vadd.low.f32.bf16 %v3849_v38, %v4195_v25 }
 0x54b   :  { %v3850_v11 = vpop.f32.mrb[42].mxu0  ;;  %3861 = vmatprep.subr.bf16.mxu1 %v1685_v10  ;;  %v4591_v55 = vadd.low.f32.bf16 %v1633_v6, %v4190_v37  ;;  %4238 = vset.pattern.permute.xlu0 %v4787_v1 }
 0x54c   :  { %v4590_v42 = vadd.high.f32.bf16 %v3850_v11, %v4195_v25  ;;  %v1636_v15 = vpop.f32.mrb[43].mxu0  ;;  %2119 = vperm.xlu0 %4238, %v5313_v34  }
 0x54d   :  { %v4592_v22 = vadd.high.f32.bf16 %v1636_v15, %v4190_v37 }
 0x54e   :  { %v1687_v13 = vpack.c.bf16 %v4590_v42, %v4589_v43  ;;  %3862 = vmatpush3.bf16.msra.mxu1 %v1685_v10  ;;  %4216 = vset.pattern.permute.xlu1 %v4785_v5 }
 0x54f   :  { %v1686_v58 = vpack.c.bf16 %v4592_v22, %v4591_v55  ;;  %2043 = vperm.xlu1 %4216, %v5335_v0   ;;  %v4527_v22 = vld [vmem:[#allocation2 + $0x10] sm:$0xff] }
 0x550   :  { %2127 = vperm.xlu0 %4238, %v5319_v51  }
 0x551   :  { %3863 = vmatprep.subr.bf16.mxu1 %v1686_v58 }
 0x552   :  { %3864 = vmatpush3.bf16.msra.mxu1 %v1686_v58 }
 0x553   :  { %3865 = vmatprep.subr.bf16.mxu1 %v1687_v13  ;;  %4217 = vset.pattern.permute.xlu1 %v4786_v4 }
 0x554   :  { %2079 = vperm.xlu1 %4217, %v5319_v51   ;;  %2147 = vperm.xlu0 %4238, %v5364_v8  }
 0x556   :  { %3866 = vmatpush3.bf16.msra.mxu1 %v1687_v13 }
 0x557   :  { %3875 = vmatprep.subr.bf16.mxu1 %v4778_v14 }
 0x558   :  { %4218 = vset.pattern.permute.xlu1 %v4788_v28  ;;  %4245 = vset.pattern.permute.xlu0 %v4790_v63 }
 0x559   :  { %2167 = vperm.xlu1 %4218, %v5313_v34   ;;  %2447 = vperm.xlu0 %4245, %v5316_v35  }
 0x55d   :  { %2171 = vperm.xlu1 %4218, %v5316_v35   ;;  %4246 = vset.pattern.permute.xlu0 %v4789_v24 }
 0x55e   :  { %2219 = vperm.xlu0 %4246, %v5316_v35  }
 0x561   :  { %4219 = vset.pattern.permute.xlu1 %v4787_v1 }
 0x562   :  { %2131 = vperm.xlu1 %4219, %v5335_v0   ;;  %2223 = vperm.xlu0 %4246, %v5319_v51  }
 0x566   :  { %4220 = vset.pattern.permute.xlu1 %v4789_v24  ;;  %2239 = vperm.xlu0 %4246, %v5345_v44  }
 0x567   :  { %2215 = vperm.xlu1 %4220, %v5313_v34  }
 0x56a   :  { %4251 = vset.pattern.permute.xlu0 %v4791_v61 }
 0x56b   :  { %4221 = vset.pattern.permute.xlu1 %v4785_v5  ;;  %2288 = vperm.xlu0 %4251, %v5340_v21  }
 0x56c   :  { %2047 = vperm.xlu1 %4221, %v5340_v21  }
 0x56f   :  { %2296 = vperm.xlu0 %4251, %v5345_v44  }
 0x570   :  { %2051 = vperm.xlu1 %4221, %v5354_v29  }
 0x573   :  { %4255 = vset.pattern.permute.xlu0 %v4792_v17 }
 0x574   :  { %4222 = vset.pattern.permute.xlu1 %v4786_v4  ;;  %2386 = vperm.xlu0 %4255, %v5313_v34  }
 0x575   :  { %2091 = vperm.xlu1 %4222, %v5354_v29  }
 0x578   :  { %2398 = vperm.xlu0 %4255, %v5335_v0  }
 0x579   :  { %4223 = vset.pattern.permute.xlu1 %v4788_v28 }
 0x57a   :  { %2175 = vperm.xlu1 %4223, %v5319_v51  }
 0x57c   :  { %2406 = vperm.xlu0 %4255, %v5354_v29  }
 0x57e   :  { %4224 = vset.pattern.permute.xlu1 %v4791_v61 }
 0x57f   :  { %2272 = vperm.xlu1 %4224, %v5313_v34  }
 0x580   :  { %4258 = vset.pattern.permute.xlu0 %v4793_v30 }
 0x581   :  { %2333 = vperm.xlu0 %4258, %v5316_v35  }
 0x583   :  { %2276 = vperm.xlu1 %4224, %v5316_v35  }
 0x585   :  { %2337 = vperm.xlu0 %4258, %v5319_v51  }
 0x587   :  { %4231 = vset.pattern.permute.xlu1 %v4787_v1 }
 0x588   :  { %2135 = vperm.xlu1 %4231, %v5340_v21  }
 0x589   :  { %2349 = vperm.xlu0 %4258, %v5354_v29  }
 0x58c   :  { %2139 = vperm.xlu1 %4231, %v5354_v29  }
 0x58d   :  { %2353 = vperm.xlu0 %4258, %v5345_v44  }
 0x590   :  { %4232 = vset.pattern.permute.xlu1 %v4789_v24 }
 0x591   :  { %2227 = vperm.xlu1 %4232, %v5335_v0   ;;  %4263 = vset.pattern.permute.xlu0 %v4794_v60 }
 0x592   :  { %2516 = vperm.xlu0 %4263, %v5340_v21  }
 0x595   :  { %4233 = vset.pattern.permute.xlu1 %v4793_v30 }
 0x596   :  { %2329 = vperm.xlu1 %4233, %v5313_v34   ;;  %4264 = vset.pattern.permute.xlu0 %v4790_v63 }
 0x597   :  { %2463 = vperm.xlu0 %4264, %v5354_v29  }
 0x59a   :  { %4234 = vset.pattern.permute.xlu1 %v4785_v5  ;;  %v5409_v5 = vpop.permute.xlu0 %2035 }
 0x59b   :  { %2055 = vperm.xlu1 %4234, %v5345_v44   ;;  %2471 = vperm.xlu0 %4264, %v5364_v8  }
 0x59e   :  { %v2040_v16 = vpop.permute.xlu0 %2039 }
 0x59f   :  { %v1696_v27 = vpop.trf.xlu1  ;;  %2059 = vperm.xlu1 %4234, %v5364_v8   ;;  %4268 = vset.pattern.permute.xlu0 %v4777_v19  ;;  %v2064_v13 = vmul.f32 %v4527_v22, %v2040_v16  ;;  %v4534_v22 = vld [vmem:[#allocation2 + $0x20] sm:$0xff] }
 0x5a0   :  { %3867 = vmatprep.mubr.msk.bf16.mxu1 %vm508_vm0, %v1696_v27 }
 0x5a2   :  { %v5423_v57 = vpop.permute.xlu0 %4202 }
 0x5a3   :  { %v1697_v36 = vpop.trf.xlu1  ;;  %4236 = vset.pattern.permute.xlu1 %v4786_v4 }
 0x5a4   :  { %3868 = vmatmul.mubr.msk.bf16.vlgmr.msra.gmra.mrb[16].mxu1 %vm508_vm0, %v1697_v36  ;;  %2099 = vperm.xlu1 %4236, %v5364_v8   ;;  %v4529_v36 = vld [vmem:[#allocation2 + $0x98] sm:$0xff] }
 0x5a6   :  { %v5427_v47 = vpop.permute.xlu0 %4207 }
 0x5a7   :  { %v1698_v32 = vpop.trf.xlu1 }
 0x5a8   :  { %3871 = vmatprep.mubr.msk.bf16.mxu1 %vm508_vm0, %v1698_v32  ;;  %4237 = vset.pattern.permute.xlu1 %v4788_v28 }
 0x5a9   :  { %2183 = vperm.xlu1 %4237, %v5340_v21  }
 0x5aa   :  { %v5432_v52 = vpop.permute.xlu0 %4212 }
 0x5ab   :  { %v1699_v33 = vpop.trf.xlu1 }
 0x5ac   :  { %3872 = vmatmul.mubr.msk.bf16.gmra.mrb[20].mxu1 %vm508_vm0, %v1699_v33  ;;  %v4530_v33 = vld [vmem:[#allocation2 + $0x80] sm:$0xff] }
 0x5ad   :  { %4239 = vset.pattern.permute.xlu1 %v4791_v61  ;;  %3883 = vmatprep.mubr.msk.bf16.mxu1 %vm4784_vm1, %v4778_v14 }
 0x5ae   :  { %2280 = vperm.xlu1 %4239, %v5319_v51   ;;  %v5436_v4 = vpop.permute.xlu0 %4226 }
 0x5b2   :  { %2284 = vperm.xlu1 %4239, %v5335_v0   ;;  %v2072_v56 = vpop.permute.xlu0 %2071 }
 0x5b3   :  { %v2102_v48 = vmul.f32 %v4526_v62, %v2072_v56 }
 0x5b5   :  { %v2110_v12 = vadd.f32 %v2102_v48, %v2062_v59 }
 0x5b6   :  { %4240 = vset.pattern.permute.xlu1 %v4792_v17  ;;  %v5441_v54 = vpop.permute.xlu0 %2075 }
 0x5b7   :  { %2390 = vperm.xlu1 %4240, %v5316_v35  }
 0x5ba   :  { %v2084_v10 = vpop.permute.xlu0 %2083 }
 0x5bb   :  { %4241 = vset.pattern.permute.xlu1 %v4787_v1  ;;  %v2105_v42 = vmul.f32 %v5240_v26, %v2084_v10 }
 0x5bc   :  { %2143 = vperm.xlu1 %4241, %v5345_v44  }
 0x5be   :  { %v2088_v41 = vpop.permute.xlu0 %2087 }
 0x5c0   :  { %4242 = vset.pattern.permute.xlu1 %v4789_v24 }
 0x5c1   :  { %2231 = vperm.xlu1 %4242, %v5340_v21  }
 0x5c2   :  { %v5450_v38 = vpop.permute.xlu0 %2095 }
 0x5c5   :  { %2235 = vperm.xlu1 %4242, %v5354_v29  }
 0x5c6   :  { %v2180_v6 = vpop.permute.xlu0 %2179 }
 0x5c7   :  { %v2201_v26 = vmul.f32 %v2180_v6, %v5257_v40  ;;  %v4533_v6 = vld [vmem:[#allocation2 + $0x60] sm:$0xff] }
 0x5c9   :  { %4243 = vset.pattern.permute.xlu1 %v4793_v30  ;;  %v5444_v23 = vpop.permute.xlu1 %2123 }
 0x5ca   :  { %2341 = vperm.xlu1 %4243, %v5335_v0   ;;  %v5459_v15 = vpop.permute.xlu0 %2187 }
 0x5ce   :  { %4244 = vset.pattern.permute.xlu1 %v4790_v63  ;;  %v2044_v25 = vpop.permute.xlu1 %2043  ;;  %v2120_v39 = vpop.permute.xlu0 %2119 }
 0x5cf   :  { %2443 = vperm.xlu1 %4244, %v5313_v34   ;;  %v2065_v11 = vmul.f32 %v5244_v31, %v2044_v25  ;;  %v4528_v31 = vld [vmem:[#allocation2 + $0xc0] sm:$0xff]  ;;  %v2150_v7 = vmul.f32 %v4530_v33, %v2120_v39  ;;  %v4531_v25 = vld [vmem:[#allocation2 + $0x90] sm:$0xff] }
 0x5d1   :  { %v2113_v58 = vadd.f32 %v2105_v42, %v2065_v11 }
 0x5d2   :  { %v2128_v62 = vpop.permute.xlu0 %2127 }
 0x5d3   :  { %4247 = vset.pattern.permute.xlu1 %v4788_v28  ;;  %v2080_v37 = vpop.permute.xlu1 %2079 }
 0x5d4   :  { %2191 = vperm.xlu1 %4247, %v5345_v44   ;;  %v2104_v55 = vmul.f32 %v5236_v3, %v2080_v37  ;;  %v2158_v3 = vadd.f32 %v2150_v7, %v2110_v12  ;;  %v2152_v37 = vmul.f32 %v4531_v25, %v2128_v62  ;;  %v4536_v7 = vld [vmem:[#allocation2 + $0x68] sm:$0xff] }
 0x5d6   :  { %v2112_v59 = vadd.f32 %v2104_v55, %v2064_v13  ;;  %v2106_v55 = vmul.f32 %v4533_v6, %v2088_v41 }
 0x5d8   :  { %2195 = vperm.xlu1 %4247, %v5364_v8   ;;  %v2168_v1 = vpop.permute.xlu1 %2167  ;;  %v5470_v42 = vadd.f32 %v2152_v37, %v2112_v59  ;;  %v4538_v37 = vld [vmem:[#allocation2 + $0x8] sm:$0xff] }
 0x5d9   :  { %v2198_v27 = vmul.f32 %v4528_v31, %v2168_v1  ;;  %v4532_v1 = vld [vmem:[#allocation2 + $0x100] sm:$0xff] }
 0x5db   :  { %v2206_v10 = vadd.f32 %v2198_v27, %v2158_v3  ;;  %v4537_v3 = vld [vmem:[#allocation2 + $0xa0] sm:$0xff] }
 0x5dc   :  { %4248 = vset.pattern.permute.xlu1 %v4791_v61  ;;  %v5456_v43 = vpop.permute.xlu1 %2171 }
 0x5dd   :  { %2292 = vperm.xlu1 %4248, %v5354_v29  }
 0x5e1   :  { %4249 = vset.pattern.permute.xlu1 %v4792_v17  ;;  %v2132_v28 = vpop.permute.xlu1 %2131 }
 0x5e2   :  { %2394 = vperm.xlu1 %4249, %v5319_v51   ;;  %v2153_v32 = vmul.f32 %v4529_v36, %v2132_v28 }
 0x5e4   :  { %v2161_v56 = vadd.f32 %v2153_v32, %v2113_v58  ;;  %v5488_v32 = vpop.permute.xlu0 %2147 }
 0x5e6   :  { %4250 = vset.pattern.permute.xlu1 %v4794_v60  ;;  %v2216_v16 = vpop.permute.xlu1 %2215  ;;  %v5467_v48 = vadd.f32 %v2201_v26, %v2161_v56  ;;  %v4535_v26 = vld [vmem:[#allocation2 + $0x28] sm:$0xff] }
 0x5e7   :  { %2500 = vperm.xlu1 %4250, %v5313_v34   ;;  %v2246_v11 = vmul.f32 %v4532_v1, %v2216_v16  ;;  %v2063_v1 = vmul.f32 %v4538_v37, %v5409_v5 }
 0x5e8   :  { %v5494_v25 = vpop.permute.xlu0 %2447 }
 0x5e9   :  { %v5472_v40 = vadd.f32 %v2246_v11, %v2206_v10  ;;  %v4539_v11 = vld [vmem:[#allocation2 + $0xa8] sm:$0xff] }
 0x5eb   :  { %2504 = vperm.xlu1 %4250, %v5316_v35   ;;  %v2048_v12 = vpop.permute.xlu1 %2047 }
 0x5ec   :  { %v2066_v13 = vmul.f32 %v4534_v22, %v2048_v12  ;;  %v2203_v22 = vmul.f32 %v5459_v15, %v5267_v45  ;;  %v2263_v45 = vld [vmem:[#allocation2 + $0x140] sm:$0xff] }
 0x5ee   :  { %v2114_v58 = vadd.f32 %v2106_v55, %v2066_v13  ;;  %v4540_v55 = vld [vmem:[#allocation2 + $0x48] sm:$0xff] }
 0x5ef   :  { %4252 = vset.pattern.permute.xlu1 %v4789_v24  ;;  %v2052_v28 = vpop.permute.xlu1 %2051  ;;  %v2103_v12 = vmul.f32 %v4540_v55, %v5441_v54 }
 0x5f0   :  { %2243 = vperm.xlu1 %4252, %v5364_v8   ;;  %v2067_v33 = vmul.f32 %v4535_v26, %v2052_v28 }
 0x5f4   :  { %4253 = vset.pattern.permute.xlu1 %v4793_v30  ;;  %v2092_v34 = vpop.permute.xlu1 %2091 }
 0x5f5   :  { %2345 = vperm.xlu1 %4253, %v5340_v21   ;;  %v2107_v59 = vmul.f32 %v4536_v7, %v2092_v34  ;;  %v4541_v34 = vld [vmem:[#allocation2 + $0x88] sm:$0xff] }
 0x5f7   :  { %v5479_v39 = vpop.f32.mrb[12].mxu1  ;;  %v2115_v16 = vadd.f32 %v2107_v59, %v2067_v33  ;;  %v2220_v33 = vpop.permute.xlu0 %2219 }
 0x5f8   :  { %v3825_v31 = vpop.f32.mrb[13].mxu1 }
 0x5f9   :  { %v1020_v41 = vpop.f32.mrb[14].mxu1  ;;  %4254 = vset.pattern.permute.xlu1 %v4790_v63  ;;  %v2176_v35 = vpop.permute.xlu1 %2175  ;;  %v2151_v31 = vmul.f32 %v4541_v34, %v5444_v23  ;;  %v4542_v23 = vld [vmem:[#allocation2 + $0xc8] sm:$0xff] }
 0x5fa   :  { %v3826_v27 = vpop.f32.mrb[15].mxu1  ;;  %2451 = vperm.xlu1 %4254, %v5319_v51  }
 0x5fb   :  { %v2111_v27 = vadd.f32 %v2103_v12, %v2063_v1  ;;  %v2224_v1 = vpop.permute.xlu0 %2223 }
 0x5fe   :  { %2455 = vperm.xlu1 %4254, %v5335_v0   ;;  %v2273_v24 = vpop.permute.xlu1 %2272 }
 0x602   :  { %4256 = vset.pattern.permute.xlu1 %v4791_v61  ;;  %v5485_v36 = vpop.permute.xlu1 %2276 }
 0x603   :  { %2300 = vperm.xlu1 %4256, %v5364_v8  }
 0x607   :  { %4257 = vset.pattern.permute.xlu1 %v4792_v17  ;;  %v2136_v56 = vpop.permute.xlu1 %2135 }
 0x608   :  { %2402 = vperm.xlu1 %4257, %v5340_v21   ;;  %v2154_v62 = vmul.f32 %v4537_v3, %v2136_v56  ;;  %v2199_v56 = vmul.f32 %v4542_v23, %v5456_v43  ;;  %v2200_v3 = vmul.f32 %v2176_v35, %v5254_v18  ;;  %v2248_v35 = vmul.f32 %v2224_v1, %v5270_v9  ;;  %v2265_v1 = vld [vmem:[#allocation2 + $0x150] sm:$0xff] }
 0x60a   :  { %v5492_v10 = vadd.f32 %v2154_v62, %v2114_v58  ;;  %v3853_v58 = vpop.f32.mrb[44].mxu0  ;;  %v2320_v62 = vld [vmem:[#allocation2 + $0x180] sm:$0xff]  ;;  %v2208_v18 = vadd.f32 %v2200_v3, %v5470_v42  ;;  %v4545_v42 = vld [vmem:[#allocation2 + $0x30] sm:$0xff] }
 0x60b   :  { %v2140_v61 = vpop.permute.xlu1 %2139  ;;  %v1649_v28 = vpop.f32.mrb[45].mxu0 }
 0x60c   :  { %4259 = vset.pattern.permute.xlu1 %v4794_v60  ;;  %v2155_v6 = vmul.f32 %v4539_v11, %v2140_v61  ;;  %v3854_v5 = vpop.f32.mrb[46].mxu0  ;;  %v2303_v61 = vmul.f32 %v2273_v24, %v2263_v45  ;;  %v4544_v24 = vld [vmem:[#allocation2 + $0x108] sm:$0xff] }
 0x60d   :  { %2508 = vperm.xlu1 %4259, %v5319_v51   ;;  %v1652_v7 = vpop.f32.mrb[47].mxu0  ;;  %v4593_v51 = vadd.low.f32.bf16 %v1649_v28, %v5423_v57  ;;  %v4596_v55 = vadd.high.f32.bf16 %v3854_v5, %v5427_v47 }
 0x60e   :  { %v2163_v13 = vadd.f32 %v2155_v6, %v2115_v16  ;;  %v4594_v15 = vadd.high.f32.bf16 %v1652_v7, %v5423_v57  ;;  %v2159_v16 = vadd.f32 %v2151_v31, %v2111_v27  ;;  %v4595_v6 = vadd.low.f32.bf16 %v3853_v58, %v5427_v47  ;;  %v3857_v27 = vpop.f32.mrb[48].mxu0 }
 0x60f   :  { %v2311_v12 = vadd.f32 %v2303_v61, %v5472_v40  ;;  %v4597_v5 = vadd.low.f32.bf16 %v3857_v27, %v5436_v4  ;;  %v2323_v27 = vld [vmem:[#allocation2 + $0x198] sm:$0xff] }
 0x610   :  { %v2228_v41 = vpop.permute.xlu1 %2227  ;;  %v5503_v26 = vadd.f32 %v2203_v22, %v2163_v13  ;;  %v2207_v43 = vadd.f32 %v2199_v56, %v2159_v16  ;;  %v2264_v22 = vld [vmem:[#allocation2 + $0x148] sm:$0xff]  ;;  %v1890_v9 = vpack.c.bf16 %v4596_v55, %v4595_v6  ;;  %v4549_v55 = vld [vmem:[#allocation2 + $0xb0] sm:$0xff] }
 0x611   :  { %2512 = vperm.xlu1 %4259, %v5335_v0   ;;  %v2249_v54 = vmul.f32 %v2228_v41, %v5263_v50  ;;  %v1889_v0 = vpack.c.bf16 %v4594_v15, %v4593_v51  ;;  %v2304_v31 = vmul.f32 %v5485_v36, %v2264_v22  ;;  %v4546_v15 = vld [vmem:[#allocation2 + $0x38] sm:$0xff] }
 0x612   :  { %v1900_v47 = vsel %vm508_vm0, %v1890_v9, 0 }
 0x613   :  { %v5510_v59 = vadd.f32 %v2249_v54, %v5467_v48  ;;  %v1897_v37 = vsel %vm508_vm0, %v1889_v0, 0  ;;  %v4543_v48 = vld [vmem:[#allocation2 + $0x70] sm:$0xff]  ;;  %v1665_v54 = vpop.f32.mrb[49].mxu0  ;;  %v4548_v0 = vld [vmem:[#allocation2 + $0xb8] sm:$0xff] }
 0x614   :  { %3888 = vmatpush3.bf16.xpose.msra.mxu0 %v1897_v37  ;;  %v2108_v11 = vmul.f32 %v4543_v48, %v5450_v38  ;;  %v2256_v38 = vadd.f32 %v2248_v35, %v2208_v18  ;;  %v2157_v61 = vmul.f32 %v4548_v0, %v5488_v32  ;;  %v2266_v18 = vld [vmem:[#allocation2 + $0x158] sm:$0xff]  ;;  %v2240_v35 = vpop.permute.xlu0 %2239  ;;  %v2322_v0 = vld [vmem:[#allocation2 + $0x190] sm:$0xff] }
 0x615   :  { %4260 = vset.pattern.permute.xlu1 %v4793_v30  ;;  %v2330_v50 = vpop.permute.xlu1 %2329  ;;  %3889 = vmatprep.subr.bf16.mxu0 %v4778_v14  ;;  %v2247_v30 = vmul.f32 %v4544_v24, %v2220_v33  ;;  %v3858_v33 = vpop.f32.mrb[50].mxu0 }
 0x616   :  { %2357 = vperm.xlu1 %4260, %v5364_v8   ;;  %v2360_v57 = vmul.f32 %v2330_v50, %v2320_v62  ;;  %v4599_v7 = vadd.high.f32.bf16 %v3858_v33, %v5436_v4  ;;  %v1668_v36 = vpop.f32.mrb[51].mxu0  ;;  %v4547_v62 = vld [vmem:[#allocation2 + $0x78] sm:$0xff] }
 0x617   :  { %v2255_v58 = vadd.f32 %v2247_v30, %v2207_v43  ;;  %v4600_v45 = vadd.high.f32.bf16 %v1668_v36, %v5432_v52  ;;  %v2269_v36 = vld [vmem:[#allocation2 + $0x170] sm:$0xff] }
 0x618   :  { %v5526_v34 = vadd.f32 %v2360_v57, %v2311_v12  ;;  %v1892_v56 = vpack.c.bf16 %v4599_v7, %v4597_v5  ;;  %v2289_v6 = vpop.permute.xlu0 %2288 }
 0x619   :  { %v5537_v51 = vadd.f32 %v2304_v31, %v2255_v58 }
 0x61a   :  { %4261 = vset.pattern.permute.xlu1 %v4790_v63  ;;  %v2056_v13 = vpop.permute.xlu1 %2055 }
 0x61b   :  { %2459 = vperm.xlu1 %4261, %v5340_v21   ;;  %v2068_v28 = vmul.f32 %v4545_v42, %v2056_v13  ;;  %v4598_v21 = vadd.low.f32.bf16 %v1665_v54, %v5432_v52 }
 0x61c   :  { %3890 = vmatpush3.bf16.xpose.msra.mxu0 %v1900_v47  ;;  %v2297_v22 = vpop.permute.xlu0 %2296 }
 0x61d   :  { %v2116_v41 = vadd.f32 %v2108_v11, %v2068_v28  ;;  %3891 = vmatprep.subr.bf16.mxu0 %v4778_v14  ;;  %v1906_v11 = vsel %vm508_vm0, %v1892_v56, 0 }
 0x61e   :  { %v2060_v40 = vpop.permute.xlu1 %2059 }
 0x61f   :  { %4262 = vset.pattern.permute.xlu1 %v4792_v17  ;;  %v2069_v23 = vmul.f32 %v4546_v15, %v2060_v40  ;;  %v1891_v17 = vpack.c.bf16 %v4600_v45, %v4598_v21 }
 0x620   :  { %2410 = vperm.xlu1 %4262, %v5345_v44   ;;  %v2387_v9 = vpop.permute.xlu0 %2386 }
 0x621   :  { %v1903_v4 = vsel %vm508_vm0, %v1891_v17, 0 }
 0x623   :  { %v2100_v3 = vpop.permute.xlu1 %2099 }
 0x624   :  { %2414 = vperm.xlu1 %4262, %v5364_v8   ;;  %v2109_v16 = vmul.f32 %v4547_v62, %v2100_v3  ;;  %3892 = vmatpush3.bf16.xpose.msra.mxu0 %v1903_v4  ;;  %v2399_v47 = vpop.permute.xlu0 %2398  ;;  %v4550_v3 = vld [vmem:[#allocation2 + $0xf8] sm:$0xff]  ;;  %v2268_v4 = vld [vmem:[#allocation2 + $0x168] sm:$0xff] }
 0x625   :  { %3893 = vmatprep.subr.bf16.mxu0 %v4778_v14 }
 0x626   :  { %v2117_v50 = vadd.f32 %v2109_v16, %v2069_v23 }
 0x628   :  { %4265 = vset.pattern.permute.xlu1 %v4794_v60  ;;  %v2184_v52 = vpop.permute.xlu1 %2183  ;;  %v2165_v37 = vadd.f32 %v2157_v61, %v2117_v50 }
 0x629   :  { %2520 = vperm.xlu1 %4265, %v5354_v29   ;;  %v2202_v57 = vmul.f32 %v2184_v52, %v5273_v49  ;;  %v2321_v52 = vld [vmem:[#allocation2 + $0x188] sm:$0xff] }
 0x62b   :  { %v2210_v48 = vadd.f32 %v2202_v57, %v5492_v10  ;;  %v2325_v57 = vld [vmem:[#allocation2 + $0x1a8] sm:$0xff] }
 0x62c   :  { %3894 = vmatpush3.bf16.xpose.msra.mxu0 %v1906_v11 }
 0x62d   :  { %v2281_v32 = vpop.permute.xlu1 %2280  ;;  %4266 = vset.pattern.permute.xlu1 %v4790_v63 }
 0x62e   :  { %v2305_v43 = vmul.f32 %v2281_v32, %v2265_v1  ;;  %2467 = vperm.xlu1 %4266, %v5345_v44  }
 0x630   :  { %v5550_v24 = vadd.f32 %v2305_v43, %v2256_v38  ;;  %v2267_v38 = vld [vmem:[#allocation2 + $0x160] sm:$0xff] }
 0x631   :  { %v2285_v30 = vpop.permute.xlu1 %2284 }
 0x632   :  { %v2306_v29 = vmul.f32 %v2285_v30, %v2266_v18  ;;  %4267 = vset.pattern.permute.xlu1 %v4794_v60  ;;  %v2307_v60 = vmul.f32 %v2289_v6, %v2267_v38  ;;  %v2435_v38 = vld [vmem:[#allocation2 + $0x208] sm:$0xff] }
 0x633   :  { %2524 = vperm.xlu1 %4267, %v5345_v44  }
 0x634   :  { %v2314_v49 = vadd.f32 %v2306_v29, %v5510_v59  ;;  %v2379_v29 = vld [vmem:[#allocation2 + $0x1d0] sm:$0xff] }
 0x636   :  { %v2391_v10 = vpop.permute.xlu1 %2390 }
 0x637   :  { %2528 = vperm.xlu1 %4267, %v5364_v8  }
 0x63b   :  { %v2144_v63 = vpop.permute.xlu1 %2143  ;;  %4274 = vset.pattern.permute.xlu1 %v4777_v19  ;;  %v2380_v19 = vld [vmem:[#allocation2 + $0x1d8] sm:$0xff] }
 0x63c   :  { %v2156_v12 = vmul.f32 %v4549_v55, %v2144_v63 }
 0x63e   :  { %v2164_v13 = vadd.f32 %v2156_v12, %v2116_v41  ;;  %v2420_v41 = vmul.f32 %v2399_v47, %v2380_v19  ;;  %v2492_v19 = vld [vmem:[#allocation2 + $0x248] sm:$0xff] }
 0x640   :  { %v2232_v42 = vpop.permute.xlu1 %2231 }
 0x641   :  { %v2250_v28 = vmul.f32 %v2232_v42, %v5279_v53  ;;  %v2407_v53 = vpop.permute.xlu0 %2406 }
 0x643   :  { %v2258_v44 = vadd.f32 %v2250_v28, %v2210_v48  ;;  %v2382_v48 = vld [vmem:[#allocation2 + $0x1e8] sm:$0xff] }
 0x644   :  { %v2236_v31 = vpop.permute.xlu1 %2235  ;;  %v2422_v6 = vmul.f32 %v2407_v53, %v2382_v48 }
 0x645   :  { %v2251_v59 = vmul.f32 %v2236_v31, %v5283_v46  ;;  %v5559_v58 = vadd.f32 %v2307_v60, %v2258_v44  ;;  %v2252_v46 = vmul.f32 %v2240_v35, %v5290_v2  ;;  %v2334_v15 = vpop.permute.xlu0 %2333  ;;  %v2378_v35 = vld [vmem:[#allocation2 + $0x1c8] sm:$0xff]  ;;  %v2491_v31 = vld [vmem:[#allocation2 + $0x240] sm:$0xff] }
 0x646   :  { %v2361_v43 = vmul.f32 %v2334_v15, %v2321_v52  ;;  %v2418_v55 = vmul.f32 %v2391_v10, %v2378_v35 }
 0x647   :  { %v2259_v8 = vadd.f32 %v2251_v59, %v5503_v26  ;;  %v2309_v26 = vmul.f32 %v2297_v22, %v2269_v36 }
 0x648   :  { %v2369_v22 = vadd.f32 %v2361_v43, %v5537_v51 }
 0x649   :  { %v2342_v40 = vpop.permute.xlu1 %2341  ;;  %v2338_v16 = vpop.permute.xlu0 %2337 }
 0x64a   :  { %v2363_v5 = vmul.f32 %v2342_v40, %v2323_v27  ;;  %v2362_v2 = vmul.f32 %v2338_v16, %v2322_v0 }
 0x64c   :  { %v2371_v54 = vadd.f32 %v2363_v5, %v2314_v49  ;;  %v2370_v63 = vadd.f32 %v2362_v2, %v5550_v24 }
 0x64d   :  { %v2350_v11 = vpop.permute.xlu0 %2349 }
 0x64e   :  { %v2444_v21 = vpop.permute.xlu1 %2443  ;;  %v5562_v33 = vadd.f32 %v2420_v41, %v2371_v54  ;;  %v2365_v18 = vmul.f32 %v2350_v11, %v2325_v57 }
 0x653   :  { %v2192_v7 = vpop.permute.xlu1 %2191 }
 0x654   :  { %v2204_v45 = vmul.f32 %v2192_v7, %v5285_v20  ;;  %v2377_v20 = vld [vmem:[#allocation2 + $0x1c0] sm:$0xff] }
 0x655   :  { %v2417_v49 = vmul.f32 %v2387_v9, %v2377_v20  ;;  %v2475_v9 = vmul.f32 %v5494_v25, %v2435_v38 }
 0x656   :  { %v2212_v23 = vadd.f32 %v2204_v45, %v2164_v13 }
 0x657   :  { %v2196_v56 = vpop.permute.xlu1 %2195  ;;  %v2425_v60 = vadd.f32 %v2417_v49, %v5526_v34 }
 0x658   :  { %v2205_v17 = vmul.f32 %v4550_v3, %v2196_v56  ;;  %v2260_v62 = vadd.f32 %v2252_v46, %v2212_v23 }
 0x65a   :  { %v5566_v61 = vadd.f32 %v2205_v17, %v2165_v37  ;;  %v5568_v50 = vadd.f32 %v2309_v26, %v2260_v62  ;;  %v2434_v37 = vld [vmem:[#allocation2 + $0x200] sm:$0xff] }
 0x65b   :  { %v2474_v28 = vmul.f32 %v2444_v21, %v2434_v37 }
 0x65c   :  { %v2293_v1 = vpop.permute.xlu1 %2292 }
 0x65d   :  { %v2308_v32 = vmul.f32 %v2293_v1, %v2268_v4  ;;  %v2482_v10 = vadd.f32 %v2474_v28, %v2425_v60  ;;  %v2436_v28 = vld [vmem:[#allocation2 + $0x210] sm:$0xff] }
 0x65f   :  { %v2316_v30 = vadd.f32 %v2308_v32, %v2259_v8  ;;  %v2426_v8 = vadd.f32 %v2418_v55, %v2369_v22 }
 0x661   :  { %v2395_v12 = vpop.permute.xlu1 %2394  ;;  %v2373_v13 = vadd.f32 %v2365_v18, %v2316_v30  ;;  %v2483_v47 = vadd.f32 %v2475_v9, %v2426_v8 }
 0x662   :  { %v2419_v42 = vmul.f32 %v2395_v12, %v2379_v29 }
 0x663   :  { %v5573_v44 = vadd.f32 %v2422_v6, %v2373_v13 }
 0x664   :  { %v5575_v59 = vadd.f32 %v2419_v42, %v2370_v63 }
 0x666   :  { %v2501_v27 = vpop.permute.xlu1 %2500 }
 0x667   :  { %v2531_v24 = vmul.f32 %v2501_v27, %v2491_v31  ;;  %v2437_v27 = vld [vmem:[#allocation2 + $0x218] sm:$0xff] }
 0x669   :  { %v2539_v5 = vadd.f32 %v2531_v24, %v2482_v10 }
 0x66a   :  { %v2505_v51 = vpop.permute.xlu1 %2504 }
 0x66b   :  { %v2532_v40 = vmul.f32 %v2505_v51, %v2492_v19 }
 0x66d   :  { %v2540_v41 = vadd.f32 %v2532_v40, %v2483_v47  ;;  %v2493_v47 = vld [vmem:[#allocation2 + $0x250] sm:$0xff] }
 0x66f   :  { %v5578_v54 = vpop.permute.xlu1 %2243  ;;  %v5580_v34 = vpack.c.bf16 %v2540_v41, %v2539_v5 }
 0x671   :  { %3911 = vmatprep.subr.bf16.mxu0 %v5580_v34 }
 0x674   :  { %v5583_v21 = vpop.permute.xlu1 %2345 }
 0x677   :  { %v3869_v53 = vpop.f32.mrb[16].mxu1 }
 0x678   :  { %v1783_v25 = vmul.f32 0.125, %v3869_v53  ;;  %v1750_v7 = vpop.f32.mrb[17].mxu1 }
 0x679   :  { %v1781_v36 = vmul.f32 0.125, %v1750_v7  ;;  %v3870_v45 = vpop.f32.mrb[18].mxu1  ;;  %v2452_v46 = vpop.permute.xlu1 %2451 }
 0x67a   :  { %v1791_v15 = vsub.f32 0.0, %v1783_v25  ;;  %v1784_v23 = vmul.f32 0.125, %v3870_v45  ;;  %v1753_v26 = vpop.f32.mrb[19].mxu1  ;;  %v2476_v10 = vmul.f32 %v2452_v46, %v2436_v28 }
 0x67b   :  { %v1789_v56 = vsub.f32 0.0, %v1781_v36  ;;  %v1782_v3 = vmul.f32 0.125, %v1753_v26  ;;  %v2494_v26 = vld [vmem:[#allocation2 + $0x258] sm:$0xff] }
 0x67c   :  { %v1799_v17 = vmin.f32 %v1791_v15, 60.0  ;;  %v1792_v62 = vsub.f32 0.0, %v1784_v23  ;;  %v2484_v45 = vadd.f32 %v2476_v10, %v5575_v59 }
 0x67d   :  { %v1797_v16 = vmin.f32 %v1789_v56, 60.0  ;;  %v1790_v0 = vsub.f32 0.0, %v1782_v3  ;;  %v2456_v4 = vpop.permute.xlu1 %2455 }
 0x67e   :  { %v1809_v52 = vmul.f32 1.442695, %v1799_v17  ;;  %v1800_v57 = vmin.f32 %v1792_v62, 60.0  ;;  %v2477_v5 = vmul.f32 %v2456_v4, %v2437_v27 }
 0x67f   :  { %v1805_v1 = vmul.f32 1.442695, %v1797_v16  ;;  %v1798_v20 = vmin.f32 %v1790_v0, 60.0  ;;  %v3873_v48 = vpop.f32.mrb[20].mxu1 }
 0x680   :  { %4446 = vpow2.f32 %v1809_v52  ;;  %v1811_v2 = vmul.f32 1.442695, %v1800_v57  ;;  %v1787_v11 = vmul.f32 0.125, %v3873_v48  ;;  %v1766_v32 = vpop.f32.mrb[21].mxu1  ;;  %v2485_v46 = vadd.f32 %v2477_v5, %v5562_v33  ;;  %v2324_v33 = vld [vmem:[#allocation2 + $0x1a0] sm:$0xff] }
 0x681   :  { %4448 = vpow2.f32 %v1805_v1  ;;  %v1807_v43 = vmul.f32 1.442695, %v1798_v20  ;;  %v1785_v18 = vmul.f32 0.125, %v1766_v32  ;;  %v3874_v35 = vpop.f32.mrb[22].mxu1  ;;  %v2354_v1 = vpop.permute.xlu0 %2353 }
 0x682   :  { %4450 = vpow2.f32 %v1811_v2  ;;  %v1795_v30 = vsub.f32 0.0, %v1787_v11  ;;  %v1788_v29 = vmul.f32 0.125, %v3874_v35  ;;  %v1769_v49 = vpop.f32.mrb[23].mxu1  ;;  %v5585_v6 = vpop.permute.xlu1 %2300  ;;  %v2364_v35 = vmul.f32 %v5583_v21, %v2324_v33  ;;  %v4551_v21 = vld [vmem:[#allocation2 + $0x138] sm:$0xff] }
 0x683   :  { %4452 = vpow2.f32 %v1807_v43  ;;  %v1793_v37 = vsub.f32 0.0, %v1785_v18  ;;  %v1786_v63 = vmul.f32 0.125, %v1769_v49  ;;  %v2381_v49 = vld [vmem:[#allocation2 + $0x1e0] sm:$0xff]  ;;  %v2253_v27 = vmul.f32 %v4551_v21, %v5578_v54  ;;  %v5617_v21 = vld [vmem:[#allocation8 + $0x128] sm:$0xff]  }
 0x684   :  { %v1803_v55 = vmin.f32 %v1795_v30, 60.0  ;;  %v1796_v12 = vsub.f32 0.0, %v1788_v29 }
 0x685   :  { %v1801_v22 = vmin.f32 %v1793_v37, 60.0  ;;  %v1794_v13 = vsub.f32 0.0, %v1786_v63  ;;  %v2517_v63 = vpop.permute.xlu0 %2516 }
 0x686   :  { %v1817_v38 = vmul.f32 1.442695, %v1803_v55  ;;  %v1804_v42 = vmin.f32 %v1796_v12, 60.0  ;;  %v2372_v12 = vadd.f32 %v2364_v35, %v5559_v58  ;;  %v2270_v58 = vld [vmem:[#allocation2 + $0x178] sm:$0xff] }
 0x687   :  { %v1813_v60 = vmul.f32 1.442695, %v1801_v22  ;;  %v1802_v31 = vmin.f32 %v1794_v13, 60.0  ;;  %v2403_v9 = vpop.permute.xlu1 %2402  ;;  %v2438_v13 = vld [vmem:[#allocation2 + $0x220] sm:$0xff] }
 0x688   :  { %4454 = vpow2.f32 %v1817_v38  ;;  %v1819_v8 = vmul.f32 1.442695, %v1804_v42  ;;  %v2421_v22 = vmul.f32 %v2403_v9, %v2381_v49  ;;  %v2498_v49 = vld [vmem:[#allocation2 + $0x278] sm:$0xff] }
 0x689   :  { %4456 = vpow2.f32 %v1813_v60  ;;  %v1815_v24 = vmul.f32 1.442695, %v1802_v31  ;;  %v2439_v60 = vld [vmem:[#allocation2 + $0x228] sm:$0xff]  ;;  %v2464_v31 = vpop.permute.xlu0 %2463 }
 0x68a   :  { %v4447_v19 = vpop.eup %4446  ;;  %4458 = vpow2.f32 %v1819_v8  ;;  %v2479_v5 = vmul.f32 %v2464_v31, %v2439_v60 }
 0x68b   :  { %v4449_v51 = vpop.eup %4448  ;;  %v1823_v40 = vadd.f32 1.0, %v4447_v19  ;;  %4460 = vpow2.f32 %v1815_v24  ;;  %v2429_v24 = vadd.f32 %v2421_v22, %v2372_v12 }
 0x68c   :  { %v4451_v41 = vpop.eup %4450  ;;  %v1821_v53 = vadd.f32 1.0, %v4449_v51  ;;  %v2509_v25 = vpop.permute.xlu1 %2508 }
 0x68d   :  { %v4453_v7 = vpop.eup %4452  ;;  %4462 = vrcp.f32 %v1823_v40  ;;  %v1824_v36 = vadd.f32 1.0, %v4451_v41  ;;  %v2533_v15 = vmul.f32 %v2509_v25, %v2493_v47  ;;  %v2495_v47 = vld [vmem:[#allocation2 + $0x260] sm:$0xff]  ;;  %v2326_v41 = vld [vmem:[#allocation2 + $0x1b0] sm:$0xff]  ;;  %v2310_v25 = vmul.f32 %v5585_v6, %v2270_v58  ;;  %v2384_v6 = vld [vmem:[#allocation2 + $0x1f8] sm:$0xff] }
 0x68e   :  { %4464 = vrcp.f32 %v1821_v53  ;;  %v1822_v23 = vadd.f32 1.0, %v4453_v7  ;;  %v2261_v53 = vadd.f32 %v2253_v27, %v5566_v61  ;;  %v1837_v7 = vld [vmem:[#allocation10 + $0x60] sm:$0x3]  ;;  %v5623_v58 = vld [vmem:[#allocation8 + $0x110] sm:$0xff]  }
 0x68f   :  { %4466 = vrcp.f32 %v1824_v36  ;;  %v2541_v3 = vadd.f32 %v2533_v15, %v2484_v45  ;;  %v2535_v36 = vmul.f32 %v2517_v63, %v2495_v47  ;;  %v2327_v45 = vld [vmem:[#allocation2 + $0x1b8] sm:$0xff]  ;;  %v2496_v15 = vld [vmem:[#allocation2 + $0x268] sm:$0xff] }
 0x690   :  { %4468 = vrcp.f32 %v1822_v23  ;;  %v2513_v56 = vpop.permute.xlu1 %2512  ;;  %v2366_v23 = vmul.f32 %v2354_v1, %v2326_v41  ;;  %v2589_v41 = vunpack.c.h.bf16 %v5623_v58 }
 0x691   :  { %v2534_v17 = vmul.f32 %v2513_v56, %v2494_v26  ;;  %v2487_v26 = vadd.f32 %v2479_v5, %v5573_v44  ;;  %v2383_v56 = vld [vmem:[#allocation2 + $0x1f0] sm:$0xff]  ;;  %v2588_v5 = vunpack.c.l.bf16 %v5623_v58 }
 0x692   :  { %v4455_v62 = vpop.eup %4454 }
 0x693   :  { %v4457_v16 = vpop.eup %4456  ;;  %v1827_v0 = vadd.f32 1.0, %v4455_v62  ;;  %v2542_v4 = vadd.f32 %v2534_v17, %v2485_v46  ;;  %v1839_v46 = vpack.c.bf16 %v1837_v7, %v1837_v7  ;;  %v2318_v17 = vadd.f32 %v2310_v25, %v2261_v53  ;;  %v5629_v53 = vld [vmem:[#allocation8 + $0x138] sm:$0xff]   ;;  %v5631_v7 = vld [vmem:[#allocation8 + $0x120] sm:$0xff]  }
 0x694   :  { %v4459_v52 = vpop.eup %4458  ;;  %v1825_v57 = vadd.f32 1.0, %v4457_v16 }
 0x695   :  { %v4461_v20 = vpop.eup %4460  ;;  %4470 = vrcp.f32 %v1827_v0  ;;  %v1828_v59 = vadd.f32 1.0, %v4459_v52  ;;  %v2358_v48 = vpop.permute.xlu1 %2357  ;;  %v5589_v2 = vpack.c.bf16 %v2542_v4, %v2541_v3  ;;  %v2374_v0 = vadd.f32 %v2366_v23, %v5568_v50 }
 0x696   :  { %4472 = vrcp.f32 %v1825_v57  ;;  %v1826_v11 = vadd.f32 1.0, %v4461_v20  ;;  %v2367_v62 = vmul.f32 %v2358_v48, %v2327_v45  ;;  %v2440_v57 = vld [vmem:[#allocation2 + $0x230] sm:$0xff]  ;;  %v2441_v48 = vld [vmem:[#allocation2 + $0x238] sm:$0xff]  ;;  %v2599_v45 = vunpack.c.h.bf16 %v5629_v53 }
 0x697   :  { %v4463_v32 = vpop.eup %4462  ;;  %4474 = vrcp.f32 %v1828_v59  ;;  %v2592_v23 = vunpack.c.l.bf16 %v5631_v7 }
 0x698   :  { %v4465_v43 = vpop.eup %4464  ;;  %4476 = vrcp.f32 %v1826_v11  ;;  %v2375_v1 = vadd.f32 %v2367_v62, %v2318_v17  ;;  %v2472_v11 = vpop.permute.xlu0 %2471  ;;  %v2564_v17 = vld [vmem:[#allocation8 + $0x130] sm:$0xff]  }
 0x699   :  { %v4467_v18 = vpop.eup %4466  ;;  %v2481_v50 = vmul.f32 %v2472_v11, %v2441_v48  ;;  %v4372_v11 = vld [vmem:[#allocation8 + $0xf0] sm:$0xff]  }
 0x69a   :  { %v4469_v30 = vpop.eup %4468  ;;  %v1841_v29 = vpack.c.bf16 %v4467_v18, %v4463_v32  ;;  %v2460_v37 = vpop.permute.xlu1 %2459 }
 0x69b   :  { %v1840_v55 = vpack.c.bf16 %v4469_v30, %v4465_v43  ;;  %v2478_v10 = vmul.f32 %v2460_v37, %v2438_v13  ;;  %v2497_v43 = vld [vmem:[#allocation2 + $0x270] sm:$0xff] }
 0x69d   :  { %3876 = vmatpush3.bf16.msra.mxu1 %v1840_v55  ;;  %v2486_v54 = vadd.f32 %v2478_v10, %v2429_v24  ;;  %v5619_v24 = vld [vmem:[#allocation8 + $0x108] sm:$0xff]   ;;  %v2594_v10 = vunpack.c.l.bf16 %v5617_v21 }
 0x69e   :  { %3877 = vmatprep.subr.bf16.mxu1 %v4778_v14  ;;  %v2586_v47 = vunpack.c.l.bf16 %v5619_v24 }
 0x69f   :  { %v4471_v38 = vpop.eup %4470  ;;  %v2411_v42 = vpop.permute.xlu1 %2410  ;;  %v2543_v61 = vadd.f32 %v2535_v36, %v2486_v54  ;;  %v2598_v36 = vunpack.c.l.bf16 %v5629_v53 }
 0x6a0   :  { %v4473_v28 = vpop.eup %4472  ;;  %v2423_v4 = vmul.f32 %v2411_v42, %v2383_v56  ;;  %v5611_v42 = vld [vmem:[#allocation8 + $0x118] sm:$0xff]   ;;  %v5638_v56 = vld [vmem:[#allocation8 + $0x140] sm:$0xff]  }
 0x6a1   :  { %v4475_v8 = vpop.eup %4474  ;;  %3878 = vmatpush3.bf16.msra.mxu1 %v1841_v29  ;;  %v2590_v31 = vunpack.c.l.bf16 %v5611_v42  ;;  %v2600_v62 = vunpack.c.l.bf16 %v5638_v56 }
 0x6a2   :  { %v4477_v19 = vpop.eup %4476  ;;  %3879 = vmatprep.subr.bf16.mxu1 %v4778_v14  ;;  %v1843_v9 = vpack.c.bf16 %v4475_v8, %v4471_v38  ;;  %v2431_v33 = vadd.f32 %v2423_v4, %v2374_v0  ;;  %v5609_v38 = vld [vmem:[#allocation8 + $0x100] sm:$0xff]   ;;  %v2591_v8 = vunpack.c.h.bf16 %v5611_v42  ;;  %v2596_v0 = vunpack.c.l.bf16 %v2564_v17 }
 0x6a3   :  { %v1842_v51 = vpack.c.bf16 %v4477_v19, %v4473_v28  ;;  %v2415_v40 = vpop.permute.xlu1 %2414  ;;  %v2584_v28 = vunpack.c.l.bf16 %v5609_v38  ;;  %v2585_v60 = vunpack.c.h.bf16 %v5609_v38  ;;  %v2595_v19 = vunpack.c.h.bf16 %v5617_v21 }
 0x6a4   :  { %v2424_v44 = vmul.f32 %v2415_v40, %v2384_v6  ;;  %v4370_v40 = vld [vmem:[#allocation8 + $0xe0] sm:$0xff]   ;;  %v2597_v4 = vunpack.c.h.bf16 %v2564_v17 }
 0x6a5   :  { %3880 = vmatpush3.bf16.msra.mxu1 %v1842_v51  ;;  %v4269_v27 = vpack.i.bf16 %v2585_v60, %v2584_v28  ;;  %v2587_v51 = vunpack.c.h.bf16 %v5619_v24  ;;  %v4295_v54 = vpack.i.bf16 %v2595_v19, %v2594_v10 }
 0x6a6   :  { %3881 = vmatprep.subr.bf16.mxu1 %v4778_v14  ;;  %v2432_v18 = vadd.f32 %v2424_v44, %v2375_v1  ;;  %v4300_v48 = vpack.i.bf16 %v2597_v4, %v2596_v0 }
 0x6a7   :  { %4270 = vperm.xlu0 %4268, %v4269_v27   ;;  %v4275_v25 = vpack.i.bf16 %v2587_v51, %v2586_v47 }
 0x6a8   :  { %v2521_v3 = vpop.permute.xlu1 %2520  ;;  %v2489_v37 = vadd.f32 %v2481_v50, %v2432_v18  ;;  %v1984_v50 = vsel %vm508_vm0, %v4372_v11, 0 }
 0x6a9   :  { %3882 = vmatpush3.bf16.msra.mxu1 %v1843_v9  ;;  %v2536_v16 = vmul.f32 %v2521_v3, %v2496_v15  ;;  %v4285_v9 = vpack.i.bf16 %v2591_v8, %v2590_v31  ;;  %4276 = vperm.xlu1 %4274, %v4275_v25   ;;  %v4280_v15 = vpack.i.bf16 %v2589_v41, %v2588_v5  ;;  %v4371_v3 = vld [vmem:[#allocation8 + $0xe8] sm:$0xff]  }
 0x6aa   :  { %3899 = vmatprep.subr.bf16.mxu1 %v4778_v14 }
 0x6ab   :  { %v2544_v52 = vadd.f32 %v2536_v16, %v2487_v26  ;;  %4286 = vperm.xlu0 %4268, %v4285_v9   ;;  %v2593_v26 = vunpack.c.h.bf16 %v5631_v7  ;;  %v4305_v16 = vpack.i.bf16 %v2599_v45, %v2598_v36 }
 0x6ac   :  { %3884 = vmatmul.mubr.msk.bf16.vlgmr.msra.gmra.mrb[24].mxu1 %vm508_vm0, %v1839_v46  ;;  %v1978_v46 = vsel %vm508_vm0, %v4370_v40, 0 }
 0x6ad   :  { %v2468_v20 = vpop.permute.xlu1 %2467  ;;  %v5603_v59 = vpack.c.bf16 %v2544_v52, %v2543_v61  ;;  %3907 = vmatprep.mubr.msk.bf16.mxu1 %vm4784_vm1, %v4778_v14  ;;  %v2601_v61 = vunpack.c.h.bf16 %v5638_v56  ;;  %4281 = vperm.xlu1 %4274, %v4280_v15   ;;  %v4290_v6 = vpack.i.bf16 %v2593_v26, %v2592_v23  ;;  %v1981_v52 = vsel %vm508_vm0, %v4371_v3, 0 }
 0x6ae   :  { %v2480_v32 = vmul.f32 %v2468_v20, %v2440_v57  ;;  %v2570_v57 = vld [vmem:[#allocation8 + $0x148] sm:$0xff]  }
 0x6af   :  { %4296 = vperm.xlu0 %4268, %v4295_v54   ;;  %v4310_v1 = vpack.i.bf16 %v2601_v61, %v2600_v62  ;;  %v2602_v44 = vunpack.c.l.bf16 %v2570_v57  ;;  %v2603_v20 = vunpack.c.h.bf16 %v2570_v57 }
 0x6b0   :  { %v2488_v30 = vadd.f32 %v2480_v32, %v2431_v33  ;;  %v2572_v33 = vld [vmem:[#allocation8 + $0x150] sm:$0xff]  }
 0x6b1   :  { %4291 = vperm.xlu1 %4274, %v4290_v6   ;;  %v4315_v32 = vpack.i.bf16 %v2603_v20, %v2602_v44  ;;  %v2605_v18 = vunpack.c.h.bf16 %v2572_v33 }
 0x6b2   :  { %v2525_v35 = vpop.permute.xlu1 %2524  ;;  %3900 = vmatpush3.bf16.xpose.msra.mxu1 %v1978_v46 }
 0x6b3   :  { %v2537_v29 = vmul.f32 %v2525_v35, %v2497_v43  ;;  %3901 = vmatprep.subr.bf16.mxu1 %v4778_v14  ;;  %4306 = vperm.xlu0 %4268, %v4305_v16   ;;  %v2604_v43 = vunpack.c.l.bf16 %v2572_v33  ;;  %v2574_v35 = vld [vmem:[#allocation8 + $0x158] sm:$0xff]  }
 0x6b5   :  { %v2545_v55 = vadd.f32 %v2537_v29, %v2488_v30  ;;  %4301 = vperm.xlu1 %4274, %v4300_v48   ;;  %v4320_v30 = vpack.i.bf16 %v2605_v18, %v2604_v43  ;;  %v2606_v29 = vunpack.c.l.bf16 %v2574_v35 }
 0x6b6   :  { %v2529_v63 = vpop.permute.xlu1 %2528 }
 0x6b7   :  { %v2538_v12 = vmul.f32 %v2529_v63, %v2498_v49  ;;  %4311 = vperm.xlu0 %4268, %v4310_v1   ;;  %v2607_v49 = vunpack.c.h.bf16 %v2574_v35 }
 0x6b9   :  { %v2546_v22 = vadd.f32 %v2538_v12, %v2489_v37  ;;  %v4373_v37 = vld [vmem:[#allocation8 + $0xf8] sm:$0xff]   ;;  %v4325_v63 = vpack.i.bf16 %v2607_v49, %v2606_v29  ;;  %v1838_v12 = vld [vmem:[#allocation10 + $0x62] sm:$0x3] }
 0x6ba   :  { %3902 = vmatpush3.bf16.xpose.msra.mxu1 %v1981_v52 }
 0x6bb   :  { %v5607_v13 = vpack.c.bf16 %v2546_v22, %v2545_v55  ;;  %3903 = vmatprep.subr.bf16.mxu1 %v4778_v14  ;;  %4316 = vperm.xlu0 %4268, %v4315_v32   ;;  %v1987_v55 = vsel %vm508_vm0, %v4373_v37, 0 }
 0x6bf   :  { %4321 = vperm.xlu0 %4268, %v4320_v30  }
 0x6c2   :  { %3904 = vmatpush3.bf16.xpose.msra.mxu1 %v1984_v50 }
 0x6c3   :  { %3905 = vmatprep.subr.bf16.mxu1 %v4778_v14  ;;  %4326 = vperm.xlu0 %4268, %v4325_v63  }
 0x6ca   :  { %3906 = vmatpush3.bf16.xpose.msra.mxu1 %v1987_v55 }
 0x77f   :  { %v1881_v22 = vpop.f32.mrb[24].mxu1 }
 0x780   :  { %v1887_v28 = vmul.f32 %v1881_v22, %v1838_v12  ;;  %v3885_v60 = vpop.f32.mrb[25].mxu1 }
 0x781   :  { %v1884_v31 = vpop.f32.mrb[26].mxu1 }
 0x782   :  { %v1888_v8 = vpack.c.bf16 %v1887_v28, %v1887_v28  ;;  %v3886_v27 = vpop.f32.mrb[27].mxu1 }
 0x784   :  { %3896 = vmatmul.mubr.msk.bf16.vlgmr.msra.gmra.mrb[52].mxu0 %vm508_vm0, %v1888_v8 }
 0x785   :  { %3912 = vmatpush3.bf16.msra.mxu0 %v5580_v34  ;;  %3919 = vmatprep.mubr.msk.bf16.mxu0 %vm508_vm0, %v5609_v38  ;;  %v5679_v34 = vld [vmem:[#allocation10 + $0x52] sm:$0x1] }
 0x786   :  { %3913 = vmatprep.subr.bf16.mxu0 %v5589_v2  ;;  %3309 = vrot.lane.b32.xlu0 %v5679_v34, %s4795_s4 }
 0x789   :  { %3914 = vmatpush3.bf16.msra.mxu0 %v5589_v2  ;;  %v4271_v2 = vpop.permute.xlu0 %4270 }
 0x78a   :  { %3915 = vmatprep.subr.bf16.mxu0 %v5603_v59  ;;  %3316 = vrot.lane.b32.xlu0 %v5679_v34, %s4796_s21 }
 0x78d   :  { %3916 = vmatpush3.bf16.msra.mxu0 %v5603_v59  ;;  %v4287_v59 = vpop.permute.xlu0 %4286 }
 0x78e   :  { %3917 = vmatprep.subr.bf16.mxu0 %v5607_v13  ;;  %3323 = vrot.lane.b32.xlu0 %v5679_v34, %s4797_s9  ;;  %v3331_v34 = vld [vmem:[#allocation10 + $0x10] sm:$0xff] }
 0x791   :  { %3918 = vmatpush3.bf16.msra.mxu0 %v5607_v13  ;;  %v4297_v10 = vpop.permute.xlu0 %4296 }
 0x792   :  { %3971 = vmatprep.subr.bf16.mxu0 %v4778_v14 }
 0x794   :  { %3920 = vmatmul.mubr.msk.bf16.vlgmr.msra.gmra.mrb[56].mxu0 %vm508_vm0, %v5619_v24 }
 0x795   :  { %3923 = vmatprep.mubr.msk.bf16.mxu0 %vm508_vm0, %v5623_v58  ;;  %v4307_v19 = vpop.permute.xlu0 %4306  ;;  %v4277_v58 = vpop.permute.xlu1 %4276 }
 0x799   :  { %v5683_v51 = vpop.permute.xlu0 %4311  ;;  %v4282_v23 = vpop.permute.xlu1 %4281 }
 0x79c   :  { %3924 = vmatmul.mubr.msk.bf16.gmra.mrb[60].mxu0 %vm508_vm0, %v5611_v42 }
 0x79d   :  { %3927 = vmatprep.mubr.msk.bf16.mxu0 %vm508_vm0, %v5631_v7  ;;  %v4317_v45 = vpop.permute.xlu0 %4316  ;;  %v4292_v52 = vpop.permute.xlu1 %4291 }
 0x7a1   :  { %v4322_v6 = vpop.permute.xlu0 %4321  ;;  %v4302_v50 = vpop.permute.xlu1 %4301 }
 0x7a4   :  { %3928 = vmatmul.mubr.msk.bf16.gmra.mrb[64].mxu0 %vm508_vm0, %v5617_v21 }
 0x7a5   :  { %3931 = vmatprep.mubr.msk.bf16.mxu0 %vm508_vm0, %v2564_v17  ;;  %v4327_v11 = vpop.permute.xlu0 %4326 }
 0x7ac   :  { %3932 = vmatmul.mubr.msk.bf16.gmra.mrb[68].mxu0 %vm508_vm0, %v5629_v53 }
 0x7ad   :  { %3935 = vmatprep.mubr.msk.bf16.mxu0 %vm508_vm0, %v5638_v56 }
 0x7b4   :  { %3936 = vmatmul.mubr.msk.bf16.gmra.mrb[72].mxu0 %vm508_vm0, %v2570_v57 }
 0x7b5   :  { %3939 = vmatprep.mubr.msk.bf16.mxu0 %vm508_vm0, %v2572_v33 }
 0x7bc   :  { %3940 = vmatmul.mubr.msk.bf16.gmra.mrb[76].mxu0 %vm508_vm0, %v2574_v35 }
 0x7bd   :  { %3979 = vmatprep.mubr.msk.bf16.mxu0 %vm4784_vm1, %v4778_v14 }
 0x7f8   :  { %v3310_v30 = vpop.permute.xlu0 %3309 }
 0x7f9   :  { %4015 = vpush %v3310_v30 }
 0x82a   :  { %s4016_s3 = spop %4015 }
 0x857   :  { %v1942_v13 = vpop.f32.mrb[52].mxu0 }
 0x858   :  { %v1949_v38 = vpack.c.bf16 %v1942_v13, %v1942_v13  ;;  %v3897_v42 = vpop.f32.mrb[53].mxu0 }
 0x859   :  { %v1945_v21 = vpop.f32.mrb[54].mxu0 }
 0x85a   :  { %v3898_v24 = vpop.f32.mrb[55].mxu0  ;;  %3908 = vmatmul.mubr.msk.bf16.vlgmr.msra.gmra.mrb[28].mxu1 %vm508_vm0, %v1949_v38 }
 0x867   :  { %v3921_v9 = vpop.f32.mrb[56].mxu0 }
 0x868   :  { %v2858_v47 = vpop.f32.mrb[57].mxu0  ;;  %v4601_v5 = vadd.low.f32.bf16 %v3921_v9, %v4277_v58 }
 0x869   :  { %v3922_v40 = vpop.f32.mrb[58].mxu0  ;;  %v4603_v25 = vadd.low.f32.bf16 %v2858_v47, %v4271_v2 }
 0x86a   :  { %v4602_v41 = vadd.high.f32.bf16 %v3922_v40, %v4277_v58  ;;  %v2861_v53 = vpop.f32.mrb[59].mxu0 }
 0x86b   :  { %v4604_v7 = vadd.high.f32.bf16 %v2861_v53, %v4271_v2 }
 0x86c   :  { %v2954_v54 = vpack.c.bf16 %v4602_v41, %v4601_v5 }
 0x86d   :  { %v2953_v36 = vpack.c.bf16 %v4604_v7, %v4603_v25 }
 0x86f   :  { %v3925_v15 = vpop.f32.mrb[60].mxu0  ;;  %2961 = vxpose.xlu1.c.b16.start [1/4] (short) (narrow) %v2953_v36, 64 }
 0x870   :  { %v2874_v26 = vpop.f32.mrb[61].mxu0  ;;  %v4605_v56 = vadd.low.f32.bf16 %v3925_v15, %v4287_v59 }
 0x871   :  { %v3926_v46 = vpop.f32.mrb[62].mxu0  ;;  %v4607_v62 = vadd.low.f32.bf16 %v2874_v26, %v4282_v23 }
 0x872   :  { %v4606_v3 = vadd.high.f32.bf16 %v3926_v46, %v4287_v59  ;;  %v2877_v17 = vpop.f32.mrb[63].mxu0  ;;  %v3537_v46 = vld [vmem:[#allocation10 + $0x53] ss:$0 sm:$0xff] }
 0x873   :  { %v4608_v61 = vadd.high.f32.bf16 %v2877_v17, %v4282_v23  ;;  %2962 = vxpose.xlu1.c.b16.cont [2/4] (short) (narrow) %v2954_v54, 64 }
 0x874   :  { %v2956_v16 = vpack.c.bf16 %v4606_v3, %v4605_v56  ;;  %v1018_v56 = vadd.f32 %v3537_v46, %v5479_v39  ;;  %v3573_v3 = vld [vmem:[#allocation10 + $0x54] ss:$0 sm:$0xff] }
 0x875   :  { %v2955_v0 = vpack.c.bf16 %v4608_v61, %v4607_v62 }
 0x876   :  { %v1023_v62 = vmax.f32 %v1018_v56, 0.0 }
 0x877   :  { %v3929_v4 = vpop.f32.mrb[64].mxu0  ;;  %2963 = vxpose.xlu1.c.b16.cont [3/4] (short) (narrow) %v2955_v0, 64 }
 0x878   :  { %v2890_v57 = vpop.f32.mrb[65].mxu0  ;;  %v4609_v44 = vadd.low.f32.bf16 %v3929_v4, %v4297_v10  ;;  %v3312_v4 = vstv %s4016_s3 }
 0x879   :  { %v3930_v1 = vpop.f32.mrb[66].mxu0  ;;  %v4611_v33 = vadd.low.f32.bf16 %v2890_v57, %v4292_v52 }
 0x87a   :  { %v4610_v20 = vadd.high.f32.bf16 %v3930_v1, %v4297_v10  ;;  %v2893_v48 = vpop.f32.mrb[67].mxu0 }
 0x87b   :  { %v4612_v32 = vadd.high.f32.bf16 %v2893_v48, %v4292_v52  ;;  %2964 = vxpose.xlu1.c.b16.end [4/4] (short) (narrow) %v2956_v16, 64 }
 0x87c   :  { %v2958_v43 = vpack.c.bf16 %v4610_v20, %v4609_v44 }
 0x87d   :  { %v2957_v18 = vpack.c.bf16 %v4612_v32, %v4611_v33 }
 0x87f   :  { %v3933_v35 = vpop.f32.mrb[68].mxu0  ;;  %3943 = vmatprep.subr.bf16.mxu1 %v2957_v18 }
 0x880   :  { %v2906_v29 = vpop.f32.mrb[69].mxu0  ;;  %3944 = vmatpush3.bf16.msra.mxu1 %v2957_v18  ;;  %v4613_v37 = vadd.low.f32.bf16 %v3933_v35, %v4307_v19 }
 0x881   :  { %v3934_v49 = vpop.f32.mrb[70].mxu0  ;;  %3945 = vmatprep.subr.bf16.mxu1 %v2958_v43  ;;  %v4615_v12 = vadd.low.f32.bf16 %v2906_v29, %v4302_v50 }
 0x882   :  { %v4614_v63 = vadd.high.f32.bf16 %v3934_v49, %v4307_v19  ;;  %v2909_v55 = vpop.f32.mrb[71].mxu0 }
 0x883   :  { %v4616_v22 = vadd.high.f32.bf16 %v2909_v55, %v4302_v50 }
 0x884   :  { %v2960_v28 = vpack.c.bf16 %v4614_v63, %v4613_v37  ;;  %3946 = vmatpush3.bf16.msra.mxu1 %v2958_v43 }
 0x885   :  { %v2959_v60 = vpack.c.bf16 %v4616_v22, %v4615_v12 }
 0x887   :  { %v3937_v31 = vpop.f32.mrb[72].mxu0  ;;  %3947 = vmatprep.subr.bf16.mxu1 %v2959_v60 }
 0x888   :  { %v2922_v8 = vpop.f32.mrb[73].mxu0  ;;  %3948 = vmatpush3.bf16.msra.mxu1 %v2959_v60  ;;  %v4617_v2 = vadd.low.f32.bf16 %v3937_v31, %v4317_v45 }
 0x889   :  { %v3938_v27 = vpop.f32.mrb[74].mxu0  ;;  %3949 = vmatprep.subr.bf16.mxu1 %v2960_v28  ;;  %v4619_v38 = vadd.low.f32.bf16 %v2922_v8, %v5683_v51 }
 0x88a   :  { %v4618_v59 = vadd.high.f32.bf16 %v3938_v27, %v4317_v45  ;;  %v2925_v13 = vpop.f32.mrb[75].mxu0 }
 0x88b   :  { %v4620_v42 = vadd.high.f32.bf16 %v2925_v13, %v5683_v51 }
 0x88c   :  { %v3163_v21 = vpack.c.bf16 %v4618_v59, %v4617_v2  ;;  %3950 = vmatpush3.bf16.msra.mxu1 %v2960_v28 }
 0x88d   :  { %v3162_v24 = vpack.c.bf16 %v4620_v42, %v4619_v38  ;;  %3959 = vmatprep.subr.bf16.mxu1 %v4778_v14 }
 0x88e   :  { %v3173_v7 = vsel %vm508_vm0, %v3163_v21, 0 }
 0x88f   :  { %v3941_v10 = vpop.f32.mrb[76].mxu0  ;;  %v3170_v19 = vsel %vm508_vm0, %v3162_v24, 0 }
 0x890   :  { %v2938_v58 = vpop.f32.mrb[77].mxu0  ;;  %3972 = vmatpush3.bf16.xpose.msra.mxu0 %v3170_v19  ;;  %v4621_v47 = vadd.low.f32.bf16 %v3941_v10, %v4327_v11 }
 0x891   :  { %v3942_v9 = vpop.f32.mrb[78].mxu0  ;;  %3973 = vmatprep.subr.bf16.mxu0 %v4778_v14  ;;  %v4623_v41 = vadd.low.f32.bf16 %v2938_v58, %v4322_v6 }
 0x892   :  { %v4622_v40 = vadd.high.f32.bf16 %v3942_v9, %v4327_v11  ;;  %v2941_v5 = vpop.f32.mrb[79].mxu0 }
 0x893   :  { %v4624_v53 = vadd.high.f32.bf16 %v2941_v5, %v4322_v6  ;;  %v3306_v6 = vstv %s4014_s8 }
 0x894   :  { %v3165_v25 = vpack.c.bf16 %v4622_v40, %v4621_v47  ;;  %v3308_v1 = vmul.f32 %v3306_v6, %v1023_v62 }
 0x895   :  { %v3164_v51 = vpack.c.bf16 %v4624_v53, %v4623_v41 }
 0x896   :  { %v3179_v36 = vsel %vm508_vm0, %v3165_v25, 0 }
 0x897   :  { %v3176_v54 = vsel %vm508_vm0, %v3164_v51, 0 }
 0x898   :  { %3974 = vmatpush3.bf16.xpose.msra.mxu0 %v3173_v7 }
 0x899   :  { %3975 = vmatprep.subr.bf16.mxu0 %v4778_v14 }
 0x8a0   :  { %3976 = vmatpush3.bf16.xpose.msra.mxu0 %v3176_v54 }
 0x8a1   :  { %3977 = vmatprep.subr.bf16.mxu0 %v4778_v14 }
 0x8a8   :  { %3978 = vmatpush3.bf16.xpose.msra.mxu0 %v3179_v36 }
 0x8a9   :  { %3995 = vmatprep.subr.bf16.mxu0 %v4778_v14 }
 0x8d5   :  { %v2969_v45 = vpop.trf.xlu1 }
 0x8d6   :  { %3951 = vmatprep.mubr.msk.bf16.mxu1 %vm508_vm0, %v2969_v45 }
 0x8d9   :  { %v2970_v15 = vpop.trf.xlu1 }
 0x8da   :  { %3952 = vmatmul.mubr.msk.bf16.vlgmr.msra.gmra.mrb[32].mxu1 %vm508_vm0, %v2970_v15 }
 0x8dd   :  { %v2971_v23 = vpop.trf.xlu1 }
 0x8de   :  { %3955 = vmatprep.mubr.msk.bf16.mxu1 %vm508_vm0, %v2971_v23 }
 0x8e1   :  { %v2972_v26 = vpop.trf.xlu1 }
 0x8e2   :  { %3956 = vmatmul.mubr.msk.bf16.gmra.mrb[36].mxu1 %vm508_vm0, %v2972_v26 }
 0x8e3   :  { %3967 = vmatprep.mubr.msk.bf16.mxu1 %vm4784_vm1, %v4778_v14 }
 0x92d   :  { %v2023_v17 = vpop.f32.mrb[28].mxu1 }
 0x92e   :  { %v2024_v61 = vadd.f32 %v3573_v3, %v2023_v17  ;;  %v3909_v16 = vpop.f32.mrb[29].mxu1 }
 0x92f   :  { %v2026_v0 = vpop.f32.mrb[30].mxu1 }
 0x930   :  { %v2029_v52 = vmax.f32 %v2024_v61, 0.0  ;;  %v3910_v57 = vpop.f32.mrb[31].mxu1 }
 0x932   :  { %v3314_v44 = vmul.f32 %v3312_v4, %v2029_v52 }
 0x934   :  { %v5703_v20 = vadd.f32 %v3314_v44, %v3308_v1 }
 0x9ad   :  { %v3953_v48 = vpop.f32.mrb[32].mxu1 }
 0x9ae   :  { %v3056_v11 = vmul.f32 0.125, %v3953_v48  ;;  %v3023_v33 = vpop.f32.mrb[33].mxu1 }
 0x9af   :  { %v3054_v39 = vmul.f32 0.125, %v3023_v33  ;;  %v3954_v32 = vpop.f32.mrb[34].mxu1 }
 0x9b0   :  { %v3064_v43 = vsub.f32 0.0, %v3056_v11  ;;  %v3057_v18 = vmul.f32 0.125, %v3954_v32  ;;  %v3026_v50 = vpop.f32.mrb[35].mxu1 }
 0x9b1   :  { %v3062_v35 = vsub.f32 0.0, %v3054_v39  ;;  %v3055_v30 = vmul.f32 0.125, %v3026_v50  ;;  %v3110_v50 = vld [vmem:[#allocation10 + $0x68] sm:$0x3] }
 0x9b2   :  { %v3072_v29 = vmin.f32 %v3064_v43, 60.0  ;;  %v3065_v49 = vsub.f32 0.0, %v3057_v18 }
 0x9b3   :  { %v3070_v37 = vmin.f32 %v3062_v35, 60.0  ;;  %v3063_v63 = vsub.f32 0.0, %v3055_v30  ;;  %v3112_v35 = vpack.c.bf16 %v3110_v50, %v3110_v50  ;;  %v4374_v30 = vld [vmem:[#allocation8 + $0x160] sm:$0xff]  }
 0x9b4   :  { %v3082_v55 = vmul.f32 1.442695, %v3072_v29  ;;  %v3073_v12 = vmin.f32 %v3065_v49, 60.0  ;;  %v3251_v29 = vsel %vm508_vm0, %v4374_v30, 0  ;;  %v4375_v49 = vld [vmem:[#allocation8 + $0x168] sm:$0xff]  }
 0x9b5   :  { %v3078_v22 = vmul.f32 1.442695, %v3070_v37  ;;  %v3071_v28 = vmin.f32 %v3063_v63, 60.0  ;;  %v3957_v60 = vpop.f32.mrb[36].mxu1  ;;  %v3254_v37 = vsel %vm508_vm0, %v4375_v49, 0  ;;  %v4376_v63 = vld [vmem:[#allocation8 + $0x170] sm:$0xff]  }
 0x9b6   :  { %4478 = vpow2.f32 %v3082_v55  ;;  %v3084_v31 = vmul.f32 1.442695, %v3073_v12  ;;  %v3060_v8 = vmul.f32 0.125, %v3957_v60  ;;  %v3039_v27 = vpop.f32.mrb[37].mxu1  ;;  %v3257_v55 = vsel %vm508_vm0, %v4376_v63, 0  ;;  %v4377_v12 = vld [vmem:[#allocation8 + $0x178] sm:$0xff]  }
 0x9b7   :  { %4480 = vpow2.f32 %v3078_v22  ;;  %v3080_v2 = vmul.f32 1.442695, %v3071_v28  ;;  %v3058_v59 = vmul.f32 0.125, %v3039_v27  ;;  %v3958_v13 = vpop.f32.mrb[38].mxu1  ;;  %v3260_v22 = vsel %vm508_vm0, %v4377_v12, 0 }
 0x9b8   :  { %4482 = vpow2.f32 %v3084_v31  ;;  %v3068_v38 = vsub.f32 0.0, %v3060_v8  ;;  %v3061_v42 = vmul.f32 0.125, %v3958_v13  ;;  %v3042_v21 = vpop.f32.mrb[39].mxu1  ;;  %v3111_v28 = vld [vmem:[#allocation10 + $0x6a] sm:$0x3]  ;;  %v3317_v13 = vpop.permute.xlu0 %3316 }
 0x9b9   :  { %4484 = vpow2.f32 %v3080_v2  ;;  %v3066_v24 = vsub.f32 0.0, %v3058_v59  ;;  %v3059_v10 = vmul.f32 0.125, %v3042_v21  ;;  %4017 = vpush %v3317_v13 }
 0x9ba   :  { %v3076_v19 = vmin.f32 %v3068_v38, 60.0  ;;  %v3069_v58 = vsub.f32 0.0, %v3061_v42 }
 0x9bb   :  { %v3074_v9 = vmin.f32 %v3066_v24, 60.0  ;;  %v3067_v47 = vsub.f32 0.0, %v3059_v10 }
 0x9bc   :  { %v3090_v40 = vmul.f32 1.442695, %v3076_v19  ;;  %v3077_v5 = vmin.f32 %v3069_v58, 60.0  ;;  %v3324_v38 = vpop.permute.xlu0 %3323  ;;  %v3329_v58 = vld [vmem:[#allocation10] sm:$0xff] }
 0x9bd   :  { %v3086_v41 = vmul.f32 1.442695, %v3074_v9  ;;  %v3075_v53 = vmin.f32 %v3067_v47, 60.0  ;;  %4019 = vpush %v3324_v38  ;;  %v3330_v9 = vld [vmem:[#allocation10 + $0x8] sm:$0xff]  ;;  %v3472_v38 = vld [vmem:[#allocation5] sm:$0xff] }
 0x9be   :  { %4486 = vpow2.f32 %v3090_v40  ;;  %v3092_v25 = vmul.f32 1.442695, %v3077_v5  ;;  %v3342_v47 = vpack.c.bf16 %v3330_v9, %v3329_v58  ;;  %v3332_v5 = vld [vmem:[#allocation10 + $0x18] sm:$0xff] }
 0x9bf   :  { %4488 = vpow2.f32 %v3086_v41  ;;  %v3088_v51 = vmul.f32 1.442695, %v3075_v53  ;;  %v3395_v41 = vpack.c.bf16 %v3332_v5, %v3331_v34  ;;  %v3333_v53 = vld [vmem:[#allocation10 + $0x20] sm:$0xff] }
 0x9c0   :  { %v4479_v7 = vpop.eup %4478  ;;  %4490 = vpow2.f32 %v3092_v25  ;;  %v3351_v40 = vsel %vm508_vm0, %v3342_v47, 0  ;;  %v3334_v25 = vld [vmem:[#allocation10 + $0x28] sm:$0xff] }
 0x9c1   :  { %v4481_v54 = vpop.eup %4480  ;;  %v3096_v36 = vadd.f32 1.0, %v4479_v7  ;;  %4492 = vpow2.f32 %v3088_v51  ;;  %v3408_v51 = vsel %vm3403_vm2, %v3395_v41, 0  ;;  %v3396_v7 = vpack.c.bf16 %v3334_v25, %v3333_v53 }
 0x9c2   :  { %v4483_v45 = vpop.eup %4482  ;;  %v3094_v15 = vadd.f32 1.0, %v4481_v54 }
 0x9c3   :  { %v4485_v23 = vpop.eup %4484  ;;  %4494 = vrcp.f32 %v3096_v36  ;;  %v3097_v26 = vadd.f32 1.0, %v4483_v45  ;;  %v3411_v54 = vsel %vm3403_vm2, %v3396_v7, 0  ;;  %v3335_v36 = vld [vmem:[#allocation10 + $0x30] sm:$0xff]  ;;  %v3336_v45 = vld [vmem:[#allocation10 + $0x38] sm:$0xff] }
 0x9c4   :  { %4496 = vrcp.f32 %v3094_v15  ;;  %v3095_v46 = vadd.f32 1.0, %v4485_v23  ;;  %v3397_v15 = vpack.c.bf16 %v3336_v45, %v3335_v36 }
 0x9c5   :  { %4498 = vrcp.f32 %v3097_v26  ;;  %v3609_v26 = vld [vmem:[#allocation10 + $0x55] ss:$0 sm:$0xff] }
 0x9c6   :  { %4500 = vrcp.f32 %v3095_v46  ;;  %v3414_v23 = vsel %vm3403_vm2, %v3397_v15, 0 }
 0x9c8   :  { %v4487_v56 = vpop.eup %4486 }
 0x9c9   :  { %v4489_v3 = vpop.eup %4488  ;;  %v3100_v17 = vadd.f32 1.0, %v4487_v56 }
 0x9ca   :  { %v4491_v62 = vpop.eup %4490  ;;  %v3098_v61 = vadd.f32 1.0, %v4489_v3 }
 0x9cb   :  { %v4493_v16 = vpop.eup %4492  ;;  %4502 = vrcp.f32 %v3100_v17  ;;  %v3101_v6 = vadd.f32 1.0, %v4491_v62 }
 0x9cc   :  { %4504 = vrcp.f32 %v3098_v61  ;;  %v3099_v0 = vadd.f32 1.0, %v4493_v16 }
 0x9cd   :  { %v4495_v4 = vpop.eup %4494  ;;  %4506 = vrcp.f32 %v3101_v6 }
 0x9ce   :  { %v4497_v52 = vpop.eup %4496  ;;  %4508 = vrcp.f32 %v3099_v0 }
 0x9cf   :  { %v4499_v57 = vpop.eup %4498 }
 0x9d0   :  { %v4501_v1 = vpop.eup %4500  ;;  %v3114_v44 = vpack.c.bf16 %v4499_v57, %v4495_v4 }
 0x9d1   :  { %v3113_v48 = vpack.c.bf16 %v4501_v1, %v4497_v52  ;;  %v3337_v1 = vld [vmem:[#allocation10 + $0x40] sm:$0xff] }
 0x9d3   :  { %3960 = vmatpush3.bf16.msra.mxu1 %v3113_v48 }
 0x9d4   :  { %3961 = vmatprep.subr.bf16.mxu1 %v4778_v14 }
 0x9d5   :  { %v4503_v11 = vpop.eup %4502 }
 0x9d6   :  { %v4505_v33 = vpop.eup %4504 }
 0x9d7   :  { %v4507_v39 = vpop.eup %4506  ;;  %3962 = vmatpush3.bf16.msra.mxu1 %v3114_v44 }
 0x9d8   :  { %v4509_v32 = vpop.eup %4508  ;;  %3963 = vmatprep.subr.bf16.mxu1 %v4778_v14  ;;  %v3116_v43 = vpack.c.bf16 %v4507_v39, %v4503_v11  ;;  %v3615_v11 = vld [vmem:[#allocation10 + $0x50] ss:$0 sm:$0xff] }
 0x9d9   :  { %v3115_v18 = vpack.c.bf16 %v4509_v32, %v4505_v33 }
 0x9db   :  { %3964 = vmatpush3.bf16.msra.mxu1 %v3115_v18 }
 0x9dc   :  { %3965 = vmatprep.subr.bf16.mxu1 %v4778_v14 }
 0x9df   :  { %3966 = vmatpush3.bf16.msra.mxu1 %v3116_v43 }
 0x9e0   :  { %3983 = vmatprep.subr.bf16.mxu1 %v4778_v14 }
 0x9e2   :  { %3968 = vmatmul.mubr.msk.bf16.vlgmr.msra.gmra.mrb[40].mxu1 %vm508_vm0, %v3112_v35 }
 0x9e3   :  { %3991 = vmatprep.mubr.msk.bf16.mxu1 %vm4784_vm1, %v4778_v14 }
 0x9e8   :  { %3984 = vmatpush3.bf16.xpose.msra.mxu1 %v3251_v29 }
 0x9e9   :  { %3985 = vmatprep.subr.bf16.mxu1 %v4778_v14 }
 0x9ea   :  { %s4018_s10 = spop %4017 }
 0x9eb   :  { %v3319_v62 = vstv %s4018_s10 }
 0x9ee   :  { %s4020_s11 = spop %4019 }
 0x9ef   :  { %v3326_v0 = vstv %s4020_s11 }
 0x9f0   :  { %3986 = vmatpush3.bf16.xpose.msra.mxu1 %v3254_v37 }
 0x9f1   :  { %3987 = vmatprep.subr.bf16.mxu1 %v4778_v14 }
 0x9f8   :  { %3988 = vmatpush3.bf16.xpose.msra.mxu1 %v3257_v55 }
 0x9f9   :  { %3989 = vmatprep.subr.bf16.mxu1 %v4778_v14 }
 0xa00   :  { %3990 = vmatpush3.bf16.xpose.msra.mxu1 %v3260_v22 }
 0xa01   :  { %4001 = vmatprep.subr.bf16.mxu1 %v4778_v14 }
 0xab5   :  { %v3154_v60 = vpop.f32.mrb[40].mxu1 }
 0xab6   :  { %v3160_v31 = vmul.f32 %v3154_v60, %v3111_v28  ;;  %v3969_v8 = vpop.f32.mrb[41].mxu1 }
 0xab7   :  { %v3157_v27 = vpop.f32.mrb[42].mxu1 }
 0xab8   :  { %v3161_v2 = vpack.c.bf16 %v3160_v31, %v3160_v31  ;;  %v3970_v59 = vpop.f32.mrb[43].mxu1  ;;  %v3476_v27 = vlaneseq }
 0xaba   :  { %3980 = vmatmul.mubr.msk.bf16.vlgmr.msra.gmra.mrb[80].mxu0 %vm508_vm0, %v3161_v2  ;;  %v3477_v2 = vshrl.u32 %v3476_v27, 7 }
 0xabb   :  { %3997 = vmatprep.mubr.msk.bf16.mxu0 %vm4784_vm1, %v4778_v14  ;;  %3996 = vmatpush3.bf16.xpose.msra.mxu0 %v3351_v40 }
 0xabc   :  { %v3478_v59 = vsub.s32 0, %v3477_v2 }
 0xb8d   :  { %v3215_v42 = vpop.f32.mrb[80].mxu0 }
 0xb8e   :  { %v3222_v21 = vpack.c.bf16 %v3215_v42, %v3215_v42  ;;  %v3981_v24 = vpop.f32.mrb[81].mxu0 }
 0xb8f   :  { %v3218_v10 = vpop.f32.mrb[82].mxu0  ;;  %v3474_v24 = vld [vmem:[#allocation5 + $0x10] sm:$0xff] }
 0xb90   :  { %v3982_v19 = vpop.f32.mrb[83].mxu0  ;;  %3992 = vmatmul.mubr.msk.bf16.vlgmr.msra.gmra.mrb[44].mxu1 %vm508_vm0, %v3222_v21  ;;  %v3473_v21 = vld [vmem:[#allocation5 + $0x8] sm:$0xff]  ;;  %v3475_v10 = vld [vmem:[#allocation5 + $0x18] sm:$0xff] }
 0xb91   :  { %4009 = vmatprep.mubr.msk.bf16.mxu1 %vm4784_vm1, %v4778_v14  ;;  %4002 = vmatpush3.bf16.xpose.msra.mxu1 %v3408_v51 }
 0xb92   :  { %4003 = vmatprep.subr.bf16.mxu1 %v4778_v14 }
 0xb99   :  { %4004 = vmatpush3.bf16.xpose.msra.mxu1 %v3411_v54 }
 0xb9a   :  { %4005 = vmatprep.subr.bf16.mxu1 %v4778_v14 }
 0xba1   :  { %4006 = vmatpush3.bf16.xpose.msra.mxu1 %v3414_v23 }
 0xba2   :  { %4007 = vmatprep.subr.bf16.mxu1 %v4778_v14  ;;  %v3338_v14 = vld [vmem:[#allocation10 + $0x48] sm:$0xff] }
 0xba3   :  { %v3398_v44 = vpack.c.bf16 %v3338_v14, %v3337_v1 }
 0xba5   :  { %v3417_v48 = vsel %vm3403_vm2, %v3398_v44, 0 }
 0xba9   :  { %4008 = vmatpush3.bf16.xpose.msra.mxu1 %v3417_v48 }
 0xc63   :  { %v3296_v46 = vpop.f32.mrb[44].mxu1 }
 0xc64   :  { %v3297_v56 = vadd.f32 %v3609_v26, %v3296_v46  ;;  %v3993_v3 = vpop.f32.mrb[45].mxu1 }
 0xc65   :  { %v3299_v17 = vpop.f32.mrb[46].mxu1 }
 0xc66   :  { %v3302_v61 = vmax.f32 %v3297_v56, 0.0  ;;  %v3994_v16 = vpop.f32.mrb[47].mxu1 }
 0xc68   :  { %v3321_v6 = vmul.f32 %v3319_v62, %v3302_v61 }
 0xc6a   :  { %v3322_v4 = vadd.f32 %v3321_v6, %v5703_v20  ;;  %v3617_v20 = vld [vmem:[#allocation10 + $0x51] ss:$0 sm:$0xff] }
 0xc6c   :  { %v3328_v52 = vadd.f32 %v3326_v0, %v3322_v4 }
 0xc6e   :  { %v3341_v57 = vpack.c.bf16 %v3328_v52, %v3328_v52 }
 0xc70   :  { %3998 = vmatmul.mubr.msk.bf16.vlgmr.msra.gmra.mrb[84].mxu0 %vm508_vm0, %v3341_v57 }
 0xd43   :  { %v3387_v33 = vpop.f32.mrb[84].mxu0 }
 0xd44   :  { %v3388_v39 = vadd.f32 %v3615_v11, %v3387_v33  ;;  %v3999_v32 = vpop.f32.mrb[85].mxu0 }
 0xd45   :  { %v3390_v43 = vpop.f32.mrb[86].mxu0 }
 0xd46   :  { %v3393_v18 = vmax.f32 %v3388_v39, 0.0  ;;  %v4000_v50 = vpop.f32.mrb[87].mxu0 }
 0xd48   :  { %v3394_v35 = vpack.c.bf16 %v3393_v18, %v3393_v18 }
 0xd4a   :  { %4010 = vmatmul.mubr.msk.bf16.vlgmr.msra.gmra.mrb[48].mxu1 %vm3403_vm2, %v3394_v35 }
 0xe1d   :  { %v3453_v30 = vpop.f32.mrb[48].mxu1 }
 0xe1e   :  { %v3454_v29 = vadd.f32 %v3617_v20, %v3453_v30  ;;  %v4011_v49 = vpop.f32.mrb[49].mxu1 }
 0xe1f   :  { %v3456_v37 = vpop.f32.mrb[50].mxu1 }
 0xe20   :  { %v3459_v63 = vsub.f32 0.0, %v3454_v29  ;;  %v4012_v55 = vpop.f32.mrb[51].mxu1 }
 0xe22   :  { %v3460_v12 = vmin.f32 %v3459_v63, 60.0 }
 0xe24   :  { %v3461_v22 = vmul.f32 1.442695, %v3460_v12 }
 0xe26   :  { %4510 = vpow2.f32 %v3461_v22 }
 0xe30   :  { %v4511_v28 = vpop.eup %4510 }
 0xe31   :  { %v3463_v60 = vadd.f32 1.0, %v4511_v28 }
 0xe33   :  { %4512 = vrcp.f32 %v3463_v60 }
 0xe3d   :  { %v4513_v31 = vpop.eup %4512 }
 0xe3e   :  { %v3467_v8 = vrot.slane %v4513_v31, 1 }
 0xe40   :  { %3468 = vrot.lane.b32.xlu0 %v3467_v8, %s4769_s1  ;;  %s4735_s1 = scalar_lea.vmem %s3494_s13, 512 }
 0xe41   :  { %p4736_p12 = scmp.ne.s32.totalorder %s3494_s13, %s4735_s1  ;;  %p4741_p0 = scmp.lt.s32.totalorder %s4735_s1, %s4735_s1 }
 0xe43   :  { %p4742_p1 = por %p4741_p0, %p4740_p13 }
 0xe45   :  { %p4743_p2 = pnand %p4742_p1, %p4736_p12 }
 0xeb2   :  { %v3469_v13 = vpop.permute.xlu0 %3468 }
 0xeb3   :  { %v3471_v42 = vsel %vm508_vm0, %v4513_v31, %v3469_v13 }
 0xeb4   :  { %v3479_v19 = vrot.slane %v3471_v42, %v3478_v59 }
 0xeb6   :  { %v3480_v58 = vmul.f32 %v3479_v19, %v3472_v38  ;;  %v3481_v9 = vmul.f32 %v3479_v19, %v3473_v21  ;;  %v3482_v47 = vmul.f32 %v3479_v19, %v3474_v24  ;;  %v3483_v40 = vmul.f32 %v3479_v19, %v3475_v10 }
 0xeb8   :  { %3484 = vst [vmem:[#allocation11] sm:$0xff] %v3480_v58  ;;  %3485 = vst [vmem:[#allocation11 + $0x8] sm:$0xff] %v3481_v9 }
 0xeb9   :  { %3486 = vst [vmem:[#allocation11 + $0x10] sm:$0xff] %v3482_v47  ;;  %3487 = vst [vmem:[#allocation11 + $0x18] sm:$0xff] %v3483_v40 }
 0xeba   :  { %4746 = shalt.err (!%p4743_p2)
}
 0xebb   :  { %s4747_s16 = scalar_lea.hbm %s5761_s5, 512 }
 0xebc   :  { %p4748_p3 = scmp.ne.s32.totalorder %s5761_s5, %s4747_s16  ;;  %p4751_p4 = scmp.lt.u32.totalorder %s4747_s16, %s5761_s5 }
 0xebe   :  { %p4753_p5 = pnand %p4751_p4, %p4748_p3 }
 0xec0   :  { %4756 = shalt.err (!%p4753_p5)
}
 0xec1   :  { %3499 = dma.vmem_to_hbm [thread:$0]  %s3494_s13, 512, %s5761_s5, [#allocation4], %s4767_s30, %s4767_s30, %s4768_s6  }
 0xec2   :  { %4763 = dma.done.wait [#allocation4], 512  }
 0xec3   :  { %4764 = vsyncadd [#allocation4], 4294966784 }
 0xec4   :  { %3503 = vsyncpa [#allocation3], 1 }
 0xec5   :  { %3504 = vsyncpa [#allocation6], 1 }
 0xec6   :  { %3505 = vsyncpa [#allocation9], 1 }
 0xec7   :  { %3506 = vsyncpa [#allocation4], 1 }

</bundles_post_ra>
